<compile_context>
chip_gen: v6e
topology: v6e:2x2x1
jax: 0.10.0
libtpu: 0.0.40
codegen_flags: <defaults>
</compile_context>

<pallas_src>
import functools

import numpy as np

import jax
import jax.numpy as jnp
from jax.experimental import pallas as pl
from jax.experimental.pallas import tpu as pltpu

BN_EPS = 1e-5


# ----------------------------------------------------------------------------
# Core Pallas kernel: shifted row-slab tap-accumulated matmul
#   out = act( sum_t  x[base+off_t : base+off_t+block_m, :] @ w[t]  + b )
# ----------------------------------------------------------------------------
def _pick_block_m(r_out):
    """Output row tile: a multiple of 16 (bf16 sublane packing) dividing r_out,
    targeting ~3-4 grid steps; otherwise a single tile."""
    if r_out >= 128 and r_out % 16 == 0:
        for nt in (4, 3, 2):
            if r_out % nt == 0 and (r_out // nt) % 16 == 0:
                return r_out // nt
    return r_out


def _tap_matmul_kernel(x_ref, w_ref, b_ref, o_ref, *, offs, block_m, win,
                       tiled, act):
    # x_ref: (1, R_in, Cin) bf16   w_ref: (T, Cin, Cout) bf16
    # b_ref: (1, Cout)      f32    o_ref: (1, block_m, Cout) bf16
    if tiled:
        base = pl.multiple_of(pl.program_id(1) * block_m, 16)
    else:
        base = 0
    # One aligned window read + one up-cast per tile; tap windows are static
    # value slices of it (avoids unaligned packed-dtype ref loads).
    xw = x_ref[0, pl.ds(base, win), :].astype(jnp.float32)
    cout = w_ref.shape[-1]
    acc = jnp.zeros((block_m, cout), jnp.float32)
    for t, off in enumerate(offs):                     # static unrolled taps
        patch = xw[off:off + block_m].astype(jnp.bfloat16)
        acc = acc + jnp.dot(patch, w_ref[t], preferred_element_type=jnp.float32)
    acc = acc + b_ref[...]
    if act == "relu":
        acc = jnp.maximum(acc, 0.0)
    elif act == "sigmoid":
        # exp + approximate reciprocal both live in the EUP slot.
        acc = pl.reciprocal(1.0 + jnp.exp(-acc), approx=True)
    o_ref[0] = acc.astype(o_ref.dtype)


def _tap_matmul(x_flat, w_taps, bias, offs, r_out, act):
    """x_flat: (N, R_in, Cin) bf16; w_taps: (T, Cin, Cout) bf16; bias: (1, Cout) f32."""
    N, R_in, Cin = x_flat.shape
    T, _, Cout = w_taps.shape
    max_off = max(offs)
    assert max_off + r_out <= R_in, (max_off, r_out, R_in)
    block_m = _pick_block_m(r_out)
    num_tiles = r_out // block_m
    win = block_m + max_off

    flops = 2 * N * r_out * Cin * Cout * T
    transc = N * r_out * Cout if act == "sigmoid" else 0
    bytes_accessed = (x_flat.size * 2 + w_taps.size * 2 + bias.size * 4
                      + N * r_out * Cout * 2)

    kernel = functools.partial(
        _tap_matmul_kernel, offs=tuple(int(o) for o in offs),
        block_m=block_m, win=win, tiled=num_tiles > 1, act=act)
    return pl.pallas_call(
        kernel,
        out_shape=jax.ShapeDtypeStruct((N, r_out, Cout), jnp.bfloat16),
        grid=(N, num_tiles),
        in_specs=[
            pl.BlockSpec((1, R_in, Cin), lambda n, m: (n, 0, 0)),
            pl.BlockSpec((T, Cin, Cout), lambda n, m: (0, 0, 0)),
            pl.BlockSpec((1, Cout), lambda n, m: (0, 0)),
        ],
        out_specs=pl.BlockSpec((1, block_m, Cout), lambda n, m: (n, m, 0)),
        compiler_params=pltpu.CompilerParams(
            dimension_semantics=("parallel", "parallel"),
            vmem_limit_bytes=32 * 1024 * 1024,
        ),
        cost_estimate=pl.CostEstimate(flops=flops, transcendentals=transc,
                                      bytes_accessed=bytes_accessed),
    )(x_flat, w_taps, bias)


# ----------------------------------------------------------------------------
# Fused encoder head: [fc_mu | fc_var] -> reparameterize -> decoder_input
# ----------------------------------------------------------------------------
def _fc_head_kernel(x_ref, wmu_ref, bmu_ref, wvar_ref, bvar_ref,
                    eps_ref, wd_ref, bd_ref, mu_ref, lv_ref, d_ref):
    x = x_ref[...]                                     # bf16
    mu = jnp.dot(x, wmu_ref[...], preferred_element_type=jnp.float32) + bmu_ref[...]
    lv = jnp.dot(x, wvar_ref[...], preferred_element_type=jnp.float32) + bvar_ref[...]
    z = eps_ref[...] * jnp.exp(0.5 * lv) + mu          # reparameterization trick
    d = jnp.dot(z.astype(jnp.bfloat16), wd_ref[...],
                preferred_element_type=jnp.float32) + bd_ref[...]
    mu_ref[...] = mu
    lv_ref[...] = lv
    d_ref[...] = d.astype(d_ref.dtype)


def fc_head(flat, fc, eps):
    B, F = flat.shape
    L = fc["w_mu"].shape[1]
    D = fc["w_dec"].shape[1]
    vmem = pl.BlockSpec(memory_space=pltpu.MemorySpace.VMEM)
    flops = 2 * B * (2 * F * L + L * D)
    bytes_accessed = (flat.size * 2 + eps.size * 4
                      + (fc["w_mu"].size + fc["w_var"].size + fc["w_dec"].size) * 2
                      + 2 * B * L * 4 + B * D * 2)
    return pl.pallas_call(
        _fc_head_kernel,
        out_shape=(jax.ShapeDtypeStruct((B, L), jnp.float32),
                   jax.ShapeDtypeStruct((B, L), jnp.float32),
                   jax.ShapeDtypeStruct((B, D), jnp.bfloat16)),
        in_specs=[vmem] * 8,
        out_specs=(vmem, vmem, vmem),
        compiler_params=pltpu.CompilerParams(vmem_limit_bytes=32 * 1024 * 1024),
        cost_estimate=pl.CostEstimate(flops=flops, transcendentals=B * L,
                                      bytes_accessed=bytes_accessed),
    )(flat, fc["w_mu"], fc["b_mu"], fc["w_var"], fc["b_var"],
      eps, fc["w_dec"], fc["b_dec"])


# ----------------------------------------------------------------------------
# One-time parameter preparation (hoisted out of the traced forward)
# ----------------------------------------------------------------------------
def _fold_bn(w_taps, b, bn):
    """Fold eval-mode BatchNorm into (T, Cin, Cout) tap weights, in f32."""
    gamma, beta, r_mean, r_var = bn
    scale = gamma / jnp.sqrt(r_var + BN_EPS)
    return w_taps * scale[None, None, :], b * scale + (beta - r_mean * scale)


# Sub-pixel decomposition of ConvTranspose2d(k=3, s=2, p=1, op=1):
#   (i, j) -> (output parity g = dy*2+dx, input row shift ay, col shift ax)
_CONVT_TAP_INFO = {
    (1, 1): (0, 0, 0),
    (1, 2): (1, 0, 0), (1, 0): (1, 0, 1),
    (2, 1): (2, 0, 0), (0, 1): (2, 1, 0),
    (2, 2): (3, 0, 0), (2, 0): (3, 0, 1), (0, 2): (3, 1, 0), (0, 0): (3, 1, 1),
}


def _prep_convt(wt_iohw, bias, bn):
    """ConvTranspose2d weight (Cin, Cout, 3, 3) -> parity-lane-packed bf16 taps."""
    cin, cout = wt_iohw.shape[0], wt_iohw.shape[1]
    w_taps = jnp.transpose(wt_iohw, (2, 3, 0, 1)).reshape(9, cin, cout)
    if bn is not None:
        w_taps, bias = _fold_bn(w_taps, bias, bn)
    # Pack each tap's (Cin, Cout) block into the lane slot of its output parity.
    # TODO(synk): for 4*Cout > 128 use dense per-parity matmuls instead.
    w_packed = jnp.zeros((9, cin, 4 * cout), jnp.float32)
    for i in range(3):
        for j in range(3):
            g, _, _ = _CONVT_TAP_INFO[(i, j)]
            t = i * 3 + j
            w_packed = w_packed.at[t, :, g * cout:(g + 1) * cout].set(w_taps[t])
    b_packed = jnp.tile(bias, 4).reshape(1, 4 * cout)
    return {"w": w_packed.astype(jnp.bfloat16), "b": b_packed}


def prepare_params(params, in_channels, hidden_dims, enc_h, enc_w):
    """BN folding, tap transposes, parity packing, flatten-order perms, bf16 casts."""
    prep = {}

    enc = []
    cin = in_channels
    for layer in params["encoder"]:
        cout = layer["w"].shape[0]
        w_taps = jnp.transpose(layer["w"], (2, 3, 1, 0)).reshape(9, cin, cout)
        w_taps, b = _fold_bn(w_taps, layer["b"], layer["bn"])
        enc.append({"w": w_taps.astype(jnp.bfloat16), "b": b.reshape(1, cout)})
        cin = cout
    prep["encoder"] = enc

    # Fold torch.flatten's (C,H,W) order into the fc weights so the forward can
    # flatten the NHWC encoder output directly (no transposes around fc head).
    ce = hidden_dims[-1]
    feat = ce * enc_h * enc_w
    perm = np.transpose(np.arange(feat).reshape(ce, enc_h, enc_w),
                        (1, 2, 0)).reshape(feat)
    perm = jnp.asarray(perm, jnp.int32)
    lat = params["fc_mu"]["w"].shape[1]
    prep["fc"] = {
        "w_mu": params["fc_mu"]["w"][perm, :].astype(jnp.bfloat16),
        "b_mu": params["fc_mu"]["b"].reshape(1, lat),
        "w_var": params["fc_var"]["w"][perm, :].astype(jnp.bfloat16),
        "b_var": params["fc_var"]["b"].reshape(1, lat),
        "w_dec": params["dec_in"]["w"][:, perm].astype(jnp.bfloat16),
        "b_dec": params["dec_in"]["b"][perm].reshape(1, feat),
    }

    prep["decoder"] = [_prep_convt(l["w"], l["b"], l["bn"])
                       for l in params["decoder"]]
    fl = params["final"]
    prep["final_convt"] = _prep_convt(fl["convt_w"], fl["convt_b"], fl["bn"])
    c0 = hidden_dims[0]
    conv_w = jnp.transpose(fl["conv_w"], (2, 3, 1, 0)).reshape(9, c0, in_channels)
    prep["final_conv"] = {"w": conv_w.astype(jnp.bfloat16),
                          "b": fl["conv_b"].reshape(1, in_channels)}
    return prep


# ----------------------------------------------------------------------------
# Layer wrappers (host side: bf16 layout plumbing only; math is in the kernels)
# ----------------------------------------------------------------------------
def conv2d_s2(x_nhwc, prep, act="relu"):
    """3x3 / stride 2 / pad 1 Conv2d (+folded BN +act) via parity-plane slabs."""
    N, H, W, Cin = x_nhwc.shape
    assert H % 2 == 0 and W % 2 == 0
    Cout = prep["w"].shape[-1]
    Ho, Wo = H // 2, W // 2
    Wp1 = Wo + 1
    Pn = (Ho + 1) * Wp1
    r_out = Ho * Wp1                      # garbage column ox == Wo dropped below

    xp = jnp.pad(x_nhwc, ((0, 0), (1, 1), (1, 1), (0, 0)))
    planes = [xp[:, a::2, b::2, :].reshape(N, Pn, Cin)
              for a in (0, 1) for b in (0, 1)]
    x_flat = jnp.concatenate(planes + [jnp.zeros((N, 8, Cin), x_nhwc.dtype)],
                             axis=1)

    # tap (i,j) reads parity plane (i%2, j%2) at window offset (i//2, j//2)
    offs = tuple((2 * (i % 2) + (j % 2)) * Pn + (i // 2) * Wp1 + (j // 2)
                 for i in range(3) for j in range(3))
    out = _tap_matmul(x_flat, prep["w"], prep["b"], offs, r_out, act)
    return out.reshape(N, Ho, Wp1, Cout)[:, :, :Wo, :]


def conv2d_s1(x_nhwc, prep, act="none"):
    """3x3 / stride 1 / pad 1 Conv2d via shifted-slab matmul."""
    N, H, W, Cin = x_nhwc.shape
    Cout = prep["w"].shape[-1]
    Wp = W + 2
    r_out = H * Wp                        # 2 garbage columns dropped below

    xp = jnp.pad(x_nhwc, ((0, 0), (1, 1), (1, 1), (0, 0))).reshape(
        N, (H + 2) * Wp, Cin)
    x_flat = jnp.concatenate([xp, jnp.zeros((N, 8, Cin), x_nhwc.dtype)], axis=1)

    offs = tuple(i * Wp + j for i in range(3) for j in range(3))
    out = _tap_matmul(x_flat, prep["w"], prep["b"], offs, r_out, act)
    return out.reshape(N, H, Wp, Cout)[:, :, :W, :]


def conv_transpose2d(x_nhwc, prep, act="relu"):
    """3x3 / stride 2 / pad 1 / output_pad 1 ConvTranspose2d, sub-pixel form.

    The 4 output parities are lane-packed (Cout -> 4*Cout) so the kernel does
    one lane-dense store; the host does a cheap depth-to-space.
    """
    N, H, W, Cin = x_nhwc.shape
    Cout = prep["w"].shape[-1] // 4
    Wp1 = W + 1
    r_out = H * Wp1

    xp = jnp.pad(x_nhwc, ((0, 0), (0, 1), (0, 1), (0, 0))).reshape(
        N, (H + 1) * Wp1, Cin)
    x_flat = jnp.concatenate([xp, jnp.zeros((N, 8, Cin), x_nhwc.dtype)], axis=1)

    offs = tuple(_CONVT_TAP_INFO[(i, j)][1] * Wp1 + _CONVT_TAP_INFO[(i, j)][2]
                 for i in range(3) for j in range(3))
    out = _tap_matmul(x_flat, prep["w"], prep["b"], offs, r_out, act)
    # (N, H*(W+1), 4*Cout) lane-packed as (dy, dx, c) -> depth-to-space NHWC
    out = out.reshape(N, H, Wp1, 2, 2, Cout)[:, :, :W]
    out = jnp.transpose(out, (0, 1, 3, 2, 4, 5)).reshape(N, 2 * H, 2 * W, Cout)
    return out


# ----------------------------------------------------------------------------
# Raw parameters (deterministic synthetic init, torch layouts)
# ----------------------------------------------------------------------------
def make_params(key, in_channels, hidden_dims, latent_dim, enc_h, enc_w):
    keys = iter(jax.random.split(key, 128))

    def nrm(shape, std=0.05):
        return std * jax.random.normal(next(keys), shape, jnp.float32)

    def bn(c):
        gamma = 1.0 + 0.1 * jax.random.normal(next(keys), (c,), jnp.float32)
        beta = 0.1 * jax.random.normal(next(keys), (c,), jnp.float32)
        return (gamma, beta, jnp.zeros((c,), jnp.float32),
                jnp.ones((c,), jnp.float32))

    params = {}
    enc = []
    cin = in_channels
    for h in hidden_dims:
        enc.append({"w": nrm((h, cin, 3, 3)), "b": nrm((h,)), "bn": bn(h)})
        cin = h
    params["encoder"] = enc

    flat = hidden_dims[-1] * enc_h * enc_w
    params["fc_mu"] = {"w": nrm((flat, latent_dim)), "b": nrm((latent_dim,))}
    params["fc_var"] = {"w": nrm((flat, latent_dim)), "b": nrm((latent_dim,))}
    params["dec_in"] = {"w": nrm((latent_dim, flat)), "b": nrm((flat,))}

    dec = []
    for i in range(len(hidden_dims) - 1, 0, -1):
        dec.append({"w": nrm((hidden_dims[i], hidden_dims[i - 1], 3, 3)),
                    "b": nrm((hidden_dims[i - 1],)),
                    "bn": bn(hidden_dims[i - 1])})
    params["decoder"] = dec

    params["final"] = {
        "convt_w": nrm((hidden_dims[0], hidden_dims[0], 3, 3)),
        "convt_b": nrm((hidden_dims[0],)),
        "bn": bn(hidden_dims[0]),
        "conv_w": nrm((in_channels, hidden_dims[0], 3, 3)),
        "conv_b": nrm((in_channels,)),
    }
    return params


# ----------------------------------------------------------------------------
# Forward pass (VanillaVAE.forward): returns (recons, x, mu, log_var)
# ----------------------------------------------------------------------------
def vae_forward(x_nchw, prep, eps):
    # ---- encode ----  Conv2d(k3,s2,p1) + folded BN + ReLU blocks, bf16 slabs
    h = jnp.transpose(x_nchw, (0, 2, 3, 1)).astype(jnp.bfloat16)   # NCHW -> NHWC
    for layer in prep["encoder"]:
        h = conv2d_s2(h, layer, act="relu")
    N, He, We, Ce = h.shape
    # fc weights are row-permuted to the NHWC order, so flatten directly.
    flat = h.reshape(N, He * We * Ce)

    # ---- fused fc_mu / fc_var / reparameterize / decoder_input ----
    mu, log_var, d = fc_head(flat, prep["fc"], eps)

    # ---- decode ----  (dec_in columns are permuted, so d is already NHWC)
    h = d.reshape(N, He, We, Ce)
    for layer in prep["decoder"]:
        h = conv_transpose2d(h, layer, act="relu")
    h = conv_transpose2d(h, prep["final_convt"], act="relu")
    h = conv2d_s1(h, prep["final_conv"], act="sigmoid")
    recons = jnp.transpose(h, (0, 3, 1, 2)).astype(jnp.float32)    # NHWC -> NCHW
    return recons, x_nchw, mu, log_var


# ----------------------------------------------------------------------------
if __name__ == "__main__":
    key = jax.random.PRNGKey(0)
    kx, kp, ke = jax.random.split(key, 3)

    # small shapes consistent with the module
    B, C, H, W = 2, 4, 16, 16
    hidden_dims = [8, 16, 32]
    latent_dim = 16

    x = jax.random.normal(kx, (B, C, H, W), jnp.float32)

    # encoder output spatial size (k=3, stride=2, pad=1 per layer)
    eh, ew = H, W
    for _ in hidden_dims:
        eh = (eh - 1) // 2 + 1
        ew = (ew - 1) // 2 + 1

    raw_params = make_params(kp, C, hidden_dims, latent_dim, eh, ew)
    # one-time weight prep (BN fold, tap packing, perms, bf16) outside the jit
    prep = prepare_params(raw_params, C, hidden_dims, eh, ew)
    eps = jax.random.normal(ke, (B, latent_dim), jnp.float32)

    fwd = jax.jit(vae_forward)
    recons, x_out, mu, log_var = fwd(x, prep, eps)
    jax.block_until_ready(recons)

    assert recons.shape == (B, C, H, W), recons.shape
    assert mu.shape == (B, latent_dim) and log_var.shape == (B, latent_dim)
    assert bool(jnp.all(jnp.isfinite(recons)))
    print("KERNEL_OK")
</pallas_src>

<mosaic_0001>
module attributes {stable_mosaic.version = 11 : i64} {
  func.func @_tap_matmul_kernel(%arg0: i32, %arg1: i32, %arg2: memref<1x332x4xbf16, #tpu.memory_space<vmem>>, %arg3: memref<9x4x8xbf16, #tpu.memory_space<vmem>>, %arg4: memref<1x8xf32, #tpu.memory_space<vmem>>, %arg5: memref<1x72x8xbf16, #tpu.memory_space<vmem>>) attributes {dimension_semantics = [#tpu.dimension_semantics<parallel>, #tpu.dimension_semantics<parallel>], iteration_bounds = array<i64: 2, 1>, scalar_prefetch = 0 : i64, scratch_operands = 0 : i64, tpu.core_type = #tpu.core_type<tc>, window_params = [{transform_indices = @transform_0, window_bounds = array<i64: 1, 332, 4>}, {pipeline_mode = #tpu.pipeline_mode<synchronous>, transform_indices = @transform_1, window_bounds = array<i64: 9, 4, 8>}, {pipeline_mode = #tpu.pipeline_mode<synchronous>, transform_indices = @transform_2, window_bounds = array<i64: 1, 8>}, {transform_indices = @transform_3, window_bounds = array<i64: 1, 72, 8>}]} {
    %c0 = arith.constant 0 : index
    %c0_0 = arith.constant 0 : index
    %c0_1 = arith.constant 0 : index
    %0 = vector.load %arg2[%c0, %c0_0, %c0_1] : memref<1x332x4xbf16, #tpu.memory_space<vmem>>, vector<1x315x4xbf16>
    %1 = vector.shape_cast %0 : vector<1x315x4xbf16> to vector<315x4xbf16>
    %2 = arith.extf %1 : vector<315x4xbf16> to vector<315x4xf32>
    %cst = arith.constant 0.000000e+00 : f32
    %3 = vector.broadcast %cst : f32 to vector<72x8xf32>
    %4 = vector.extract_strided_slice %2 {offsets = [0, 0], sizes = [72, 4], strides = [1, 1]} : vector<315x4xf32> to vector<72x4xf32>
    %5 = arith.truncf %4 : vector<72x4xf32> to vector<72x4xbf16>
    %c0_2 = arith.constant 0 : index
    %c0_3 = arith.constant 0 : index
    %c0_4 = arith.constant 0 : index
    %6 = vector.load %arg3[%c0_2, %c0_3, %c0_4] : memref<9x4x8xbf16, #tpu.memory_space<vmem>>, vector<1x4x8xbf16>
    %7 = vector.shape_cast %6 : vector<1x4x8xbf16> to vector<4x8xbf16>
    %cst_5 = arith.constant dense<0.000000e+00> : vector<72x8xf32>
    %8 = tpu.matmul %5, %7, %cst_5 {dimension_numbers = #tpu.dot_dimension_numbers<[1], [0], [0], [1], [0, 0, 1, 1], [], []>} : vector<72x4xbf16>, vector<4x8xbf16>, vector<72x8xf32> -> vector<72x8xf32>
    %9 = arith.addf %3, %8 : vector<72x8xf32>
    %10 = vector.extract_strided_slice %2 {offsets = [81, 0], sizes = [72, 4], strides = [1, 1]} : vector<315x4xf32> to vector<72x4xf32>
    %11 = arith.truncf %10 : vector<72x4xf32> to vector<72x4xbf16>
    %c1 = arith.constant 1 : index
    %c0_6 = arith.constant 0 : index
    %c0_7 = arith.constant 0 : index
    %12 = vector.load %arg3[%c1, %c0_6, %c0_7] : memref<9x4x8xbf16, #tpu.memory_space<vmem>>, vector<1x4x8xbf16>
    %13 = vector.shape_cast %12 : vector<1x4x8xbf16> to vector<4x8xbf16>
    %cst_8 = arith.constant dense<0.000000e+00> : vector<72x8xf32>
    %14 = tpu.matmul %11, %13, %cst_8 {dimension_numbers = #tpu.dot_dimension_numbers<[1], [0], [0], [1], [0, 0, 1, 1], [], []>} : vector<72x4xbf16>, vector<4x8xbf16>, vector<72x8xf32> -> vector<72x8xf32>
    %15 = arith.addf %9, %14 : vector<72x8xf32>
    %16 = vector.extract_strided_slice %2 {offsets = [1, 0], sizes = [72, 4], strides = [1, 1]} : vector<315x4xf32> to vector<72x4xf32>
    %17 = arith.truncf %16 : vector<72x4xf32> to vector<72x4xbf16>
    %c2 = arith.constant 2 : index
    %c0_9 = arith.constant 0 : index
    %c0_10 = arith.constant 0 : index
    %18 = vector.load %arg3[%c2, %c0_9, %c0_10] : memref<9x4x8xbf16, #tpu.memory_space<vmem>>, vector<1x4x8xbf16>
    %19 = vector.shape_cast %18 : vector<1x4x8xbf16> to vector<4x8xbf16>
    %cst_11 = arith.constant dense<0.000000e+00> : vector<72x8xf32>
    %20 = tpu.matmul %17, %19, %cst_11 {dimension_numbers = #tpu.dot_dimension_numbers<[1], [0], [0], [1], [0, 0, 1, 1], [], []>} : vector<72x4xbf16>, vector<4x8xbf16>, vector<72x8xf32> -> vector<72x8xf32>
    %21 = arith.addf %15, %20 : vector<72x8xf32>
    %22 = vector.extract_strided_slice %2 {offsets = [162, 0], sizes = [72, 4], strides = [1, 1]} : vector<315x4xf32> to vector<72x4xf32>
    %23 = arith.truncf %22 : vector<72x4xf32> to vector<72x4xbf16>
    %c3 = arith.constant 3 : index
    %c0_12 = arith.constant 0 : index
    %c0_13 = arith.constant 0 : index
    %24 = vector.load %arg3[%c3, %c0_12, %c0_13] : memref<9x4x8xbf16, #tpu.memory_space<vmem>>, vector<1x4x8xbf16>
    %25 = vector.shape_cast %24 : vector<1x4x8xbf16> to vector<4x8xbf16>
    %cst_14 = arith.constant dense<0.000000e+00> : vector<72x8xf32>
    %26 = tpu.matmul %23, %25, %cst_14 {dimension_numbers = #tpu.dot_dimension_numbers<[1], [0], [0], [1], [0, 0, 1, 1], [], []>} : vector<72x4xbf16>, vector<4x8xbf16>, vector<72x8xf32> -> vector<72x8xf32>
    %27 = arith.addf %21, %26 : vector<72x8xf32>
    %28 = vector.extract_strided_slice %2 {offsets = [243, 0], sizes = [72, 4], strides = [1, 1]} : vector<315x4xf32> to vector<72x4xf32>
    %29 = arith.truncf %28 : vector<72x4xf32> to vector<72x4xbf16>
    %c4 = arith.constant 4 : index
    %c0_15 = arith.constant 0 : index
    %c0_16 = arith.constant 0 : index
    %30 = vector.load %arg3[%c4, %c0_15, %c0_16] : memref<9x4x8xbf16, #tpu.memory_space<vmem>>, vector<1x4x8xbf16>
    %31 = vector.shape_cast %30 : vector<1x4x8xbf16> to vector<4x8xbf16>
    %cst_17 = arith.constant dense<0.000000e+00> : vector<72x8xf32>
    %32 = tpu.matmul %29, %31, %cst_17 {dimension_numbers = #tpu.dot_dimension_numbers<[1], [0], [0], [1], [0, 0, 1, 1], [], []>} : vector<72x4xbf16>, vector<4x8xbf16>, vector<72x8xf32> -> vector<72x8xf32>
    %33 = arith.addf %27, %32 : vector<72x8xf32>
    %34 = vector.extract_strided_slice %2 {offsets = [163, 0], sizes = [72, 4], strides = [1, 1]} : vector<315x4xf32> to vector<72x4xf32>
    %35 = arith.truncf %34 : vector<72x4xf32> to vector<72x4xbf16>
    %c5 = arith.constant 5 : index
    %c0_18 = arith.constant 0 : index
    %c0_19 = arith.constant 0 : index
    %36 = vector.load %arg3[%c5, %c0_18, %c0_19] : memref<9x4x8xbf16, #tpu.memory_space<vmem>>, vector<1x4x8xbf16>
    %37 = vector.shape_cast %36 : vector<1x4x8xbf16> to vector<4x8xbf16>
    %cst_20 = arith.constant dense<0.000000e+00> : vector<72x8xf32>
    %38 = tpu.matmul %35, %37, %cst_20 {dimension_numbers = #tpu.dot_dimension_numbers<[1], [0], [0], [1], [0, 0, 1, 1], [], []>} : vector<72x4xbf16>, vector<4x8xbf16>, vector<72x8xf32> -> vector<72x8xf32>
    %39 = arith.addf %33, %38 : vector<72x8xf32>
    %40 = vector.extract_strided_slice %2 {offsets = [9, 0], sizes = [72, 4], strides = [1, 1]} : vector<315x4xf32> to vector<72x4xf32>
    %41 = arith.truncf %40 : vector<72x4xf32> to vector<72x4xbf16>
    %c6 = arith.constant 6 : index
    %c0_21 = arith.constant 0 : index
    %c0_22 = arith.constant 0 : index
    %42 = vector.load %arg3[%c6, %c0_21, %c0_22] : memref<9x4x8xbf16, #tpu.memory_space<vmem>>, vector<1x4x8xbf16>
    %43 = vector.shape_cast %42 : vector<1x4x8xbf16> to vector<4x8xbf16>
    %cst_23 = arith.constant dense<0.000000e+00> : vector<72x8xf32>
    %44 = tpu.matmul %41, %43, %cst_23 {dimension_numbers = #tpu.dot_dimension_numbers<[1], [0], [0], [1], [0, 0, 1, 1], [], []>} : vector<72x4xbf16>, vector<4x8xbf16>, vector<72x8xf32> -> vector<72x8xf32>
    %45 = arith.addf %39, %44 : vector<72x8xf32>
    %46 = vector.extract_strided_slice %2 {offsets = [90, 0], sizes = [72, 4], strides = [1, 1]} : vector<315x4xf32> to vector<72x4xf32>
    %47 = arith.truncf %46 : vector<72x4xf32> to vector<72x4xbf16>
    %c7 = arith.constant 7 : index
    %c0_24 = arith.constant 0 : index
    %c0_25 = arith.constant 0 : index
    %48 = vector.load %arg3[%c7, %c0_24, %c0_25] : memref<9x4x8xbf16, #tpu.memory_space<vmem>>, vector<1x4x8xbf16>
    %49 = vector.shape_cast %48 : vector<1x4x8xbf16> to vector<4x8xbf16>
    %cst_26 = arith.constant dense<0.000000e+00> : vector<72x8xf32>
    %50 = tpu.matmul %47, %49, %cst_26 {dimension_numbers = #tpu.dot_dimension_numbers<[1], [0], [0], [1], [0, 0, 1, 1], [], []>} : vector<72x4xbf16>, vector<4x8xbf16>, vector<72x8xf32> -> vector<72x8xf32>
    %51 = arith.addf %45, %50 : vector<72x8xf32>
    %52 = vector.extract_strided_slice %2 {offsets = [10, 0], sizes = [72, 4], strides = [1, 1]} : vector<315x4xf32> to vector<72x4xf32>
    %53 = arith.truncf %52 : vector<72x4xf32> to vector<72x4xbf16>
    %c8 = arith.constant 8 : index
    %c0_27 = arith.constant 0 : index
    %c0_28 = arith.constant 0 : index
    %54 = vector.load %arg3[%c8, %c0_27, %c0_28] : memref<9x4x8xbf16, #tpu.memory_space<vmem>>, vector<1x4x8xbf16>
    %55 = vector.shape_cast %54 : vector<1x4x8xbf16> to vector<4x8xbf16>
    %cst_29 = arith.constant dense<0.000000e+00> : vector<72x8xf32>
    %56 = tpu.matmul %53, %55, %cst_29 {dimension_numbers = #tpu.dot_dimension_numbers<[1], [0], [0], [1], [0, 0, 1, 1], [], []>} : vector<72x4xbf16>, vector<4x8xbf16>, vector<72x8xf32> -> vector<72x8xf32>
    %57 = arith.addf %51, %56 : vector<72x8xf32>
    %c0_30 = arith.constant 0 : index
    %c0_31 = arith.constant 0 : index
    %58 = vector.load %arg4[%c0_30, %c0_31] : memref<1x8xf32, #tpu.memory_space<vmem>>, vector<1x8xf32>
    %59 = vector.broadcast %58 : vector<1x8xf32> to vector<72x8xf32>
    %60 = arith.addf %57, %59 : vector<72x8xf32>
    %cst_32 = arith.constant 0.000000e+00 : f32
    %61 = vector.broadcast %cst_32 : f32 to vector<72x8xf32>
    %62 = arith.maximumf %60, %61 : vector<72x8xf32>
    %63 = arith.truncf %62 : vector<72x8xf32> to vector<72x8xbf16>
    %c0_33 = arith.constant 0 : index
    %c0_34 = arith.constant 0 : index
    %c0_35 = arith.constant 0 : index
    %64 = vector.load %arg5[%c0_33, %c0_34, %c0_35] : memref<1x72x8xbf16, #tpu.memory_space<vmem>>, vector<1x72x8xbf16>
    %65 = vector.shape_cast %64 : vector<1x72x8xbf16> to vector<72x8xbf16>
    %66 = vector.shape_cast %63 : vector<72x8xbf16> to vector<1x72x8xbf16>
    tpu.vector_store %arg5[%c0_33, %c0_34, %c0_35], %66 {strides = array<i32>} : memref<1x72x8xbf16, #tpu.memory_space<vmem>>, vector<1x72x8xbf16>,
    return
  }
  func.func @transform_0(%arg0: i32, %arg1: i32) -> (i32, i32, i32) {
    %c0_i32 = arith.constant 0 : i32
    %c0_i32_0 = arith.constant 0 : i32
    %c0_i32_1 = arith.constant 0 : i32
    return %arg0, %c0_i32, %c0_i32_0 : i32, i32, i32
  }
  func.func @transform_1(%arg0: i32, %arg1: i32) -> (i32, i32, i32) {
    %c0_i32 = arith.constant 0 : i32
    %c0_i32_0 = arith.constant 0 : i32
    %c0_i32_1 = arith.constant 0 : i32
    %c0_i32_2 = arith.constant 0 : i32
    return %c0_i32, %c0_i32_0, %c0_i32_1 : i32, i32, i32
  }
  func.func @transform_2(%arg0: i32, %arg1: i32) -> (i32, i32) {
    %c0_i32 = arith.constant 0 : i32
    %c0_i32_0 = arith.constant 0 : i32
    %c0_i32_1 = arith.constant 0 : i32
    return %c0_i32, %c0_i32_0 : i32, i32
  }
  func.func @transform_3(%arg0: i32, %arg1: i32) -> (i32, i32, i32) {
    %c0_i32 = arith.constant 0 : i32
    %c0_i32_0 = arith.constant 0 : i32
    return %arg0, %arg1, %c0_i32 : i32, i32, i32
  }
}

module attributes {stable_mosaic.version = 11 : i64} {
  func.func @_tap_matmul_kernel(%arg0: i32, %arg1: i32, %arg2: memref<1x108x8xbf16, #tpu.memory_space<vmem>>, %arg3: memref<9x8x16xbf16, #tpu.memory_space<vmem>>, %arg4: memref<1x16xf32, #tpu.memory_space<vmem>>, %arg5: memref<1x20x16xbf16, #tpu.memory_space<vmem>>) attributes {dimension_semantics = [#tpu.dimension_semantics<parallel>, #tpu.dimension_semantics<parallel>], iteration_bounds = array<i64: 2, 1>, scalar_prefetch = 0 : i64, scratch_operands = 0 : i64, tpu.core_type = #tpu.core_type<tc>, window_params = [{transform_indices = @transform_0, window_bounds = array<i64: 1, 108, 8>}, {pipeline_mode = #tpu.pipeline_mode<synchronous>, transform_indices = @transform_1, window_bounds = array<i64: 9, 8, 16>}, {pipeline_mode = #tpu.pipeline_mode<synchronous>, transform_indices = @transform_2, window_bounds = array<i64: 1, 16>}, {transform_indices = @transform_3, window_bounds = array<i64: 1, 20, 16>}]} {
    %c0 = arith.constant 0 : index
    %c0_0 = arith.constant 0 : index
    %c0_1 = arith.constant 0 : index
    %0 = vector.load %arg2[%c0, %c0_0, %c0_1] : memref<1x108x8xbf16, #tpu.memory_space<vmem>>, vector<1x95x8xbf16>
    %1 = vector.shape_cast %0 : vector<1x95x8xbf16> to vector<95x8xbf16>
    %2 = arith.extf %1 : vector<95x8xbf16> to vector<95x8xf32>
    %cst = arith.constant 0.000000e+00 : f32
    %3 = vector.broadcast %cst : f32 to vector<20x16xf32>
    %4 = vector.extract_strided_slice %2 {offsets = [0, 0], sizes = [20, 8], strides = [1, 1]} : vector<95x8xf32> to vector<20x8xf32>
    %5 = arith.truncf %4 : vector<20x8xf32> to vector<20x8xbf16>
    %c0_2 = arith.constant 0 : index
    %c0_3 = arith.constant 0 : index
    %c0_4 = arith.constant 0 : index
    %6 = vector.load %arg3[%c0_2, %c0_3, %c0_4] : memref<9x8x16xbf16, #tpu.memory_space<vmem>>, vector<1x8x16xbf16>
    %7 = vector.shape_cast %6 : vector<1x8x16xbf16> to vector<8x16xbf16>
    %cst_5 = arith.constant dense<0.000000e+00> : vector<20x16xf32>
    %8 = tpu.matmul %5, %7, %cst_5 {dimension_numbers = #tpu.dot_dimension_numbers<[1], [0], [0], [1], [0, 0, 1, 1], [], []>} : vector<20x8xbf16>, vector<8x16xbf16>, vector<20x16xf32> -> vector<20x16xf32>
    %9 = arith.addf %3, %8 : vector<20x16xf32>
    %10 = vector.extract_strided_slice %2 {offsets = [25, 0], sizes = [20, 8], strides = [1, 1]} : vector<95x8xf32> to vector<20x8xf32>
    %11 = arith.truncf %10 : vector<20x8xf32> to vector<20x8xbf16>
    %c1 = arith.constant 1 : index
    %c0_6 = arith.constant 0 : index
    %c0_7 = arith.constant 0 : index
    %12 = vector.load %arg3[%c1, %c0_6, %c0_7] : memref<9x8x16xbf16, #tpu.memory_space<vmem>>, vector<1x8x16xbf16>
    %13 = vector.shape_cast %12 : vector<1x8x16xbf16> to vector<8x16xbf16>
    %cst_8 = arith.constant dense<0.000000e+00> : vector<20x16xf32>
    %14 = tpu.matmul %11, %13, %cst_8 {dimension_numbers = #tpu.dot_dimension_numbers<[1], [0], [0], [1], [0, 0, 1, 1], [], []>} : vector<20x8xbf16>, vector<8x16xbf16>, vector<20x16xf32> -> vector<20x16xf32>
    %15 = arith.addf %9, %14 : vector<20x16xf32>
    %16 = vector.extract_strided_slice %2 {offsets = [1, 0], sizes = [20, 8], strides = [1, 1]} : vector<95x8xf32> to vector<20x8xf32>
    %17 = arith.truncf %16 : vector<20x8xf32> to vector<20x8xbf16>
    %c2 = arith.constant 2 : index
    %c0_9 = arith.constant 0 : index
    %c0_10 = arith.constant 0 : index
    %18 = vector.load %arg3[%c2, %c0_9, %c0_10] : memref<9x8x16xbf16, #tpu.memory_space<vmem>>, vector<1x8x16xbf16>
    %19 = vector.shape_cast %18 : vector<1x8x16xbf16> to vector<8x16xbf16>
    %cst_11 = arith.constant dense<0.000000e+00> : vector<20x16xf32>
    %20 = tpu.matmul %17, %19, %cst_11 {dimension_numbers = #tpu.dot_dimension_numbers<[1], [0], [0], [1], [0, 0, 1, 1], [], []>} : vector<20x8xbf16>, vector<8x16xbf16>, vector<20x16xf32> -> vector<20x16xf32>
    %21 = arith.addf %15, %20 : vector<20x16xf32>
    %22 = vector.extract_strided_slice %2 {offsets = [50, 0], sizes = [20, 8], strides = [1, 1]} : vector<95x8xf32> to vector<20x8xf32>
    %23 = arith.truncf %22 : vector<20x8xf32> to vector<20x8xbf16>
    %c3 = arith.constant 3 : index
    %c0_12 = arith.constant 0 : index
    %c0_13 = arith.constant 0 : index
    %24 = vector.load %arg3[%c3, %c0_12, %c0_13] : memref<9x8x16xbf16, #tpu.memory_space<vmem>>, vector<1x8x16xbf16>
    %25 = vector.shape_cast %24 : vector<1x8x16xbf16> to vector<8x16xbf16>
    %cst_14 = arith.constant dense<0.000000e+00> : vector<20x16xf32>
    %26 = tpu.matmul %23, %25, %cst_14 {dimension_numbers = #tpu.dot_dimension_numbers<[1], [0], [0], [1], [0, 0, 1, 1], [], []>} : vector<20x8xbf16>, vector<8x16xbf16>, vector<20x16xf32> -> vector<20x16xf32>
    %27 = arith.addf %21, %26 : vector<20x16xf32>
    %28 = vector.extract_strided_slice %2 {offsets = [75, 0], sizes = [20, 8], strides = [1, 1]} : vector<95x8xf32> to vector<20x8xf32>
    %29 = arith.truncf %28 : vector<20x8xf32> to vector<20x8xbf16>
    %c4 = arith.constant 4 : index
    %c0_15 = arith.constant 0 : index
    %c0_16 = arith.constant 0 : index
    %30 = vector.load %arg3[%c4, %c0_15, %c0_16] : memref<9x8x16xbf16, #tpu.memory_space<vmem>>, vector<1x8x16xbf16>
    %31 = vector.shape_cast %30 : vector<1x8x16xbf16> to vector<8x16xbf16>
    %cst_17 = arith.constant dense<0.000000e+00> : vector<20x16xf32>
    %32 = tpu.matmul %29, %31, %cst_17 {dimension_numbers = #tpu.dot_dimension_numbers<[1], [0], [0], [1], [0, 0, 1, 1], [], []>} : vector<20x8xbf16>, vector<8x16xbf16>, vector<20x16xf32> -> vector<20x16xf32>
    %33 = arith.addf %27, %32 : vector<20x16xf32>
    %34 = vector.extract_strided_slice %2 {offsets = [51, 0], sizes = [20, 8], strides = [1, 1]} : vector<95x8xf32> to vector<20x8xf32>
    %35 = arith.truncf %34 : vector<20x8xf32> to vector<20x8xbf16>
    %c5 = arith.constant 5 : index
    %c0_18 = arith.constant 0 : index
    %c0_19 = arith.constant 0 : index
    %36 = vector.load %arg3[%c5, %c0_18, %c0_19] : memref<9x8x16xbf16, #tpu.memory_space<vmem>>, vector<1x8x16xbf16>
    %37 = vector.shape_cast %36 : vector<1x8x16xbf16> to vector<8x16xbf16>
    %cst_20 = arith.constant dense<0.000000e+00> : vector<20x16xf32>
    %38 = tpu.matmul %35, %37, %cst_20 {dimension_numbers = #tpu.dot_dimension_numbers<[1], [0], [0], [1], [0, 0, 1, 1], [], []>} : vector<20x8xbf16>, vector<8x16xbf16>, vector<20x16xf32> -> vector<20x16xf32>
    %39 = arith.addf %33, %38 : vector<20x16xf32>
    %40 = vector.extract_strided_slice %2 {offsets = [5, 0], sizes = [20, 8], strides = [1, 1]} : vector<95x8xf32> to vector<20x8xf32>
    %41 = arith.truncf %40 : vector<20x8xf32> to vector<20x8xbf16>
    %c6 = arith.constant 6 : index
    %c0_21 = arith.constant 0 : index
    %c0_22 = arith.constant 0 : index
    %42 = vector.load %arg3[%c6, %c0_21, %c0_22] : memref<9x8x16xbf16, #tpu.memory_space<vmem>>, vector<1x8x16xbf16>
    %43 = vector.shape_cast %42 : vector<1x8x16xbf16> to vector<8x16xbf16>
    %cst_23 = arith.constant dense<0.000000e+00> : vector<20x16xf32>
    %44 = tpu.matmul %41, %43, %cst_23 {dimension_numbers = #tpu.dot_dimension_numbers<[1], [0], [0], [1], [0, 0, 1, 1], [], []>} : vector<20x8xbf16>, vector<8x16xbf16>, vector<20x16xf32> -> vector<20x16xf32>
    %45 = arith.addf %39, %44 : vector<20x16xf32>
    %46 = vector.extract_strided_slice %2 {offsets = [30, 0], sizes = [20, 8], strides = [1, 1]} : vector<95x8xf32> to vector<20x8xf32>
    %47 = arith.truncf %46 : vector<20x8xf32> to vector<20x8xbf16>
    %c7 = arith.constant 7 : index
    %c0_24 = arith.constant 0 : index
    %c0_25 = arith.constant 0 : index
    %48 = vector.load %arg3[%c7, %c0_24, %c0_25] : memref<9x8x16xbf16, #tpu.memory_space<vmem>>, vector<1x8x16xbf16>
    %49 = vector.shape_cast %48 : vector<1x8x16xbf16> to vector<8x16xbf16>
    %cst_26 = arith.constant dense<0.000000e+00> : vector<20x16xf32>
    %50 = tpu.matmul %47, %49, %cst_26 {dimension_numbers = #tpu.dot_dimension_numbers<[1], [0], [0], [1], [0, 0, 1, 1], [], []>} : vector<20x8xbf16>, vector<8x16xbf16>, vector<20x16xf32> -> vector<20x16xf32>
    %51 = arith.addf %45, %50 : vector<20x16xf32>
    %52 = vector.extract_strided_slice %2 {offsets = [6, 0], sizes = [20, 8], strides = [1, 1]} : vector<95x8xf32> to vector<20x8xf32>
    %53 = arith.truncf %52 : vector<20x8xf32> to vector<20x8xbf16>
    %c8 = arith.constant 8 : index
    %c0_27 = arith.constant 0 : index
    %c0_28 = arith.constant 0 : index
    %54 = vector.load %arg3[%c8, %c0_27, %c0_28] : memref<9x8x16xbf16, #tpu.memory_space<vmem>>, vector<1x8x16xbf16>
    %55 = vector.shape_cast %54 : vector<1x8x16xbf16> to vector<8x16xbf16>
    %cst_29 = arith.constant dense<0.000000e+00> : vector<20x16xf32>
    %56 = tpu.matmul %53, %55, %cst_29 {dimension_numbers = #tpu.dot_dimension_numbers<[1], [0], [0], [1], [0, 0, 1, 1], [], []>} : vector<20x8xbf16>, vector<8x16xbf16>, vector<20x16xf32> -> vector<20x16xf32>
    %57 = arith.addf %51, %56 : vector<20x16xf32>
    %c0_30 = arith.constant 0 : index
    %c0_31 = arith.constant 0 : index
    %58 = vector.load %arg4[%c0_30, %c0_31] : memref<1x16xf32, #tpu.memory_space<vmem>>, vector<1x16xf32>
    %59 = vector.broadcast %58 : vector<1x16xf32> to vector<20x16xf32>
    %60 = arith.addf %57, %59 : vector<20x16xf32>
    %cst_32 = arith.constant 0.000000e+00 : f32
    %61 = vector.broadcast %cst_32 : f32 to vector<20x16xf32>
    %62 = arith.maximumf %60, %61 : vector<20x16xf32>
    %63 = arith.truncf %62 : vector<20x16xf32> to vector<20x16xbf16>
    %c0_33 = arith.constant 0 : index
    %c0_34 = arith.constant 0 : index
    %c0_35 = arith.constant 0 : index
    %64 = vector.load %arg5[%c0_33, %c0_34, %c0_35] : memref<1x20x16xbf16, #tpu.memory_space<vmem>>, vector<1x20x16xbf16>
    %65 = vector.shape_cast %64 : vector<1x20x16xbf16> to vector<20x16xbf16>
    %66 = vector.shape_cast %63 : vector<20x16xbf16> to vector<1x20x16xbf16>
    tpu.vector_store %arg5[%c0_33, %c0_34, %c0_35], %66 {strides = array<i32>} : memref<1x20x16xbf16, #tpu.memory_space<vmem>>, vector<1x20x16xbf16>,
    return
  }
  func.func @transform_0(%arg0: i32, %arg1: i32) -> (i32, i32, i32) {
    %c0_i32 = arith.constant 0 : i32
    %c0_i32_0 = arith.constant 0 : i32
    %c0_i32_1 = arith.constant 0 : i32
    return %arg0, %c0_i32, %c0_i32_0 : i32, i32, i32
  }
  func.func @transform_1(%arg0: i32, %arg1: i32) -> (i32, i32, i32) {
    %c0_i32 = arith.constant 0 : i32
    %c0_i32_0 = arith.constant 0 : i32
    %c0_i32_1 = arith.constant 0 : i32
    %c0_i32_2 = arith.constant 0 : i32
    return %c0_i32, %c0_i32_0, %c0_i32_1 : i32, i32, i32
  }
  func.func @transform_2(%arg0: i32, %arg1: i32) -> (i32, i32) {
    %c0_i32 = arith.constant 0 : i32
    %c0_i32_0 = arith.constant 0 : i32
    %c0_i32_1 = arith.constant 0 : i32
    return %c0_i32, %c0_i32_0 : i32, i32
  }
  func.func @transform_3(%arg0: i32, %arg1: i32) -> (i32, i32, i32) {
    %c0_i32 = arith.constant 0 : i32
    %c0_i32_0 = arith.constant 0 : i32
    return %arg0, %arg1, %c0_i32 : i32, i32, i32
  }
}

module attributes {stable_mosaic.version = 11 : i64} {
  func.func @_tap_matmul_kernel(%arg0: i32, %arg1: i32, %arg2: memref<1x44x16xbf16, #tpu.memory_space<vmem>>, %arg3: memref<9x16x32xbf16, #tpu.memory_space<vmem>>, %arg4: memref<1x32xf32, #tpu.memory_space<vmem>>, %arg5: memref<1x6x32xbf16, #tpu.memory_space<vmem>>) attributes {dimension_semantics = [#tpu.dimension_semantics<parallel>, #tpu.dimension_semantics<parallel>], iteration_bounds = array<i64: 2, 1>, scalar_prefetch = 0 : i64, scratch_operands = 0 : i64, tpu.core_type = #tpu.core_type<tc>, window_params = [{transform_indices = @transform_0, window_bounds = array<i64: 1, 44, 16>}, {pipeline_mode = #tpu.pipeline_mode<synchronous>, transform_indices = @transform_1, window_bounds = array<i64: 9, 16, 32>}, {pipeline_mode = #tpu.pipeline_mode<synchronous>, transform_indices = @transform_2, window_bounds = array<i64: 1, 32>}, {transform_indices = @transform_3, window_bounds = array<i64: 1, 6, 32>}]} {
    %c0 = arith.constant 0 : index
    %c0_0 = arith.constant 0 : index
    %c0_1 = arith.constant 0 : index
    %0 = vector.load %arg2[%c0, %c0_0, %c0_1] : memref<1x44x16xbf16, #tpu.memory_space<vmem>>, vector<1x33x16xbf16>
    %1 = vector.shape_cast %0 : vector<1x33x16xbf16> to vector<33x16xbf16>
    %2 = arith.extf %1 : vector<33x16xbf16> to vector<33x16xf32>
    %cst = arith.constant 0.000000e+00 : f32
    %3 = vector.broadcast %cst : f32 to vector<6x32xf32>
    %4 = vector.extract_strided_slice %2 {offsets = [0, 0], sizes = [6, 16], strides = [1, 1]} : vector<33x16xf32> to vector<6x16xf32>
    %5 = arith.truncf %4 : vector<6x16xf32> to vector<6x16xbf16>
    %c0_2 = arith.constant 0 : index
    %c0_3 = arith.constant 0 : index
    %c0_4 = arith.constant 0 : index
    %6 = vector.load %arg3[%c0_2, %c0_3, %c0_4] : memref<9x16x32xbf16, #tpu.memory_space<vmem>>, vector<1x16x32xbf16>
    %7 = vector.shape_cast %6 : vector<1x16x32xbf16> to vector<16x32xbf16>
    %cst_5 = arith.constant dense<0.000000e+00> : vector<6x32xf32>
    %8 = tpu.matmul %5, %7, %cst_5 {dimension_numbers = #tpu.dot_dimension_numbers<[1], [0], [0], [1], [0, 0, 1, 1], [], []>} : vector<6x16xbf16>, vector<16x32xbf16>, vector<6x32xf32> -> vector<6x32xf32>
    %9 = arith.addf %3, %8 : vector<6x32xf32>
    %10 = vector.extract_strided_slice %2 {offsets = [9, 0], sizes = [6, 16], strides = [1, 1]} : vector<33x16xf32> to vector<6x16xf32>
    %11 = arith.truncf %10 : vector<6x16xf32> to vector<6x16xbf16>
    %c1 = arith.constant 1 : index
    %c0_6 = arith.constant 0 : index
    %c0_7 = arith.constant 0 : index
    %12 = vector.load %arg3[%c1, %c0_6, %c0_7] : memref<9x16x32xbf16, #tpu.memory_space<vmem>>, vector<1x16x32xbf16>
    %13 = vector.shape_cast %12 : vector<1x16x32xbf16> to vector<16x32xbf16>
    %cst_8 = arith.constant dense<0.000000e+00> : vector<6x32xf32>
    %14 = tpu.matmul %11, %13, %cst_8 {dimension_numbers = #tpu.dot_dimension_numbers<[1], [0], [0], [1], [0, 0, 1, 1], [], []>} : vector<6x16xbf16>, vector<16x32xbf16>, vector<6x32xf32> -> vector<6x32xf32>
    %15 = arith.addf %9, %14 : vector<6x32xf32>
    %16 = vector.extract_strided_slice %2 {offsets = [1, 0], sizes = [6, 16], strides = [1, 1]} : vector<33x16xf32> to vector<6x16xf32>
    %17 = arith.truncf %16 : vector<6x16xf32> to vector<6x16xbf16>
    %c2 = arith.constant 2 : index
    %c0_9 = arith.constant 0 : index
    %c0_10 = arith.constant 0 : index
    %18 = vector.load %arg3[%c2, %c0_9, %c0_10] : memref<9x16x32xbf16, #tpu.memory_space<vmem>>, vector<1x16x32xbf16>
    %19 = vector.shape_cast %18 : vector<1x16x32xbf16> to vector<16x32xbf16>
    %cst_11 = arith.constant dense<0.000000e+00> : vector<6x32xf32>
    %20 = tpu.matmul %17, %19, %cst_11 {dimension_numbers = #tpu.dot_dimension_numbers<[1], [0], [0], [1], [0, 0, 1, 1], [], []>} : vector<6x16xbf16>, vector<16x32xbf16>, vector<6x32xf32> -> vector<6x32xf32>
    %21 = arith.addf %15, %20 : vector<6x32xf32>
    %22 = vector.extract_strided_slice %2 {offsets = [18, 0], sizes = [6, 16], strides = [1, 1]} : vector<33x16xf32> to vector<6x16xf32>
    %23 = arith.truncf %22 : vector<6x16xf32> to vector<6x16xbf16>
    %c3 = arith.constant 3 : index
    %c0_12 = arith.constant 0 : index
    %c0_13 = arith.constant 0 : index
    %24 = vector.load %arg3[%c3, %c0_12, %c0_13] : memref<9x16x32xbf16, #tpu.memory_space<vmem>>, vector<1x16x32xbf16>
    %25 = vector.shape_cast %24 : vector<1x16x32xbf16> to vector<16x32xbf16>
    %cst_14 = arith.constant dense<0.000000e+00> : vector<6x32xf32>
    %26 = tpu.matmul %23, %25, %cst_14 {dimension_numbers = #tpu.dot_dimension_numbers<[1], [0], [0], [1], [0, 0, 1, 1], [], []>} : vector<6x16xbf16>, vector<16x32xbf16>, vector<6x32xf32> -> vector<6x32xf32>
    %27 = arith.addf %21, %26 : vector<6x32xf32>
    %28 = vector.extract_strided_slice %2 {offsets = [27, 0], sizes = [6, 16], strides = [1, 1]} : vector<33x16xf32> to vector<6x16xf32>
    %29 = arith.truncf %28 : vector<6x16xf32> to vector<6x16xbf16>
    %c4 = arith.constant 4 : index
    %c0_15 = arith.constant 0 : index
    %c0_16 = arith.constant 0 : index
    %30 = vector.load %arg3[%c4, %c0_15, %c0_16] : memref<9x16x32xbf16, #tpu.memory_space<vmem>>, vector<1x16x32xbf16>
    %31 = vector.shape_cast %30 : vector<1x16x32xbf16> to vector<16x32xbf16>
    %cst_17 = arith.constant dense<0.000000e+00> : vector<6x32xf32>
    %32 = tpu.matmul %29, %31, %cst_17 {dimension_numbers = #tpu.dot_dimension_numbers<[1], [0], [0], [1], [0, 0, 1, 1], [], []>} : vector<6x16xbf16>, vector<16x32xbf16>, vector<6x32xf32> -> vector<6x32xf32>
    %33 = arith.addf %27, %32 : vector<6x32xf32>
    %34 = vector.extract_strided_slice %2 {offsets = [19, 0], sizes = [6, 16], strides = [1, 1]} : vector<33x16xf32> to vector<6x16xf32>
    %35 = arith.truncf %34 : vector<6x16xf32> to vector<6x16xbf16>
    %c5 = arith.constant 5 : index
    %c0_18 = arith.constant 0 : index
    %c0_19 = arith.constant 0 : index
    %36 = vector.load %arg3[%c5, %c0_18, %c0_19] : memref<9x16x32xbf16, #tpu.memory_space<vmem>>, vector<1x16x32xbf16>
    %37 = vector.shape_cast %36 : vector<1x16x32xbf16> to vector<16x32xbf16>
    %cst_20 = arith.constant dense<0.000000e+00> : vector<6x32xf32>
    %38 = tpu.matmul %35, %37, %cst_20 {dimension_numbers = #tpu.dot_dimension_numbers<[1], [0], [0], [1], [0, 0, 1, 1], [], []>} : vector<6x16xbf16>, vector<16x32xbf16>, vector<6x32xf32> -> vector<6x32xf32>
    %39 = arith.addf %33, %38 : vector<6x32xf32>
    %40 = vector.extract_strided_slice %2 {offsets = [3, 0], sizes = [6, 16], strides = [1, 1]} : vector<33x16xf32> to vector<6x16xf32>
    %41 = arith.truncf %40 : vector<6x16xf32> to vector<6x16xbf16>
    %c6 = arith.constant 6 : index
    %c0_21 = arith.constant 0 : index
    %c0_22 = arith.constant 0 : index
    %42 = vector.load %arg3[%c6, %c0_21, %c0_22] : memref<9x16x32xbf16, #tpu.memory_space<vmem>>, vector<1x16x32xbf16>
    %43 = vector.shape_cast %42 : vector<1x16x32xbf16> to vector<16x32xbf16>
    %cst_23 = arith.constant dense<0.000000e+00> : vector<6x32xf32>
    %44 = tpu.matmul %41, %43, %cst_23 {dimension_numbers = #tpu.dot_dimension_numbers<[1], [0], [0], [1], [0, 0, 1, 1], [], []>} : vector<6x16xbf16>, vector<16x32xbf16>, vector<6x32xf32> -> vector<6x32xf32>
    %45 = arith.addf %39, %44 : vector<6x32xf32>
    %46 = vector.extract_strided_slice %2 {offsets = [12, 0], sizes = [6, 16], strides = [1, 1]} : vector<33x16xf32> to vector<6x16xf32>
    %47 = arith.truncf %46 : vector<6x16xf32> to vector<6x16xbf16>
    %c7 = arith.constant 7 : index
    %c0_24 = arith.constant 0 : index
    %c0_25 = arith.constant 0 : index
    %48 = vector.load %arg3[%c7, %c0_24, %c0_25] : memref<9x16x32xbf16, #tpu.memory_space<vmem>>, vector<1x16x32xbf16>
    %49 = vector.shape_cast %48 : vector<1x16x32xbf16> to vector<16x32xbf16>
    %cst_26 = arith.constant dense<0.000000e+00> : vector<6x32xf32>
    %50 = tpu.matmul %47, %49, %cst_26 {dimension_numbers = #tpu.dot_dimension_numbers<[1], [0], [0], [1], [0, 0, 1, 1], [], []>} : vector<6x16xbf16>, vector<16x32xbf16>, vector<6x32xf32> -> vector<6x32xf32>
    %51 = arith.addf %45, %50 : vector<6x32xf32>
    %52 = vector.extract_strided_slice %2 {offsets = [4, 0], sizes = [6, 16], strides = [1, 1]} : vector<33x16xf32> to vector<6x16xf32>
    %53 = arith.truncf %52 : vector<6x16xf32> to vector<6x16xbf16>
    %c8 = arith.constant 8 : index
    %c0_27 = arith.constant 0 : index
    %c0_28 = arith.constant 0 : index
    %54 = vector.load %arg3[%c8, %c0_27, %c0_28] : memref<9x16x32xbf16, #tpu.memory_space<vmem>>, vector<1x16x32xbf16>
    %55 = vector.shape_cast %54 : vector<1x16x32xbf16> to vector<16x32xbf16>
    %cst_29 = arith.constant dense<0.000000e+00> : vector<6x32xf32>
    %56 = tpu.matmul %53, %55, %cst_29 {dimension_numbers = #tpu.dot_dimension_numbers<[1], [0], [0], [1], [0, 0, 1, 1], [], []>} : vector<6x16xbf16>, vector<16x32xbf16>, vector<6x32xf32> -> vector<6x32xf32>
    %57 = arith.addf %51, %56 : vector<6x32xf32>
    %c0_30 = arith.constant 0 : index
    %c0_31 = arith.constant 0 : index
    %58 = vector.load %arg4[%c0_30, %c0_31] : memref<1x32xf32, #tpu.memory_space<vmem>>, vector<1x32xf32>
    %59 = vector.broadcast %58 : vector<1x32xf32> to vector<6x32xf32>
    %60 = arith.addf %57, %59 : vector<6x32xf32>
    %cst_32 = arith.constant 0.000000e+00 : f32
    %61 = vector.broadcast %cst_32 : f32 to vector<6x32xf32>
    %62 = arith.maximumf %60, %61 : vector<6x32xf32>
    %63 = arith.truncf %62 : vector<6x32xf32> to vector<6x32xbf16>
    %c0_33 = arith.constant 0 : index
    %c0_34 = arith.constant 0 : index
    %c0_35 = arith.constant 0 : index
    %64 = vector.load %arg5[%c0_33, %c0_34, %c0_35] : memref<1x6x32xbf16, #tpu.memory_space<vmem>>, vector<1x6x32xbf16>
    %65 = vector.shape_cast %64 : vector<1x6x32xbf16> to vector<6x32xbf16>
    %66 = vector.shape_cast %63 : vector<6x32xbf16> to vector<1x6x32xbf16>
    tpu.vector_store %arg5[%c0_33, %c0_34, %c0_35], %66 {strides = array<i32>} : memref<1x6x32xbf16, #tpu.memory_space<vmem>>, vector<1x6x32xbf16>,
    return
  }
  func.func @transform_0(%arg0: i32, %arg1: i32) -> (i32, i32, i32) {
    %c0_i32 = arith.constant 0 : i32
    %c0_i32_0 = arith.constant 0 : i32
    %c0_i32_1 = arith.constant 0 : i32
    return %arg0, %c0_i32, %c0_i32_0 : i32, i32, i32
  }
  func.func @transform_1(%arg0: i32, %arg1: i32) -> (i32, i32, i32) {
    %c0_i32 = arith.constant 0 : i32
    %c0_i32_0 = arith.constant 0 : i32
    %c0_i32_1 = arith.constant 0 : i32
    %c0_i32_2 = arith.constant 0 : i32
    return %c0_i32, %c0_i32_0, %c0_i32_1 : i32, i32, i32
  }
  func.func @transform_2(%arg0: i32, %arg1: i32) -> (i32, i32) {
    %c0_i32 = arith.constant 0 : i32
    %c0_i32_0 = arith.constant 0 : i32
    %c0_i32_1 = arith.constant 0 : i32
    return %c0_i32, %c0_i32_0 : i32, i32
  }
  func.func @transform_3(%arg0: i32, %arg1: i32) -> (i32, i32, i32) {
    %c0_i32 = arith.constant 0 : i32
    %c0_i32_0 = arith.constant 0 : i32
    return %arg0, %arg1, %c0_i32 : i32, i32, i32
  }
}

module attributes {stable_mosaic.version = 11 : i64} {
  func.func @_fc_head_kernel(%arg0: memref<2x128xbf16, #tpu.memory_space<vmem>>, %arg1: memref<128x16xbf16, #tpu.memory_space<vmem>>, %arg2: memref<1x16xf32, #tpu.memory_space<vmem>>, %arg3: memref<128x16xbf16, #tpu.memory_space<vmem>>, %arg4: memref<1x16xf32, #tpu.memory_space<vmem>>, %arg5: memref<2x16xf32, #tpu.memory_space<vmem>>, %arg6: memref<16x128xbf16, #tpu.memory_space<vmem>>, %arg7: memref<1x128xf32, #tpu.memory_space<vmem>>, %arg8: memref<2x16xf32, #tpu.memory_space<vmem>>, %arg9: memref<2x16xf32, #tpu.memory_space<vmem>>, %arg10: memref<2x128xbf16, #tpu.memory_space<vmem>>) attributes {dimension_semantics = [], scalar_prefetch = 0 : i64, scratch_operands = 0 : i64, tpu.core_type = #tpu.core_type<tc>} {
    %c0 = arith.constant 0 : index
    %c0_0 = arith.constant 0 : index
    %0 = vector.load %arg0[%c0, %c0_0] : memref<2x128xbf16, #tpu.memory_space<vmem>>, vector<2x128xbf16>
    %c0_1 = arith.constant 0 : index
    %c0_2 = arith.constant 0 : index
    %1 = vector.load %arg1[%c0_1, %c0_2] : memref<128x16xbf16, #tpu.memory_space<vmem>>, vector<128x16xbf16>
    %cst = arith.constant dense<0.000000e+00> : vector<2x16xf32>
    %2 = tpu.matmul %0, %1, %cst {dimension_numbers = #tpu.dot_dimension_numbers<[1], [0], [0], [1], [0, 0, 1, 1], [], []>} : vector<2x128xbf16>, vector<128x16xbf16>, vector<2x16xf32> -> vector<2x16xf32>
    %c0_3 = arith.constant 0 : index
    %c0_4 = arith.constant 0 : index
    %3 = vector.load %arg2[%c0_3, %c0_4] : memref<1x16xf32, #tpu.memory_space<vmem>>, vector<1x16xf32>
    %4 = vector.broadcast %3 : vector<1x16xf32> to vector<2x16xf32>
    %5 = arith.addf %2, %4 : vector<2x16xf32>
    %c0_5 = arith.constant 0 : index
    %c0_6 = arith.constant 0 : index
    %6 = vector.load %arg3[%c0_5, %c0_6] : memref<128x16xbf16, #tpu.memory_space<vmem>>, vector<128x16xbf16>
    %cst_7 = arith.constant dense<0.000000e+00> : vector<2x16xf32>
    %7 = tpu.matmul %0, %6, %cst_7 {dimension_numbers = #tpu.dot_dimension_numbers<[1], [0], [0], [1], [0, 0, 1, 1], [], []>} : vector<2x128xbf16>, vector<128x16xbf16>, vector<2x16xf32> -> vector<2x16xf32>
    %c0_8 = arith.constant 0 : index
    %c0_9 = arith.constant 0 : index
    %8 = vector.load %arg4[%c0_8, %c0_9] : memref<1x16xf32, #tpu.memory_space<vmem>>, vector<1x16xf32>
    %9 = vector.broadcast %8 : vector<1x16xf32> to vector<2x16xf32>
    %10 = arith.addf %7, %9 : vector<2x16xf32>
    %c0_10 = arith.constant 0 : index
    %c0_11 = arith.constant 0 : index
    %11 = vector.load %arg5[%c0_10, %c0_11] : memref<2x16xf32, #tpu.memory_space<vmem>>, vector<2x16xf32>
    %cst_12 = arith.constant 5.000000e-01 : f32
    %12 = vector.broadcast %cst_12 : f32 to vector<2x16xf32>
    %13 = arith.mulf %12, %10 : vector<2x16xf32>
    %14 = math.exp %13 : vector<2x16xf32>
    %15 = arith.mulf %11, %14 : vector<2x16xf32>
    %16 = arith.addf %15, %5 : vector<2x16xf32>
    %17 = arith.truncf %16 : vector<2x16xf32> to vector<2x16xbf16>
    %c0_13 = arith.constant 0 : index
    %c0_14 = arith.constant 0 : index
    %18 = vector.load %arg6[%c0_13, %c0_14] : memref<16x128xbf16, #tpu.memory_space<vmem>>, vector<16x128xbf16>
    %cst_15 = arith.constant dense<0.000000e+00> : vector<2x128xf32>
    %19 = tpu.matmul %17, %18, %cst_15 {dimension_numbers = #tpu.dot_dimension_numbers<[1], [0], [0], [1], [0, 0, 1, 1], [], []>} : vector<2x16xbf16>, vector<16x128xbf16>, vector<2x128xf32> -> vector<2x128xf32>
    %c0_16 = arith.constant 0 : index
    %c0_17 = arith.constant 0 : index
    %20 = vector.load %arg7[%c0_16, %c0_17] : memref<1x128xf32, #tpu.memory_space<vmem>>, vector<1x128xf32>
    %21 = vector.broadcast %20 : vector<1x128xf32> to vector<2x128xf32>
    %22 = arith.addf %19, %21 : vector<2x128xf32>
    %c0_18 = arith.constant 0 : index
    %c0_19 = arith.constant 0 : index
    %23 = vector.load %arg8[%c0_18, %c0_19] : memref<2x16xf32, #tpu.memory_space<vmem>>, vector<2x16xf32>
    tpu.vector_store %arg8[%c0_18, %c0_19], %5 {strides = array<i32>} : memref<2x16xf32, #tpu.memory_space<vmem>>, vector<2x16xf32>,
    %c0_20 = arith.constant 0 : index
    %c0_21 = arith.constant 0 : index
    %24 = vector.load %arg9[%c0_20, %c0_21] : memref<2x16xf32, #tpu.memory_space<vmem>>, vector<2x16xf32>
    tpu.vector_store %arg9[%c0_20, %c0_21], %10 {strides = array<i32>} : memref<2x16xf32, #tpu.memory_space<vmem>>, vector<2x16xf32>,
    %25 = arith.truncf %22 : vector<2x128xf32> to vector<2x128xbf16>
    %c0_22 = arith.constant 0 : index
    %c0_23 = arith.constant 0 : index
    %26 = vector.load %arg10[%c0_22, %c0_23] : memref<2x128xbf16, #tpu.memory_space<vmem>>, vector<2x128xbf16>
    tpu.vector_store %arg10[%c0_22, %c0_23], %25 {strides = array<i32>} : memref<2x128xbf16, #tpu.memory_space<vmem>>, vector<2x128xbf16>,
    return
  }
}

module attributes {stable_mosaic.version = 11 : i64} {
  func.func @_tap_matmul_kernel(%arg0: i32, %arg1: i32, %arg2: memref<1x17x32xbf16, #tpu.memory_space<vmem>>, %arg3: memref<9x32x64xbf16, #tpu.memory_space<vmem>>, %arg4: memref<1x64xf32, #tpu.memory_space<vmem>>, %arg5: memref<1x6x64xbf16, #tpu.memory_space<vmem>>) attributes {dimension_semantics = [#tpu.dimension_semantics<parallel>, #tpu.dimension_semantics<parallel>], iteration_bounds = array<i64: 2, 1>, scalar_prefetch = 0 : i64, scratch_operands = 0 : i64, tpu.core_type = #tpu.core_type<tc>, window_params = [{transform_indices = @transform_0, window_bounds = array<i64: 1, 17, 32>}, {pipeline_mode = #tpu.pipeline_mode<synchronous>, transform_indices = @transform_1, window_bounds = array<i64: 9, 32, 64>}, {pipeline_mode = #tpu.pipeline_mode<synchronous>, transform_indices = @transform_2, window_bounds = array<i64: 1, 64>}, {transform_indices = @transform_3, window_bounds = array<i64: 1, 6, 64>}]} {
    %c0 = arith.constant 0 : index
    %c0_0 = arith.constant 0 : index
    %c0_1 = arith.constant 0 : index
    %0 = vector.load %arg2[%c0, %c0_0, %c0_1] : memref<1x17x32xbf16, #tpu.memory_space<vmem>>, vector<1x10x32xbf16>
    %1 = vector.shape_cast %0 : vector<1x10x32xbf16> to vector<10x32xbf16>
    %2 = arith.extf %1 : vector<10x32xbf16> to vector<10x32xf32>
    %cst = arith.constant 0.000000e+00 : f32
    %3 = vector.broadcast %cst : f32 to vector<6x64xf32>
    %4 = vector.extract_strided_slice %2 {offsets = [4, 0], sizes = [6, 32], strides = [1, 1]} : vector<10x32xf32> to vector<6x32xf32>
    %5 = arith.truncf %4 : vector<6x32xf32> to vector<6x32xbf16>
    %c0_2 = arith.constant 0 : index
    %c0_3 = arith.constant 0 : index
    %c0_4 = arith.constant 0 : index
    %6 = vector.load %arg3[%c0_2, %c0_3, %c0_4] : memref<9x32x64xbf16, #tpu.memory_space<vmem>>, vector<1x32x64xbf16>
    %7 = vector.shape_cast %6 : vector<1x32x64xbf16> to vector<32x64xbf16>
    %cst_5 = arith.constant dense<0.000000e+00> : vector<6x64xf32>
    %8 = tpu.matmul %5, %7, %cst_5 {dimension_numbers = #tpu.dot_dimension_numbers<[1], [0], [0], [1], [0, 0, 1, 1], [], []>} : vector<6x32xbf16>, vector<32x64xbf16>, vector<6x64xf32> -> vector<6x64xf32>
    %9 = arith.addf %3, %8 : vector<6x64xf32>
    %10 = vector.extract_strided_slice %2 {offsets = [3, 0], sizes = [6, 32], strides = [1, 1]} : vector<10x32xf32> to vector<6x32xf32>
    %11 = arith.truncf %10 : vector<6x32xf32> to vector<6x32xbf16>
    %c1 = arith.constant 1 : index
    %c0_6 = arith.constant 0 : index
    %c0_7 = arith.constant 0 : index
    %12 = vector.load %arg3[%c1, %c0_6, %c0_7] : memref<9x32x64xbf16, #tpu.memory_space<vmem>>, vector<1x32x64xbf16>
    %13 = vector.shape_cast %12 : vector<1x32x64xbf16> to vector<32x64xbf16>
    %cst_8 = arith.constant dense<0.000000e+00> : vector<6x64xf32>
    %14 = tpu.matmul %11, %13, %cst_8 {dimension_numbers = #tpu.dot_dimension_numbers<[1], [0], [0], [1], [0, 0, 1, 1], [], []>} : vector<6x32xbf16>, vector<32x64xbf16>, vector<6x64xf32> -> vector<6x64xf32>
    %15 = arith.addf %9, %14 : vector<6x64xf32>
    %16 = vector.extract_strided_slice %2 {offsets = [3, 0], sizes = [6, 32], strides = [1, 1]} : vector<10x32xf32> to vector<6x32xf32>
    %17 = arith.truncf %16 : vector<6x32xf32> to vector<6x32xbf16>
    %c2 = arith.constant 2 : index
    %c0_9 = arith.constant 0 : index
    %c0_10 = arith.constant 0 : index
    %18 = vector.load %arg3[%c2, %c0_9, %c0_10] : memref<9x32x64xbf16, #tpu.memory_space<vmem>>, vector<1x32x64xbf16>
    %19 = vector.shape_cast %18 : vector<1x32x64xbf16> to vector<32x64xbf16>
    %cst_11 = arith.constant dense<0.000000e+00> : vector<6x64xf32>
    %20 = tpu.matmul %17, %19, %cst_11 {dimension_numbers = #tpu.dot_dimension_numbers<[1], [0], [0], [1], [0, 0, 1, 1], [], []>} : vector<6x32xbf16>, vector<32x64xbf16>, vector<6x64xf32> -> vector<6x64xf32>
    %21 = arith.addf %15, %20 : vector<6x64xf32>
    %22 = vector.extract_strided_slice %2 {offsets = [1, 0], sizes = [6, 32], strides = [1, 1]} : vector<10x32xf32> to vector<6x32xf32>
    %23 = arith.truncf %22 : vector<6x32xf32> to vector<6x32xbf16>
    %c3 = arith.constant 3 : index
    %c0_12 = arith.constant 0 : index
    %c0_13 = arith.constant 0 : index
    %24 = vector.load %arg3[%c3, %c0_12, %c0_13] : memref<9x32x64xbf16, #tpu.memory_space<vmem>>, vector<1x32x64xbf16>
    %25 = vector.shape_cast %24 : vector<1x32x64xbf16> to vector<32x64xbf16>
    %cst_14 = arith.constant dense<0.000000e+00> : vector<6x64xf32>
    %26 = tpu.matmul %23, %25, %cst_14 {dimension_numbers = #tpu.dot_dimension_numbers<[1], [0], [0], [1], [0, 0, 1, 1], [], []>} : vector<6x32xbf16>, vector<32x64xbf16>, vector<6x64xf32> -> vector<6x64xf32>
    %27 = arith.addf %21, %26 : vector<6x64xf32>
    %28 = vector.extract_strided_slice %2 {offsets = [0, 0], sizes = [6, 32], strides = [1, 1]} : vector<10x32xf32> to vector<6x32xf32>
    %29 = arith.truncf %28 : vector<6x32xf32> to vector<6x32xbf16>
    %c4 = arith.constant 4 : index
    %c0_15 = arith.constant 0 : index
    %c0_16 = arith.constant 0 : index
    %30 = vector.load %arg3[%c4, %c0_15, %c0_16] : memref<9x32x64xbf16, #tpu.memory_space<vmem>>, vector<1x32x64xbf16>
    %31 = vector.shape_cast %30 : vector<1x32x64xbf16> to vector<32x64xbf16>
    %cst_17 = arith.constant dense<0.000000e+00> : vector<6x64xf32>
    %32 = tpu.matmul %29, %31, %cst_17 {dimension_numbers = #tpu.dot_dimension_numbers<[1], [0], [0], [1], [0, 0, 1, 1], [], []>} : vector<6x32xbf16>, vector<32x64xbf16>, vector<6x64xf32> -> vector<6x64xf32>
    %33 = arith.addf %27, %32 : vector<6x64xf32>
    %34 = vector.extract_strided_slice %2 {offsets = [0, 0], sizes = [6, 32], strides = [1, 1]} : vector<10x32xf32> to vector<6x32xf32>
    %35 = arith.truncf %34 : vector<6x32xf32> to vector<6x32xbf16>
    %c5 = arith.constant 5 : index
    %c0_18 = arith.constant 0 : index
    %c0_19 = arith.constant 0 : index
    %36 = vector.load %arg3[%c5, %c0_18, %c0_19] : memref<9x32x64xbf16, #tpu.memory_space<vmem>>, vector<1x32x64xbf16>
    %37 = vector.shape_cast %36 : vector<1x32x64xbf16> to vector<32x64xbf16>
    %cst_20 = arith.constant dense<0.000000e+00> : vector<6x64xf32>
    %38 = tpu.matmul %35, %37, %cst_20 {dimension_numbers = #tpu.dot_dimension_numbers<[1], [0], [0], [1], [0, 0, 1, 1], [], []>} : vector<6x32xbf16>, vector<32x64xbf16>, vector<6x64xf32> -> vector<6x64xf32>
    %39 = arith.addf %33, %38 : vector<6x64xf32>
    %40 = vector.extract_strided_slice %2 {offsets = [1, 0], sizes = [6, 32], strides = [1, 1]} : vector<10x32xf32> to vector<6x32xf32>
    %41 = arith.truncf %40 : vector<6x32xf32> to vector<6x32xbf16>
    %c6 = arith.constant 6 : index
    %c0_21 = arith.constant 0 : index
    %c0_22 = arith.constant 0 : index
    %42 = vector.load %arg3[%c6, %c0_21, %c0_22] : memref<9x32x64xbf16, #tpu.memory_space<vmem>>, vector<1x32x64xbf16>
    %43 = vector.shape_cast %42 : vector<1x32x64xbf16> to vector<32x64xbf16>
    %cst_23 = arith.constant dense<0.000000e+00> : vector<6x64xf32>
    %44 = tpu.matmul %41, %43, %cst_23 {dimension_numbers = #tpu.dot_dimension_numbers<[1], [0], [0], [1], [0, 0, 1, 1], [], []>} : vector<6x32xbf16>, vector<32x64xbf16>, vector<6x64xf32> -> vector<6x64xf32>
    %45 = arith.addf %39, %44 : vector<6x64xf32>
    %46 = vector.extract_strided_slice %2 {offsets = [0, 0], sizes = [6, 32], strides = [1, 1]} : vector<10x32xf32> to vector<6x32xf32>
    %47 = arith.truncf %46 : vector<6x32xf32> to vector<6x32xbf16>
    %c7 = arith.constant 7 : index
    %c0_24 = arith.constant 0 : index
    %c0_25 = arith.constant 0 : index
    %48 = vector.load %arg3[%c7, %c0_24, %c0_25] : memref<9x32x64xbf16, #tpu.memory_space<vmem>>, vector<1x32x64xbf16>
    %49 = vector.shape_cast %48 : vector<1x32x64xbf16> to vector<32x64xbf16>
    %cst_26 = arith.constant dense<0.000000e+00> : vector<6x64xf32>
    %50 = tpu.matmul %47, %49, %cst_26 {dimension_numbers = #tpu.dot_dimension_numbers<[1], [0], [0], [1], [0, 0, 1, 1], [], []>} : vector<6x32xbf16>, vector<32x64xbf16>, vector<6x64xf32> -> vector<6x64xf32>
    %51 = arith.addf %45, %50 : vector<6x64xf32>
    %52 = vector.extract_strided_slice %2 {offsets = [0, 0], sizes = [6, 32], strides = [1, 1]} : vector<10x32xf32> to vector<6x32xf32>
    %53 = arith.truncf %52 : vector<6x32xf32> to vector<6x32xbf16>
    %c8 = arith.constant 8 : index
    %c0_27 = arith.constant 0 : index
    %c0_28 = arith.constant 0 : index
    %54 = vector.load %arg3[%c8, %c0_27, %c0_28] : memref<9x32x64xbf16, #tpu.memory_space<vmem>>, vector<1x32x64xbf16>
    %55 = vector.shape_cast %54 : vector<1x32x64xbf16> to vector<32x64xbf16>
    %cst_29 = arith.constant dense<0.000000e+00> : vector<6x64xf32>
    %56 = tpu.matmul %53, %55, %cst_29 {dimension_numbers = #tpu.dot_dimension_numbers<[1], [0], [0], [1], [0, 0, 1, 1], [], []>} : vector<6x32xbf16>, vector<32x64xbf16>, vector<6x64xf32> -> vector<6x64xf32>
    %57 = arith.addf %51, %56 : vector<6x64xf32>
    %c0_30 = arith.constant 0 : index
    %c0_31 = arith.constant 0 : index
    %58 = vector.load %arg4[%c0_30, %c0_31] : memref<1x64xf32, #tpu.memory_space<vmem>>, vector<1x64xf32>
    %59 = vector.broadcast %58 : vector<1x64xf32> to vector<6x64xf32>
    %60 = arith.addf %57, %59 : vector<6x64xf32>
    %cst_32 = arith.constant 0.000000e+00 : f32
    %61 = vector.broadcast %cst_32 : f32 to vector<6x64xf32>
    %62 = arith.maximumf %60, %61 : vector<6x64xf32>
    %63 = arith.truncf %62 : vector<6x64xf32> to vector<6x64xbf16>
    %c0_33 = arith.constant 0 : index
    %c0_34 = arith.constant 0 : index
    %c0_35 = arith.constant 0 : index
    %64 = vector.load %arg5[%c0_33, %c0_34, %c0_35] : memref<1x6x64xbf16, #tpu.memory_space<vmem>>, vector<1x6x64xbf16>
    %65 = vector.shape_cast %64 : vector<1x6x64xbf16> to vector<6x64xbf16>
    %66 = vector.shape_cast %63 : vector<6x64xbf16> to vector<1x6x64xbf16>
    tpu.vector_store %arg5[%c0_33, %c0_34, %c0_35], %66 {strides = array<i32>} : memref<1x6x64xbf16, #tpu.memory_space<vmem>>, vector<1x6x64xbf16>,
    return
  }
  func.func @transform_0(%arg0: i32, %arg1: i32) -> (i32, i32, i32) {
    %c0_i32 = arith.constant 0 : i32
    %c0_i32_0 = arith.constant 0 : i32
    %c0_i32_1 = arith.constant 0 : i32
    return %arg0, %c0_i32, %c0_i32_0 : i32, i32, i32
  }
  func.func @transform_1(%arg0: i32, %arg1: i32) -> (i32, i32, i32) {
    %c0_i32 = arith.constant 0 : i32
    %c0_i32_0 = arith.constant 0 : i32
    %c0_i32_1 = arith.constant 0 : i32
    %c0_i32_2 = arith.constant 0 : i32
    return %c0_i32, %c0_i32_0, %c0_i32_1 : i32, i32, i32
  }
  func.func @transform_2(%arg0: i32, %arg1: i32) -> (i32, i32) {
    %c0_i32 = arith.constant 0 : i32
    %c0_i32_0 = arith.constant 0 : i32
    %c0_i32_1 = arith.constant 0 : i32
    return %c0_i32, %c0_i32_0 : i32, i32
  }
  func.func @transform_3(%arg0: i32, %arg1: i32) -> (i32, i32, i32) {
    %c0_i32 = arith.constant 0 : i32
    %c0_i32_0 = arith.constant 0 : i32
    return %arg0, %arg1, %c0_i32 : i32, i32, i32
  }
}

module attributes {stable_mosaic.version = 11 : i64} {
  func.func @_tap_matmul_kernel(%arg0: i32, %arg1: i32, %arg2: memref<1x33x16xbf16, #tpu.memory_space<vmem>>, %arg3: memref<9x16x32xbf16, #tpu.memory_space<vmem>>, %arg4: memref<1x32xf32, #tpu.memory_space<vmem>>, %arg5: memref<1x20x32xbf16, #tpu.memory_space<vmem>>) attributes {dimension_semantics = [#tpu.dimension_semantics<parallel>, #tpu.dimension_semantics<parallel>], iteration_bounds = array<i64: 2, 1>, scalar_prefetch = 0 : i64, scratch_operands = 0 : i64, tpu.core_type = #tpu.core_type<tc>, window_params = [{transform_indices = @transform_0, window_bounds = array<i64: 1, 33, 16>}, {pipeline_mode = #tpu.pipeline_mode<synchronous>, transform_indices = @transform_1, window_bounds = array<i64: 9, 16, 32>}, {pipeline_mode = #tpu.pipeline_mode<synchronous>, transform_indices = @transform_2, window_bounds = array<i64: 1, 32>}, {transform_indices = @transform_3, window_bounds = array<i64: 1, 20, 32>}]} {
    %c0 = arith.constant 0 : index
    %c0_0 = arith.constant 0 : index
    %c0_1 = arith.constant 0 : index
    %0 = vector.load %arg2[%c0, %c0_0, %c0_1] : memref<1x33x16xbf16, #tpu.memory_space<vmem>>, vector<1x26x16xbf16>
    %1 = vector.shape_cast %0 : vector<1x26x16xbf16> to vector<26x16xbf16>
    %2 = arith.extf %1 : vector<26x16xbf16> to vector<26x16xf32>
    %cst = arith.constant 0.000000e+00 : f32
    %3 = vector.broadcast %cst : f32 to vector<20x32xf32>
    %4 = vector.extract_strided_slice %2 {offsets = [6, 0], sizes = [20, 16], strides = [1, 1]} : vector<26x16xf32> to vector<20x16xf32>
    %5 = arith.truncf %4 : vector<20x16xf32> to vector<20x16xbf16>
    %c0_2 = arith.constant 0 : index
    %c0_3 = arith.constant 0 : index
    %c0_4 = arith.constant 0 : index
    %6 = vector.load %arg3[%c0_2, %c0_3, %c0_4] : memref<9x16x32xbf16, #tpu.memory_space<vmem>>, vector<1x16x32xbf16>
    %7 = vector.shape_cast %6 : vector<1x16x32xbf16> to vector<16x32xbf16>
    %cst_5 = arith.constant dense<0.000000e+00> : vector<20x32xf32>
    %8 = tpu.matmul %5, %7, %cst_5 {dimension_numbers = #tpu.dot_dimension_numbers<[1], [0], [0], [1], [0, 0, 1, 1], [], []>} : vector<20x16xbf16>, vector<16x32xbf16>, vector<20x32xf32> -> vector<20x32xf32>
    %9 = arith.addf %3, %8 : vector<20x32xf32>
    %10 = vector.extract_strided_slice %2 {offsets = [5, 0], sizes = [20, 16], strides = [1, 1]} : vector<26x16xf32> to vector<20x16xf32>
    %11 = arith.truncf %10 : vector<20x16xf32> to vector<20x16xbf16>
    %c1 = arith.constant 1 : index
    %c0_6 = arith.constant 0 : index
    %c0_7 = arith.constant 0 : index
    %12 = vector.load %arg3[%c1, %c0_6, %c0_7] : memref<9x16x32xbf16, #tpu.memory_space<vmem>>, vector<1x16x32xbf16>
    %13 = vector.shape_cast %12 : vector<1x16x32xbf16> to vector<16x32xbf16>
    %cst_8 = arith.constant dense<0.000000e+00> : vector<20x32xf32>
    %14 = tpu.matmul %11, %13, %cst_8 {dimension_numbers = #tpu.dot_dimension_numbers<[1], [0], [0], [1], [0, 0, 1, 1], [], []>} : vector<20x16xbf16>, vector<16x32xbf16>, vector<20x32xf32> -> vector<20x32xf32>
    %15 = arith.addf %9, %14 : vector<20x32xf32>
    %16 = vector.extract_strided_slice %2 {offsets = [5, 0], sizes = [20, 16], strides = [1, 1]} : vector<26x16xf32> to vector<20x16xf32>
    %17 = arith.truncf %16 : vector<20x16xf32> to vector<20x16xbf16>
    %c2 = arith.constant 2 : index
    %c0_9 = arith.constant 0 : index
    %c0_10 = arith.constant 0 : index
    %18 = vector.load %arg3[%c2, %c0_9, %c0_10] : memref<9x16x32xbf16, #tpu.memory_space<vmem>>, vector<1x16x32xbf16>
    %19 = vector.shape_cast %18 : vector<1x16x32xbf16> to vector<16x32xbf16>
    %cst_11 = arith.constant dense<0.000000e+00> : vector<20x32xf32>
    %20 = tpu.matmul %17, %19, %cst_11 {dimension_numbers = #tpu.dot_dimension_numbers<[1], [0], [0], [1], [0, 0, 1, 1], [], []>} : vector<20x16xbf16>, vector<16x32xbf16>, vector<20x32xf32> -> vector<20x32xf32>
    %21 = arith.addf %15, %20 : vector<20x32xf32>
    %22 = vector.extract_strided_slice %2 {offsets = [1, 0], sizes = [20, 16], strides = [1, 1]} : vector<26x16xf32> to vector<20x16xf32>
    %23 = arith.truncf %22 : vector<20x16xf32> to vector<20x16xbf16>
    %c3 = arith.constant 3 : index
    %c0_12 = arith.constant 0 : index
    %c0_13 = arith.constant 0 : index
    %24 = vector.load %arg3[%c3, %c0_12, %c0_13] : memref<9x16x32xbf16, #tpu.memory_space<vmem>>, vector<1x16x32xbf16>
    %25 = vector.shape_cast %24 : vector<1x16x32xbf16> to vector<16x32xbf16>
    %cst_14 = arith.constant dense<0.000000e+00> : vector<20x32xf32>
    %26 = tpu.matmul %23, %25, %cst_14 {dimension_numbers = #tpu.dot_dimension_numbers<[1], [0], [0], [1], [0, 0, 1, 1], [], []>} : vector<20x16xbf16>, vector<16x32xbf16>, vector<20x32xf32> -> vector<20x32xf32>
    %27 = arith.addf %21, %26 : vector<20x32xf32>
    %28 = vector.extract_strided_slice %2 {offsets = [0, 0], sizes = [20, 16], strides = [1, 1]} : vector<26x16xf32> to vector<20x16xf32>
    %29 = arith.truncf %28 : vector<20x16xf32> to vector<20x16xbf16>
    %c4 = arith.constant 4 : index
    %c0_15 = arith.constant 0 : index
    %c0_16 = arith.constant 0 : index
    %30 = vector.load %arg3[%c4, %c0_15, %c0_16] : memref<9x16x32xbf16, #tpu.memory_space<vmem>>, vector<1x16x32xbf16>
    %31 = vector.shape_cast %30 : vector<1x16x32xbf16> to vector<16x32xbf16>
    %cst_17 = arith.constant dense<0.000000e+00> : vector<20x32xf32>
    %32 = tpu.matmul %29, %31, %cst_17 {dimension_numbers = #tpu.dot_dimension_numbers<[1], [0], [0], [1], [0, 0, 1, 1], [], []>} : vector<20x16xbf16>, vector<16x32xbf16>, vector<20x32xf32> -> vector<20x32xf32>
    %33 = arith.addf %27, %32 : vector<20x32xf32>
    %34 = vector.extract_strided_slice %2 {offsets = [0, 0], sizes = [20, 16], strides = [1, 1]} : vector<26x16xf32> to vector<20x16xf32>
    %35 = arith.truncf %34 : vector<20x16xf32> to vector<20x16xbf16>
    %c5 = arith.constant 5 : index
    %c0_18 = arith.constant 0 : index
    %c0_19 = arith.constant 0 : index
    %36 = vector.load %arg3[%c5, %c0_18, %c0_19] : memref<9x16x32xbf16, #tpu.memory_space<vmem>>, vector<1x16x32xbf16>
    %37 = vector.shape_cast %36 : vector<1x16x32xbf16> to vector<16x32xbf16>
    %cst_20 = arith.constant dense<0.000000e+00> : vector<20x32xf32>
    %38 = tpu.matmul %35, %37, %cst_20 {dimension_numbers = #tpu.dot_dimension_numbers<[1], [0], [0], [1], [0, 0, 1, 1], [], []>} : vector<20x16xbf16>, vector<16x32xbf16>, vector<20x32xf32> -> vector<20x32xf32>
    %39 = arith.addf %33, %38 : vector<20x32xf32>
    %40 = vector.extract_strided_slice %2 {offsets = [1, 0], sizes = [20, 16], strides = [1, 1]} : vector<26x16xf32> to vector<20x16xf32>
    %41 = arith.truncf %40 : vector<20x16xf32> to vector<20x16xbf16>
    %c6 = arith.constant 6 : index
    %c0_21 = arith.constant 0 : index
    %c0_22 = arith.constant 0 : index
    %42 = vector.load %arg3[%c6, %c0_21, %c0_22] : memref<9x16x32xbf16, #tpu.memory_space<vmem>>, vector<1x16x32xbf16>
    %43 = vector.shape_cast %42 : vector<1x16x32xbf16> to vector<16x32xbf16>
    %cst_23 = arith.constant dense<0.000000e+00> : vector<20x32xf32>
    %44 = tpu.matmul %41, %43, %cst_23 {dimension_numbers = #tpu.dot_dimension_numbers<[1], [0], [0], [1], [0, 0, 1, 1], [], []>} : vector<20x16xbf16>, vector<16x32xbf16>, vector<20x32xf32> -> vector<20x32xf32>
    %45 = arith.addf %39, %44 : vector<20x32xf32>
    %46 = vector.extract_strided_slice %2 {offsets = [0, 0], sizes = [20, 16], strides = [1, 1]} : vector<26x16xf32> to vector<20x16xf32>
    %47 = arith.truncf %46 : vector<20x16xf32> to vector<20x16xbf16>
    %c7 = arith.constant 7 : index
    %c0_24 = arith.constant 0 : index
    %c0_25 = arith.constant 0 : index
    %48 = vector.load %arg3[%c7, %c0_24, %c0_25] : memref<9x16x32xbf16, #tpu.memory_space<vmem>>, vector<1x16x32xbf16>
    %49 = vector.shape_cast %48 : vector<1x16x32xbf16> to vector<16x32xbf16>
    %cst_26 = arith.constant dense<0.000000e+00> : vector<20x32xf32>
    %50 = tpu.matmul %47, %49, %cst_26 {dimension_numbers = #tpu.dot_dimension_numbers<[1], [0], [0], [1], [0, 0, 1, 1], [], []>} : vector<20x16xbf16>, vector<16x32xbf16>, vector<20x32xf32> -> vector<20x32xf32>
    %51 = arith.addf %45, %50 : vector<20x32xf32>
    %52 = vector.extract_strided_slice %2 {offsets = [0, 0], sizes = [20, 16], strides = [1, 1]} : vector<26x16xf32> to vector<20x16xf32>
    %53 = arith.truncf %52 : vector<20x16xf32> to vector<20x16xbf16>
    %c8 = arith.constant 8 : index
    %c0_27 = arith.constant 0 : index
    %c0_28 = arith.constant 0 : index
    %54 = vector.load %arg3[%c8, %c0_27, %c0_28] : memref<9x16x32xbf16, #tpu.memory_space<vmem>>, vector<1x16x32xbf16>
    %55 = vector.shape_cast %54 : vector<1x16x32xbf16> to vector<16x32xbf16>
    %cst_29 = arith.constant dense<0.000000e+00> : vector<20x32xf32>
    %56 = tpu.matmul %53, %55, %cst_29 {dimension_numbers = #tpu.dot_dimension_numbers<[1], [0], [0], [1], [0, 0, 1, 1], [], []>} : vector<20x16xbf16>, vector<16x32xbf16>, vector<20x32xf32> -> vector<20x32xf32>
    %57 = arith.addf %51, %56 : vector<20x32xf32>
    %c0_30 = arith.constant 0 : index
    %c0_31 = arith.constant 0 : index
    %58 = vector.load %arg4[%c0_30, %c0_31] : memref<1x32xf32, #tpu.memory_space<vmem>>, vector<1x32xf32>
    %59 = vector.broadcast %58 : vector<1x32xf32> to vector<20x32xf32>
    %60 = arith.addf %57, %59 : vector<20x32xf32>
    %cst_32 = arith.constant 0.000000e+00 : f32
    %61 = vector.broadcast %cst_32 : f32 to vector<20x32xf32>
    %62 = arith.maximumf %60, %61 : vector<20x32xf32>
    %63 = arith.truncf %62 : vector<20x32xf32> to vector<20x32xbf16>
    %c0_33 = arith.constant 0 : index
    %c0_34 = arith.constant 0 : index
    %c0_35 = arith.constant 0 : index
    %64 = vector.load %arg5[%c0_33, %c0_34, %c0_35] : memref<1x20x32xbf16, #tpu.memory_space<vmem>>, vector<1x20x32xbf16>
    %65 = vector.shape_cast %64 : vector<1x20x32xbf16> to vector<20x32xbf16>
    %66 = vector.shape_cast %63 : vector<20x32xbf16> to vector<1x20x32xbf16>
    tpu.vector_store %arg5[%c0_33, %c0_34, %c0_35], %66 {strides = array<i32>} : memref<1x20x32xbf16, #tpu.memory_space<vmem>>, vector<1x20x32xbf16>,
    return
  }
  func.func @transform_0(%arg0: i32, %arg1: i32) -> (i32, i32, i32) {
    %c0_i32 = arith.constant 0 : i32
    %c0_i32_0 = arith.constant 0 : i32
    %c0_i32_1 = arith.constant 0 : i32
    return %arg0, %c0_i32, %c0_i32_0 : i32, i32, i32
  }
  func.func @transform_1(%arg0: i32, %arg1: i32) -> (i32, i32, i32) {
    %c0_i32 = arith.constant 0 : i32
    %c0_i32_0 = arith.constant 0 : i32
    %c0_i32_1 = arith.constant 0 : i32
    %c0_i32_2 = arith.constant 0 : i32
    return %c0_i32, %c0_i32_0, %c0_i32_1 : i32, i32, i32
  }
  func.func @transform_2(%arg0: i32, %arg1: i32) -> (i32, i32) {
    %c0_i32 = arith.constant 0 : i32
    %c0_i32_0 = arith.constant 0 : i32
    %c0_i32_1 = arith.constant 0 : i32
    return %c0_i32, %c0_i32_0 : i32, i32
  }
  func.func @transform_3(%arg0: i32, %arg1: i32) -> (i32, i32, i32) {
    %c0_i32 = arith.constant 0 : i32
    %c0_i32_0 = arith.constant 0 : i32
    return %arg0, %arg1, %c0_i32 : i32, i32, i32
  }
}

module attributes {stable_mosaic.version = 11 : i64} {
  func.func @_tap_matmul_kernel(%arg0: i32, %arg1: i32, %arg2: memref<1x89x8xbf16, #tpu.memory_space<vmem>>, %arg3: memref<9x8x32xbf16, #tpu.memory_space<vmem>>, %arg4: memref<1x32xf32, #tpu.memory_space<vmem>>, %arg5: memref<1x72x32xbf16, #tpu.memory_space<vmem>>) attributes {dimension_semantics = [#tpu.dimension_semantics<parallel>, #tpu.dimension_semantics<parallel>], iteration_bounds = array<i64: 2, 1>, scalar_prefetch = 0 : i64, scratch_operands = 0 : i64, tpu.core_type = #tpu.core_type<tc>, window_params = [{transform_indices = @transform_0, window_bounds = array<i64: 1, 89, 8>}, {pipeline_mode = #tpu.pipeline_mode<synchronous>, transform_indices = @transform_1, window_bounds = array<i64: 9, 8, 32>}, {pipeline_mode = #tpu.pipeline_mode<synchronous>, transform_indices = @transform_2, window_bounds = array<i64: 1, 32>}, {transform_indices = @transform_3, window_bounds = array<i64: 1, 72, 32>}]} {
    %c0 = arith.constant 0 : index
    %c0_0 = arith.constant 0 : index
    %c0_1 = arith.constant 0 : index
    %0 = vector.load %arg2[%c0, %c0_0, %c0_1] : memref<1x89x8xbf16, #tpu.memory_space<vmem>>, vector<1x82x8xbf16>
    %1 = vector.shape_cast %0 : vector<1x82x8xbf16> to vector<82x8xbf16>
    %2 = arith.extf %1 : vector<82x8xbf16> to vector<82x8xf32>
    %cst = arith.constant 0.000000e+00 : f32
    %3 = vector.broadcast %cst : f32 to vector<72x32xf32>
    %4 = vector.extract_strided_slice %2 {offsets = [10, 0], sizes = [72, 8], strides = [1, 1]} : vector<82x8xf32> to vector<72x8xf32>
    %5 = arith.truncf %4 : vector<72x8xf32> to vector<72x8xbf16>
    %c0_2 = arith.constant 0 : index
    %c0_3 = arith.constant 0 : index
    %c0_4 = arith.constant 0 : index
    %6 = vector.load %arg3[%c0_2, %c0_3, %c0_4] : memref<9x8x32xbf16, #tpu.memory_space<vmem>>, vector<1x8x32xbf16>
    %7 = vector.shape_cast %6 : vector<1x8x32xbf16> to vector<8x32xbf16>
    %cst_5 = arith.constant dense<0.000000e+00> : vector<72x32xf32>
    %8 = tpu.matmul %5, %7, %cst_5 {dimension_numbers = #tpu.dot_dimension_numbers<[1], [0], [0], [1], [0, 0, 1, 1], [], []>} : vector<72x8xbf16>, vector<8x32xbf16>, vector<72x32xf32> -> vector<72x32xf32>
    %9 = arith.addf %3, %8 : vector<72x32xf32>
    %10 = vector.extract_strided_slice %2 {offsets = [9, 0], sizes = [72, 8], strides = [1, 1]} : vector<82x8xf32> to vector<72x8xf32>
    %11 = arith.truncf %10 : vector<72x8xf32> to vector<72x8xbf16>
    %c1 = arith.constant 1 : index
    %c0_6 = arith.constant 0 : index
    %c0_7 = arith.constant 0 : index
    %12 = vector.load %arg3[%c1, %c0_6, %c0_7] : memref<9x8x32xbf16, #tpu.memory_space<vmem>>, vector<1x8x32xbf16>
    %13 = vector.shape_cast %12 : vector<1x8x32xbf16> to vector<8x32xbf16>
    %cst_8 = arith.constant dense<0.000000e+00> : vector<72x32xf32>
    %14 = tpu.matmul %11, %13, %cst_8 {dimension_numbers = #tpu.dot_dimension_numbers<[1], [0], [0], [1], [0, 0, 1, 1], [], []>} : vector<72x8xbf16>, vector<8x32xbf16>, vector<72x32xf32> -> vector<72x32xf32>
    %15 = arith.addf %9, %14 : vector<72x32xf32>
    %16 = vector.extract_strided_slice %2 {offsets = [9, 0], sizes = [72, 8], strides = [1, 1]} : vector<82x8xf32> to vector<72x8xf32>
    %17 = arith.truncf %16 : vector<72x8xf32> to vector<72x8xbf16>
    %c2 = arith.constant 2 : index
    %c0_9 = arith.constant 0 : index
    %c0_10 = arith.constant 0 : index
    %18 = vector.load %arg3[%c2, %c0_9, %c0_10] : memref<9x8x32xbf16, #tpu.memory_space<vmem>>, vector<1x8x32xbf16>
    %19 = vector.shape_cast %18 : vector<1x8x32xbf16> to vector<8x32xbf16>
    %cst_11 = arith.constant dense<0.000000e+00> : vector<72x32xf32>
    %20 = tpu.matmul %17, %19, %cst_11 {dimension_numbers = #tpu.dot_dimension_numbers<[1], [0], [0], [1], [0, 0, 1, 1], [], []>} : vector<72x8xbf16>, vector<8x32xbf16>, vector<72x32xf32> -> vector<72x32xf32>
    %21 = arith.addf %15, %20 : vector<72x32xf32>
    %22 = vector.extract_strided_slice %2 {offsets = [1, 0], sizes = [72, 8], strides = [1, 1]} : vector<82x8xf32> to vector<72x8xf32>
    %23 = arith.truncf %22 : vector<72x8xf32> to vector<72x8xbf16>
    %c3 = arith.constant 3 : index
    %c0_12 = arith.constant 0 : index
    %c0_13 = arith.constant 0 : index
    %24 = vector.load %arg3[%c3, %c0_12, %c0_13] : memref<9x8x32xbf16, #tpu.memory_space<vmem>>, vector<1x8x32xbf16>
    %25 = vector.shape_cast %24 : vector<1x8x32xbf16> to vector<8x32xbf16>
    %cst_14 = arith.constant dense<0.000000e+00> : vector<72x32xf32>
    %26 = tpu.matmul %23, %25, %cst_14 {dimension_numbers = #tpu.dot_dimension_numbers<[1], [0], [0], [1], [0, 0, 1, 1], [], []>} : vector<72x8xbf16>, vector<8x32xbf16>, vector<72x32xf32> -> vector<72x32xf32>
    %27 = arith.addf %21, %26 : vector<72x32xf32>
    %28 = vector.extract_strided_slice %2 {offsets = [0, 0], sizes = [72, 8], strides = [1, 1]} : vector<82x8xf32> to vector<72x8xf32>
    %29 = arith.truncf %28 : vector<72x8xf32> to vector<72x8xbf16>
    %c4 = arith.constant 4 : index
    %c0_15 = arith.constant 0 : index
    %c0_16 = arith.constant 0 : index
    %30 = vector.load %arg3[%c4, %c0_15, %c0_16] : memref<9x8x32xbf16, #tpu.memory_space<vmem>>, vector<1x8x32xbf16>
    %31 = vector.shape_cast %30 : vector<1x8x32xbf16> to vector<8x32xbf16>
    %cst_17 = arith.constant dense<0.000000e+00> : vector<72x32xf32>
    %32 = tpu.matmul %29, %31, %cst_17 {dimension_numbers = #tpu.dot_dimension_numbers<[1], [0], [0], [1], [0, 0, 1, 1], [], []>} : vector<72x8xbf16>, vector<8x32xbf16>, vector<72x32xf32> -> vector<72x32xf32>
    %33 = arith.addf %27, %32 : vector<72x32xf32>
    %34 = vector.extract_strided_slice %2 {offsets = [0, 0], sizes = [72, 8], strides = [1, 1]} : vector<82x8xf32> to vector<72x8xf32>
    %35 = arith.truncf %34 : vector<72x8xf32> to vector<72x8xbf16>
    %c5 = arith.constant 5 : index
    %c0_18 = arith.constant 0 : index
    %c0_19 = arith.constant 0 : index
    %36 = vector.load %arg3[%c5, %c0_18, %c0_19] : memref<9x8x32xbf16, #tpu.memory_space<vmem>>, vector<1x8x32xbf16>
    %37 = vector.shape_cast %36 : vector<1x8x32xbf16> to vector<8x32xbf16>
    %cst_20 = arith.constant dense<0.000000e+00> : vector<72x32xf32>
    %38 = tpu.matmul %35, %37, %cst_20 {dimension_numbers = #tpu.dot_dimension_numbers<[1], [0], [0], [1], [0, 0, 1, 1], [], []>} : vector<72x8xbf16>, vector<8x32xbf16>, vector<72x32xf32> -> vector<72x32xf32>
    %39 = arith.addf %33, %38 : vector<72x32xf32>
    %40 = vector.extract_strided_slice %2 {offsets = [1, 0], sizes = [72, 8], strides = [1, 1]} : vector<82x8xf32> to vector<72x8xf32>
    %41 = arith.truncf %40 : vector<72x8xf32> to vector<72x8xbf16>
    %c6 = arith.constant 6 : index
    %c0_21 = arith.constant 0 : index
    %c0_22 = arith.constant 0 : index
    %42 = vector.load %arg3[%c6, %c0_21, %c0_22] : memref<9x8x32xbf16, #tpu.memory_space<vmem>>, vector<1x8x32xbf16>
    %43 = vector.shape_cast %42 : vector<1x8x32xbf16> to vector<8x32xbf16>
    %cst_23 = arith.constant dense<0.000000e+00> : vector<72x32xf32>
    %44 = tpu.matmul %41, %43, %cst_23 {dimension_numbers = #tpu.dot_dimension_numbers<[1], [0], [0], [1], [0, 0, 1, 1], [], []>} : vector<72x8xbf16>, vector<8x32xbf16>, vector<72x32xf32> -> vector<72x32xf32>
    %45 = arith.addf %39, %44 : vector<72x32xf32>
    %46 = vector.extract_strided_slice %2 {offsets = [0, 0], sizes = [72, 8], strides = [1, 1]} : vector<82x8xf32> to vector<72x8xf32>
    %47 = arith.truncf %46 : vector<72x8xf32> to vector<72x8xbf16>
    %c7 = arith.constant 7 : index
    %c0_24 = arith.constant 0 : index
    %c0_25 = arith.constant 0 : index
    %48 = vector.load %arg3[%c7, %c0_24, %c0_25] : memref<9x8x32xbf16, #tpu.memory_space<vmem>>, vector<1x8x32xbf16>
    %49 = vector.shape_cast %48 : vector<1x8x32xbf16> to vector<8x32xbf16>
    %cst_26 = arith.constant dense<0.000000e+00> : vector<72x32xf32>
    %50 = tpu.matmul %47, %49, %cst_26 {dimension_numbers = #tpu.dot_dimension_numbers<[1], [0], [0], [1], [0, 0, 1, 1], [], []>} : vector<72x8xbf16>, vector<8x32xbf16>, vector<72x32xf32> -> vector<72x32xf32>
    %51 = arith.addf %45, %50 : vector<72x32xf32>
    %52 = vector.extract_strided_slice %2 {offsets = [0, 0], sizes = [72, 8], strides = [1, 1]} : vector<82x8xf32> to vector<72x8xf32>
    %53 = arith.truncf %52 : vector<72x8xf32> to vector<72x8xbf16>
    %c8 = arith.constant 8 : index
    %c0_27 = arith.constant 0 : index
    %c0_28 = arith.constant 0 : index
    %54 = vector.load %arg3[%c8, %c0_27, %c0_28] : memref<9x8x32xbf16, #tpu.memory_space<vmem>>, vector<1x8x32xbf16>
    %55 = vector.shape_cast %54 : vector<1x8x32xbf16> to vector<8x32xbf16>
    %cst_29 = arith.constant dense<0.000000e+00> : vector<72x32xf32>
    %56 = tpu.matmul %53, %55, %cst_29 {dimension_numbers = #tpu.dot_dimension_numbers<[1], [0], [0], [1], [0, 0, 1, 1], [], []>} : vector<72x8xbf16>, vector<8x32xbf16>, vector<72x32xf32> -> vector<72x32xf32>
    %57 = arith.addf %51, %56 : vector<72x32xf32>
    %c0_30 = arith.constant 0 : index
    %c0_31 = arith.constant 0 : index
    %58 = vector.load %arg4[%c0_30, %c0_31] : memref<1x32xf32, #tpu.memory_space<vmem>>, vector<1x32xf32>
    %59 = vector.broadcast %58 : vector<1x32xf32> to vector<72x32xf32>
    %60 = arith.addf %57, %59 : vector<72x32xf32>
    %cst_32 = arith.constant 0.000000e+00 : f32
    %61 = vector.broadcast %cst_32 : f32 to vector<72x32xf32>
    %62 = arith.maximumf %60, %61 : vector<72x32xf32>
    %63 = arith.truncf %62 : vector<72x32xf32> to vector<72x32xbf16>
    %c0_33 = arith.constant 0 : index
    %c0_34 = arith.constant 0 : index
    %c0_35 = arith.constant 0 : index
    %64 = vector.load %arg5[%c0_33, %c0_34, %c0_35] : memref<1x72x32xbf16, #tpu.memory_space<vmem>>, vector<1x72x32xbf16>
    %65 = vector.shape_cast %64 : vector<1x72x32xbf16> to vector<72x32xbf16>
    %66 = vector.shape_cast %63 : vector<72x32xbf16> to vector<1x72x32xbf16>
    tpu.vector_store %arg5[%c0_33, %c0_34, %c0_35], %66 {strides = array<i32>} : memref<1x72x32xbf16, #tpu.memory_space<vmem>>, vector<1x72x32xbf16>,
    return
  }
  func.func @transform_0(%arg0: i32, %arg1: i32) -> (i32, i32, i32) {
    %c0_i32 = arith.constant 0 : i32
    %c0_i32_0 = arith.constant 0 : i32
    %c0_i32_1 = arith.constant 0 : i32
    return %arg0, %c0_i32, %c0_i32_0 : i32, i32, i32
  }
  func.func @transform_1(%arg0: i32, %arg1: i32) -> (i32, i32, i32) {
    %c0_i32 = arith.constant 0 : i32
    %c0_i32_0 = arith.constant 0 : i32
    %c0_i32_1 = arith.constant 0 : i32
    %c0_i32_2 = arith.constant 0 : i32
    return %c0_i32, %c0_i32_0, %c0_i32_1 : i32, i32, i32
  }
  func.func @transform_2(%arg0: i32, %arg1: i32) -> (i32, i32) {
    %c0_i32 = arith.constant 0 : i32
    %c0_i32_0 = arith.constant 0 : i32
    %c0_i32_1 = arith.constant 0 : i32
    return %c0_i32, %c0_i32_0 : i32, i32
  }
  func.func @transform_3(%arg0: i32, %arg1: i32) -> (i32, i32, i32) {
    %c0_i32 = arith.constant 0 : i32
    %c0_i32_0 = arith.constant 0 : i32
    return %arg0, %arg1, %c0_i32 : i32, i32, i32
  }
}

module attributes {stable_mosaic.version = 11 : i64} {
  func.func @_tap_matmul_kernel(%arg0: i32, %arg1: i32, %arg2: memref<1x332x8xbf16, #tpu.memory_space<vmem>>, %arg3: memref<9x8x4xbf16, #tpu.memory_space<vmem>>, %arg4: memref<1x4xf32, #tpu.memory_space<vmem>>, %arg5: memref<1x96x4xbf16, #tpu.memory_space<vmem>>) attributes {dimension_semantics = [#tpu.dimension_semantics<parallel>, #tpu.dimension_semantics<parallel>], iteration_bounds = array<i64: 2, 3>, scalar_prefetch = 0 : i64, scratch_operands = 0 : i64, tpu.core_type = #tpu.core_type<tc>, window_params = [{transform_indices = @transform_0, window_bounds = array<i64: 1, 332, 8>}, {pipeline_mode = #tpu.pipeline_mode<synchronous>, transform_indices = @transform_1, window_bounds = array<i64: 9, 8, 4>}, {pipeline_mode = #tpu.pipeline_mode<synchronous>, transform_indices = @transform_2, window_bounds = array<i64: 1, 4>}, {transform_indices = @transform_3, window_bounds = array<i64: 1, 96, 4>}]} {
    %c96_i32 = arith.constant 96 : i32
    %0 = arith.muli %arg1, %c96_i32 : i32
    %1 = tpu.assume_multiple %0, 16 : i32
    %c0 = arith.constant 0 : index
    %2 = arith.index_cast %1 : i32 to index
    %c0_0 = arith.constant 0 : index
    %3 = vector.load %arg2[%c0, %2, %c0_0] : memref<1x332x8xbf16, #tpu.memory_space<vmem>>, vector<1x134x8xbf16>
    %4 = vector.shape_cast %3 : vector<1x134x8xbf16> to vector<134x8xbf16>
    %5 = arith.extf %4 : vector<134x8xbf16> to vector<134x8xf32>
    %cst = arith.constant 0.000000e+00 : f32
    %6 = vector.broadcast %cst : f32 to vector<96x4xf32>
    %7 = vector.extract_strided_slice %5 {offsets = [0, 0], sizes = [96, 8], strides = [1, 1]} : vector<134x8xf32> to vector<96x8xf32>
    %8 = arith.truncf %7 : vector<96x8xf32> to vector<96x8xbf16>
    %c0_1 = arith.constant 0 : index
    %c0_2 = arith.constant 0 : index
    %c0_3 = arith.constant 0 : index
    %9 = vector.load %arg3[%c0_1, %c0_2, %c0_3] : memref<9x8x4xbf16, #tpu.memory_space<vmem>>, vector<1x8x4xbf16>
    %10 = vector.shape_cast %9 : vector<1x8x4xbf16> to vector<8x4xbf16>
    %cst_4 = arith.constant dense<0.000000e+00> : vector<96x4xf32>
    %11 = tpu.matmul %8, %10, %cst_4 {dimension_numbers = #tpu.dot_dimension_numbers<[1], [0], [0], [1], [0, 0, 1, 1], [], []>} : vector<96x8xbf16>, vector<8x4xbf16>, vector<96x4xf32> -> vector<96x4xf32>
    %12 = arith.addf %6, %11 : vector<96x4xf32>
    %13 = vector.extract_strided_slice %5 {offsets = [1, 0], sizes = [96, 8], strides = [1, 1]} : vector<134x8xf32> to vector<96x8xf32>
    %14 = arith.truncf %13 : vector<96x8xf32> to vector<96x8xbf16>
    %c1 = arith.constant 1 : index
    %c0_5 = arith.constant 0 : index
    %c0_6 = arith.constant 0 : index
    %15 = vector.load %arg3[%c1, %c0_5, %c0_6] : memref<9x8x4xbf16, #tpu.memory_space<vmem>>, vector<1x8x4xbf16>
    %16 = vector.shape_cast %15 : vector<1x8x4xbf16> to vector<8x4xbf16>
    %cst_7 = arith.constant dense<0.000000e+00> : vector<96x4xf32>
    %17 = tpu.matmul %14, %16, %cst_7 {dimension_numbers = #tpu.dot_dimension_numbers<[1], [0], [0], [1], [0, 0, 1, 1], [], []>} : vector<96x8xbf16>, vector<8x4xbf16>, vector<96x4xf32> -> vector<96x4xf32>
    %18 = arith.addf %12, %17 : vector<96x4xf32>
    %19 = vector.extract_strided_slice %5 {offsets = [2, 0], sizes = [96, 8], strides = [1, 1]} : vector<134x8xf32> to vector<96x8xf32>
    %20 = arith.truncf %19 : vector<96x8xf32> to vector<96x8xbf16>
    %c2 = arith.constant 2 : index
    %c0_8 = arith.constant 0 : index
    %c0_9 = arith.constant 0 : index
    %21 = vector.load %arg3[%c2, %c0_8, %c0_9] : memref<9x8x4xbf16, #tpu.memory_space<vmem>>, vector<1x8x4xbf16>
    %22 = vector.shape_cast %21 : vector<1x8x4xbf16> to vector<8x4xbf16>
    %cst_10 = arith.constant dense<0.000000e+00> : vector<96x4xf32>
    %23 = tpu.matmul %20, %22, %cst_10 {dimension_numbers = #tpu.dot_dimension_numbers<[1], [0], [0], [1], [0, 0, 1, 1], [], []>} : vector<96x8xbf16>, vector<8x4xbf16>, vector<96x4xf32> -> vector<96x4xf32>
    %24 = arith.addf %18, %23 : vector<96x4xf32>
    %25 = vector.extract_strided_slice %5 {offsets = [18, 0], sizes = [96, 8], strides = [1, 1]} : vector<134x8xf32> to vector<96x8xf32>
    %26 = arith.truncf %25 : vector<96x8xf32> to vector<96x8xbf16>
    %c3 = arith.constant 3 : index
    %c0_11 = arith.constant 0 : index
    %c0_12 = arith.constant 0 : index
    %27 = vector.load %arg3[%c3, %c0_11, %c0_12] : memref<9x8x4xbf16, #tpu.memory_space<vmem>>, vector<1x8x4xbf16>
    %28 = vector.shape_cast %27 : vector<1x8x4xbf16> to vector<8x4xbf16>
    %cst_13 = arith.constant dense<0.000000e+00> : vector<96x4xf32>
    %29 = tpu.matmul %26, %28, %cst_13 {dimension_numbers = #tpu.dot_dimension_numbers<[1], [0], [0], [1], [0, 0, 1, 1], [], []>} : vector<96x8xbf16>, vector<8x4xbf16>, vector<96x4xf32> -> vector<96x4xf32>
    %30 = arith.addf %24, %29 : vector<96x4xf32>
    %31 = vector.extract_strided_slice %5 {offsets = [19, 0], sizes = [96, 8], strides = [1, 1]} : vector<134x8xf32> to vector<96x8xf32>
    %32 = arith.truncf %31 : vector<96x8xf32> to vector<96x8xbf16>
    %c4 = arith.constant 4 : index
    %c0_14 = arith.constant 0 : index
    %c0_15 = arith.constant 0 : index
    %33 = vector.load %arg3[%c4, %c0_14, %c0_15] : memref<9x8x4xbf16, #tpu.memory_space<vmem>>, vector<1x8x4xbf16>
    %34 = vector.shape_cast %33 : vector<1x8x4xbf16> to vector<8x4xbf16>
    %cst_16 = arith.constant dense<0.000000e+00> : vector<96x4xf32>
    %35 = tpu.matmul %32, %34, %cst_16 {dimension_numbers = #tpu.dot_dimension_numbers<[1], [0], [0], [1], [0, 0, 1, 1], [], []>} : vector<96x8xbf16>, vector<8x4xbf16>, vector<96x4xf32> -> vector<96x4xf32>
    %36 = arith.addf %30, %35 : vector<96x4xf32>
    %37 = vector.extract_strided_slice %5 {offsets = [20, 0], sizes = [96, 8], strides = [1, 1]} : vector<134x8xf32> to vector<96x8xf32>
    %38 = arith.truncf %37 : vector<96x8xf32> to vector<96x8xbf16>
    %c5 = arith.constant 5 : index
    %c0_17 = arith.constant 0 : index
    %c0_18 = arith.constant 0 : index
    %39 = vector.load %arg3[%c5, %c0_17, %c0_18] : memref<9x8x4xbf16, #tpu.memory_space<vmem>>, vector<1x8x4xbf16>
    %40 = vector.shape_cast %39 : vector<1x8x4xbf16> to vector<8x4xbf16>
    %cst_19 = arith.constant dense<0.000000e+00> : vector<96x4xf32>
    %41 = tpu.matmul %38, %40, %cst_19 {dimension_numbers = #tpu.dot_dimension_numbers<[1], [0], [0], [1], [0, 0, 1, 1], [], []>} : vector<96x8xbf16>, vector<8x4xbf16>, vector<96x4xf32> -> vector<96x4xf32>
    %42 = arith.addf %36, %41 : vector<96x4xf32>
    %43 = vector.extract_strided_slice %5 {offsets = [36, 0], sizes = [96, 8], strides = [1, 1]} : vector<134x8xf32> to vector<96x8xf32>
    %44 = arith.truncf %43 : vector<96x8xf32> to vector<96x8xbf16>
    %c6 = arith.constant 6 : index
    %c0_20 = arith.constant 0 : index
    %c0_21 = arith.constant 0 : index
    %45 = vector.load %arg3[%c6, %c0_20, %c0_21] : memref<9x8x4xbf16, #tpu.memory_space<vmem>>, vector<1x8x4xbf16>
    %46 = vector.shape_cast %45 : vector<1x8x4xbf16> to vector<8x4xbf16>
    %cst_22 = arith.constant dense<0.000000e+00> : vector<96x4xf32>
    %47 = tpu.matmul %44, %46, %cst_22 {dimension_numbers = #tpu.dot_dimension_numbers<[1], [0], [0], [1], [0, 0, 1, 1], [], []>} : vector<96x8xbf16>, vector<8x4xbf16>, vector<96x4xf32> -> vector<96x4xf32>
    %48 = arith.addf %42, %47 : vector<96x4xf32>
    %49 = vector.extract_strided_slice %5 {offsets = [37, 0], sizes = [96, 8], strides = [1, 1]} : vector<134x8xf32> to vector<96x8xf32>
    %50 = arith.truncf %49 : vector<96x8xf32> to vector<96x8xbf16>
    %c7 = arith.constant 7 : index
    %c0_23 = arith.constant 0 : index
    %c0_24 = arith.constant 0 : index
    %51 = vector.load %arg3[%c7, %c0_23, %c0_24] : memref<9x8x4xbf16, #tpu.memory_space<vmem>>, vector<1x8x4xbf16>
    %52 = vector.shape_cast %51 : vector<1x8x4xbf16> to vector<8x4xbf16>
    %cst_25 = arith.constant dense<0.000000e+00> : vector<96x4xf32>
    %53 = tpu.matmul %50, %52, %cst_25 {dimension_numbers = #tpu.dot_dimension_numbers<[1], [0], [0], [1], [0, 0, 1, 1], [], []>} : vector<96x8xbf16>, vector<8x4xbf16>, vector<96x4xf32> -> vector<96x4xf32>
    %54 = arith.addf %48, %53 : vector<96x4xf32>
    %55 = vector.extract_strided_slice %5 {offsets = [38, 0], sizes = [96, 8], strides = [1, 1]} : vector<134x8xf32> to vector<96x8xf32>
    %56 = arith.truncf %55 : vector<96x8xf32> to vector<96x8xbf16>
    %c8 = arith.constant 8 : index
    %c0_26 = arith.constant 0 : index
    %c0_27 = arith.constant 0 : index
    %57 = vector.load %arg3[%c8, %c0_26, %c0_27] : memref<9x8x4xbf16, #tpu.memory_space<vmem>>, vector<1x8x4xbf16>
    %58 = vector.shape_cast %57 : vector<1x8x4xbf16> to vector<8x4xbf16>
    %cst_28 = arith.constant dense<0.000000e+00> : vector<96x4xf32>
    %59 = tpu.matmul %56, %58, %cst_28 {dimension_numbers = #tpu.dot_dimension_numbers<[1], [0], [0], [1], [0, 0, 1, 1], [], []>} : vector<96x8xbf16>, vector<8x4xbf16>, vector<96x4xf32> -> vector<96x4xf32>
    %60 = arith.addf %54, %59 : vector<96x4xf32>
    %c0_29 = arith.constant 0 : index
    %c0_30 = arith.constant 0 : index
    %61 = vector.load %arg4[%c0_29, %c0_30] : memref<1x4xf32, #tpu.memory_space<vmem>>, vector<1x4xf32>
    %62 = vector.broadcast %61 : vector<1x4xf32> to vector<96x4xf32>
    %63 = arith.addf %60, %62 : vector<96x4xf32>
    %cst_31 = arith.constant 0.000000e+00 : f32
    %64 = vector.broadcast %cst_31 : f32 to vector<96x4xf32>
    %65 = arith.subf %64, %63 : vector<96x4xf32>
    %66 = math.exp %65 : vector<96x4xf32>
    %cst_32 = arith.constant 1.000000e+00 : f32
    %67 = vector.broadcast %cst_32 : f32 to vector<96x4xf32>
    %68 = arith.addf %67, %66 : vector<96x4xf32>
    %69 = tpu.reciprocal %68 {approx = true} : vector<96x4xf32> -> vector<96x4xf32>
    %70 = arith.truncf %69 : vector<96x4xf32> to vector<96x4xbf16>
    %c0_33 = arith.constant 0 : index
    %c0_34 = arith.constant 0 : index
    %c0_35 = arith.constant 0 : index
    %71 = vector.load %arg5[%c0_33, %c0_34, %c0_35] : memref<1x96x4xbf16, #tpu.memory_space<vmem>>, vector<1x96x4xbf16>
    %72 = vector.shape_cast %71 : vector<1x96x4xbf16> to vector<96x4xbf16>
    %73 = vector.shape_cast %70 : vector<96x4xbf16> to vector<1x96x4xbf16>
    tpu.vector_store %arg5[%c0_33, %c0_34, %c0_35], %73 {strides = array<i32>} : memref<1x96x4xbf16, #tpu.memory_space<vmem>>, vector<1x96x4xbf16>,
    return
  }
  func.func @transform_0(%arg0: i32, %arg1: i32) -> (i32, i32, i32) {
    %c0_i32 = arith.constant 0 : i32
    %c0_i32_0 = arith.constant 0 : i32
    %c0_i32_1 = arith.constant 0 : i32
    return %arg0, %c0_i32, %c0_i32_0 : i32, i32, i32
  }
  func.func @transform_1(%arg0: i32, %arg1: i32) -> (i32, i32, i32) {
    %c0_i32 = arith.constant 0 : i32
    %c0_i32_0 = arith.constant 0 : i32
    %c0_i32_1 = arith.constant 0 : i32
    %c0_i32_2 = arith.constant 0 : i32
    return %c0_i32, %c0_i32_0, %c0_i32_1 : i32, i32, i32
  }
  func.func @transform_2(%arg0: i32, %arg1: i32) -> (i32, i32) {
    %c0_i32 = arith.constant 0 : i32
    %c0_i32_0 = arith.constant 0 : i32
    %c0_i32_1 = arith.constant 0 : i32
    return %c0_i32, %c0_i32_0 : i32, i32
  }
  func.func @transform_3(%arg0: i32, %arg1: i32) -> (i32, i32, i32) {
    %c0_i32 = arith.constant 0 : i32
    %c0_i32_0 = arith.constant 0 : i32
    return %arg0, %arg1, %c0_i32 : i32, i32, i32
  }
}

</mosaic_0001>

<bundles_post_ra>
// kernel: vae_forward.8
= control target key start
LH: loop header
LB: loop body
LE: loop exit
PB: predicated region body
PF: predicated region fallthrough
CT: control target
= control target key end

     0   :  { %s2068_s12 = smov 0   ;;  %s2070_s13 = smov 0   ;;  %s2597_s0 = inlined_call_operand.vmem [shape: bf16[2,332,4], index: 0, kind: input, shape index: {}]   ;;  %s2598_s1 = inlined_call_operand.vmem [shape: bf16[9,4,8], index: 1, kind: input, shape index: {}]   ;;  %s2599_s2 = inlined_call_operand.vmem [shape: f32[1,8], index: 2, kind: input, shape index: {}]   ;;  %s2600_s3 = inlined_call_operand.vmem [shape: bf16[2,72,8], index: 3, kind: output, shape index: {}]  }
   0x1   :  { %s2072_s14 = smov 0  }
   0x2 LB: > { %s25_s15 = sadd.s32 1, %s2040_s13  ;;  %p1601_p0 = scmp.ge.s32.totalorder %s2044_s14, 1  ;;  %s2044_s14 = sphi %s2072_s14, %s13_s14   ;;  %s2040_s13 = sphi %s2070_s13, %s2602_s13   ;;  %s2036_s12 = sphi %s2068_s12, %s2601_s12  }
   0x3   : > { %p27_p1 = scmp.ge.s32.totalorder %s25_s15, 2  ;;  %p151_p2 = scmp.lt.s32.totalorder %s2044_s14, 3 }
   0x5   : > { %s2604_s15 = smov (%p27_p1, %s25_s15), 0  ;;  %p152_p3 = pnand %p1601_p0, %p151_p2 }
   0x6   : > { %p179_p4 = scmp.lt.s32.totalorder (!%p152_p3), %s2036_s12, 1 }
   0x7   : > { %155 = sbr.rel (%p152_p3) target bundleno = 404 (0x194), region = 32 }
   0xc   : > { %v1614_v0 = vld [vmem:[%s2598_s1 + $0x2] sm:$0x3]  ;;  %vm344_vm0 = vcmask 1041408   ;;  %v2046_v1 = vmov 0.0   ;;  %s2606_s12 = smov (!%p179_p4, %s2036_s12), 1  ;;  %vm2047_vm1 = vmmov 0  }
   0xd   : > { %1763 = vmatprep.subr.bf16.mxu0 %v2046_v1  ;;  %1961 = vmatprep.subr.bf16.mxu1 %v2046_v1  ;;  %v346_v2 = vsel %vm344_vm0, %v1614_v0, 0  ;;  %s1963_s18 = smul.u32 168, %s2606_s12  ;;  %vm288_vm2 = vsmask.f32 7424  ;;  %vm328_vm3 = vcmask 31744   ;;  %vm659_vm4 = vcmask 1046528  }
   0xe   : > { %1764 = vmatpush3.bf16.msra.mxu0 %v346_v2  ;;  %1962 = vmatpush3.bf16.msra.mxu1 %v346_v2  ;;  %v1626_v27 = vld [vmem:[%s2598_s1 + $0x4] sm:$0x3]  ;;  %v280_v30 = vld [vmem:[%s2598_s1] sm:$0x3]  ;;  %v1637_v2 = vld [vmem:[%s2598_s1 + $0x6] sm:$0x3] }
   0xf   : > { %1765 = vmatprep.mubr.msk.bf16.mxu0 %vm2047_vm1, %v2046_v1  ;;  %1777 = vmatprep.mubr.msk.bf16.mxu1 %vm2047_vm1, %v2046_v1  ;;  %s2104_s21 = scalar_lea.vmem %s2597_s0, %s1963_s18  ;;  %v564_v38 = vsel %vm344_vm0, %v1626_v27, 0  ;;  %v436_v41 = vsel %vm344_vm0, %v280_v30, 0  ;;  %vm775_vm5 = vsmask.f32 6400  ;;  %s1964_s17 = smul.u32 36, %s2606_s12  ;;  %vm1506_vm6 = vcmask 60416  }
  0x10   : > { %1807 = vmatprep.subr.bf16.mxu0 %v2046_v1  ;;  %1785 = vmatprep.subr.bf16.mxu1 %v2046_v1  ;;  %v2107_v3 = vld [vmem:[%s2104_s21 + $0x28] sm:$0xf]  ;;  %v2110_v4 = vld [vmem:[%s2104_s21 + $0x2c] sm:$0xf]  ;;  %v2113_v5 = vld [vmem:[%s2104_s21 + $0x30] sm:$0xf] }
  0x11   : > { %v2116_v6 = vld [vmem:[%s2104_s21 + $0x34] sm:$0xf]  ;;  %v1609_v7 = vcombine.low %v2107_v3, %v2110_v4  ;;  %v1671_v8 = vcombine.low %v2110_v4, %v2113_v5  ;;  %v2123_v9 = vld [vmem:[%s2104_s21 + $0x40] sm:$0xf]  ;;  %v2126_v10 = vld [vmem:[%s2104_s21 + $0x44] sm:$0xf]  ;;  %s2544_s20 = scalar_lea.vmem %s2600_s3, %s1964_s17 }
  0x12   : > { %v1610_v11 = vcombine.low %v2113_v5, %v2116_v6  ;;  %v2131_v12 = vld [vmem:[%s2104_s21 + $0x48] sm:$0xf]  ;;  %v2134_v13 = vld [vmem:[%s2104_s21 + $0x4c] sm:$0xf]  ;;  %v1612_v14 = vcombine.low %v2123_v9, %v2126_v10  ;;  %v2139_v15 = vld [vmem:[%s2104_s21 + $0x38] sm:$0xf] }
  0x13   : > { %v290_v16 = vshrl.u32 %v1609_v7, 16  ;;  %v292_v17 = vshll.u32 %v1609_v7, 16  ;;  %v1613_v18 = vcombine.low %v2131_v12, %v2134_v13  ;;  %v2144_v19 = vld [vmem:[%s2104_s21 + $0x3c] sm:$0xf]  ;;  %v1672_v20 = vcombine.low %v2116_v6, %v2139_v15  ;;  %v196_v31 = vld [vmem:[%s2104_s21 + $0x4] sm:$0xf] }
  0x14   : > { %v297_v21 = vshll.u32 %v1610_v11, 16  ;;  %v313_v22 = vshll.u32 %v1612_v14, 16  ;;  %v317_v23 = vshrl.u32 %v1612_v14, 16  ;;  %v1611_v24 = vcombine.low %v2139_v15, %v2144_v19  ;;  %v197_v36 = vld [vmem:[%s2104_s21 + $0x8] sm:$0xf] }
  0x15   : > { %v294_v25 = vrot.slane %v292_v17, 1  ;;  %v321_v26 = vshll.u32 %v1613_v18, 16  ;;  %v301_v34 = vshrl.u32 %v1610_v11, 16  ;;  %v2159_v39 = vcombine.low %v196_v31, %v197_v36  ;;  %v195_v43 = vld [vmem:[%s2104_s21] sm:$0xf] }
  0x16   : > { %v299_v28 = vrot.slane %v297_v21, 1  ;;  %v315_v29 = vrot.slane %v313_v22, 1  ;;  %v305_v35 = vshll.u32 %v1611_v24, 16  ;;  %v198_v44 = vld [vmem:[%s2104_s21 + $0xc] sm:$0xf]  ;;  %v325_v48 = vshrl.u32 %v1613_v18, 16 }
  0x17   : > { %v295_v32 = vor.u32 %v294_v25, %v290_v16  ;;  %v323_v33 = vrot.slane %v321_v26, 1  ;;  %v199_v45 = vld [vmem:[%s2104_s21 + $0x10] sm:$0xf]  ;;  %v200_v49 = vld [vmem:[%s2104_s21 + $0x14] sm:$0xf]  ;;  %v309_v55 = vshrl.u32 %v1611_v24, 16  ;;  %v1604_v59 = vcombine.low %v195_v43, %v196_v31 }
  0x18   : > { %v319_v37 = vor.u32 %v317_v23, %v315_v29  ;;  %v303_v46 = vor.u32 %v301_v34, %v299_v28  ;;  %v307_v47 = vrot.slane %v305_v35, 1  ;;  %v2172_v50 = vcombine.low %v198_v44, %v199_v45  ;;  %v201_v51 = vld [vmem:[%s2104_s21 + $0x18] sm:$0xf]  ;;  %v202_v52 = vld [vmem:[%s2104_s21 + $0x1c] sm:$0xf] }
  0x19   : > { %v300_v40 = vsel %vm288_vm2, %v295_v32, %v299_v28  ;;  %v2180_v53 = vld [vmem:[%s2104_s21 + $0x20] sm:$0xf]  ;;  %v2182_v54 = vcombine.low %v200_v49, %v201_v51  ;;  %v327_v58 = vor.u32 %v325_v48, %v323_v33  ;;  %v204_v60 = vld [vmem:[%s2104_s21 + $0x24] sm:$0xf]  ;;  %v1605_v62 = vcombine.low %v197_v36, %v198_v44  ;;  %v1648_v25 = vld [vmem:[%s2598_s1 + $0x8] sm:$0x3] }
  0x1a   : > { %1766 = vmatmul.mubr.msk.bf16.vlgmr.msra.gmra.mxu0 %vm328_vm3, %v300_v40  ;;  %v324_v42 = vsel %vm288_vm2, %v319_v37, %v323_v33  ;;  %v2186_v56 = vcombine.low %v202_v52, %v2180_v53  ;;  %v308_v57 = vsel %vm288_vm2, %v303_v46, %v307_v47  ;;  %v2191_v61 = vcombine.low %v204_v60, %v2107_v3  ;;  %v215_v6 = vld [vmem:[%s2104_s21 + $0x50] sm:$0xf] }
  0x1b   : > { %1778 = vmatmul.mubr.msk.bf16.vlgmr.msra.gmra.mxu1 %vm328_vm3, %v324_v42  ;;  %1808 = vmatpush3.bf16.msra.mxu0 %v564_v38  ;;  %v311_v63 = vor.u32 %v309_v55, %v307_v47  ;;  %v515_v0 = vshll.u32 %v1604_v59, 16  ;;  %v519_v7 = vshll.u32 %v1605_v62, 16  ;;  %v1074_v11 = vshll.u32 %v2159_v39, 16 }
  0x1c   : > { %1786 = vmatpush3.bf16.msra.mxu1 %v436_v41  ;;  %1769 = vmatprep.mubr.msk.bf16.mxu0 %vm2047_vm1, %v2046_v1  ;;  %v513_v14 = vshrl.u32 %v1604_v59, 16  ;;  %v685_v17 = vsel %vm344_vm0, %v1637_v2, 0  ;;  %v1072_v18 = vshrl.u32 %v2159_v39, 16  ;;  %v1606_v24 = vcombine.low %v199_v45, %v200_v49 }
  0x1d   : > { %1781 = vmatprep.mubr.msk.bf16.mxu1 %vm2047_vm1, %v2046_v1  ;;  %1829 = vmatprep.subr.bf16.mxu1 %v2046_v1  ;;  %v316_v3 = vsel %vm288_vm2, %v311_v63, %v315_v29  ;;  %v517_v16 = vrot.slane %v515_v0, 1  ;;  %v521_v21 = vrot.slane %v519_v7, 1  ;;  %v1076_v22 = vrot.slane %v1074_v11, 1 }
  0x1e   : > { %1851 = vmatprep.subr.bf16.mxu0 %v2046_v1  ;;  %v523_v26 = vshrl.u32 %v1605_v62, 16  ;;  %v526_v28 = vshll.u32 %v1606_v24, 16  ;;  %v1079_v30 = vshll.u32 %v2172_v50, 16  ;;  %v836_v31 = vsel %vm344_vm0, %v1648_v25, 0 }
  0x1f   : > { %v518_v23 = vor.u32 %v517_v16, %v513_v14  ;;  %v1077_v29 = vor.u32 %v1076_v22, %v1072_v18  ;;  %v2220_v33 = vcombine.low %v201_v51, %v202_v52  ;;  %v1083_v34 = vshrl.u32 %v2172_v50, 16 }
  0x20   : > { %v1081_v32 = vrot.slane %v1079_v30, 1  ;;  %v1087_v35 = vshll.u32 %v2182_v54, 16  ;;  %v525_v36 = vor.u32 %v523_v26, %v521_v21  ;;  %v528_v37 = vrot.slane %v526_v28, 1  ;;  %v2013_v28 = vld [vmem:[%s2104_s21 + $0x80] sm:$0xff]   ;;  %v2322_v30 = vld [vmem:[%s2104_s21 + $0x58] sm:$0xff]  }
  0x21   : > { %v522_v27 = vsel %vm288_vm2, %v518_v23, %v521_v21  ;;  %v530_v42 = vshrl.u32 %v1606_v24, 16  ;;  %v1091_v43 = vshrl.u32 %v2182_v54, 16  ;;  %v1095_v44 = vshll.u32 %v2186_v56, 16 }
  0x22   : > { %1770 = vmatmul.mubr.msk.bf16.gmra.mxu0 %vm328_vm3, %v308_v57  ;;  %v2226_v38 = vsel %vm288_vm2, %v1077_v29, %v1081_v32  ;;  %v1085_v40 = vor.u32 %v1083_v34, %v1081_v32  ;;  %v1089_v41 = vrot.slane %v1087_v35, 1  ;;  %v533_v45 = vshll.u32 %v2220_v33, 16 }
  0x23   : > { %1782 = vmatmul.mubr.msk.bf16.gmra.mxu1 %vm328_vm3, %v327_v58  ;;  %1773 = vmatprep.mubr.msk.bf16.mxu0 %vm2047_vm1, %v2046_v1  ;;  %v1099_v47 = vshrl.u32 %v2186_v56, 16  ;;  %v1103_v48 = vshll.u32 %v2191_v61, 16  ;;  %v529_v49 = vsel %vm288_vm2, %v525_v36, %v528_v37  ;;  %v1097_v52 = vrot.slane %v1095_v44, 1 }
  0x24   : > { %1787 = vmatprep.mubr.msk.bf16.mxu1 %vm2047_vm1, %v2046_v1  ;;  %v2237_v46 = vsel %vm288_vm2, %v1085_v40, %v1089_v41  ;;  %v1093_v51 = vor.u32 %v1091_v43, %v1089_v41  ;;  %v1625_v55 = vcombine.low %v2180_v53, %v204_v60  ;;  %v1221_v58 = vrot.slane %v1671_v8, 1  ;;  %v1654_v40 = vld [vmem:[%s2598_s1 + $0xa] sm:$0x3] }
  0x25   : > { %v2243_v57 = vrot.slane %v1103_v48, 1  ;;  %v1101_v63 = vor.u32 %v1099_v47, %v1097_v52  ;;  %v1673_v0 = vcombine.low %v2144_v19, %v2123_v9  ;;  %v1336_v2 = vrot.slane %v2159_v39, 1  ;;  %v2338_v48 = vld [vmem:[%s2104_s21 + $0x60] sm:$0xff]  }
  0x26   : > { %v532_v60 = vor.u32 %v530_v42, %v528_v37  ;;  %v535_v7 = vrot.slane %v533_v45, 1  ;;  %v1337_v5 = vrot.slane %v2172_v50, 1  ;;  %v1674_v15 = vcombine.low %v2126_v10, %v2131_v12  ;;  %v2015_v45 = vld [vmem:[%s2104_s21 + $0x88] sm:$0xff]  }
  0x27   : > { %v2268_v8 = vsel %vm288_vm2, %v1101_v63, %v2243_v57  ;;  %v1224_v9 = vrot.slane %v1673_v0, 1  ;;  %v1339_v19 = vrot.slane %v2182_v54, 1  ;;  %v1675_v39 = vcombine.low %v2134_v13, %v215_v6  ;;  %v1665_v63 = vld [vmem:[%s2598_s1 + $0xc] sm:$0x3] }
  0x28   : > { %v1341_v50 = vrot.slane %v2186_v56, 1  ;;  %v1226_v11 = vrot.slane %v1674_v15, 1  ;;  %v536_v54 = vsel %vm288_vm2, %v532_v60, %v535_v7  ;;  %v537_v13 = vshrl.u32 %v2220_v33, 16 }
  0x29   : > { %v2284_v14 = vsel %vm659_vm4, %v1337_v5, %v1339_v19  ;;  %v2286_v10 = vrot.slane %v1675_v39, 1  ;;  %v541_v56 = vshll.u32 %v1625_v55, 16  ;;  %v1343_v18 = vrot.slane %v2191_v61, 1 }
  0x2a   : > { %1774 = vmatmul.mubr.msk.bf16.gmra.mxu0 %vm328_vm3, %v316_v3  ;;  %v2289_v12 = vsel %vm659_vm4, %v1339_v19, %v1341_v50  ;;  %v2294_v16 = vsel %vm659_vm4, %v1224_v9, %v1226_v11  ;;  %v539_v22 = vor.u32 %v537_v13, %v535_v7  ;;  %v1608_v25 = vcombine.low %v2180_v53, %v2180_v53  ;;  %v2017_v7 = vld [vmem:[%s2104_s21 + $0x90] sm:$0xff]  }
  0x2b   : > { %1788 = vmatmul.mubr.msk.bf16.vlgmr.msra.gmra.mxu1 %vm328_vm3, %v1604_v59  ;;  %1809 = vmatprep.mubr.msk.bf16.mxu0 %vm2047_vm1, %v2046_v1  ;;  %v1222_v59 = vrot.slane %v1672_v20, 1  ;;  %v2276_v20 = vsel %vm659_vm4, %v1336_v2, %v1337_v5  ;;  %v2305_v21 = vsel %vm659_vm4, %v1341_v50, %v1343_v18  ;;  %v543_v23 = vrot.slane %v541_v56, 1  ;;  %v2018_v56 = vld [vmem:[%s2104_s21 + $0x98] sm:$0x3f]  }
  0x2c   : > { %1830 = vmatpush3.bf16.msra.mxu1 %v685_v17  ;;  %1791 = vmatprep.mubr.msk.bf16.mxu1 %vm2047_vm1, %v2046_v1  ;;  %v2298_v17 = vsel %vm659_vm4, %v1226_v11, %v2286_v10  ;;  %v788_v34 = vshll.u32 %v2013_v28, 16  ;;  %v661_v36 = vrot.slane %v2322_v30, 1  ;;  %v803_v19 = vshrl.u32 %v2017_v7, 16 }
  0x2d   : > { %1873 = vmatprep.subr.bf16.mxu1 %v2046_v1  ;;  %v2259_v4 = vsel %vm659_vm4, %v1221_v58, %v1222_v59  ;;  %v2281_v3 = vsel %vm659_vm4, %v1222_v59, %v1224_v9  ;;  %v544_v26 = vsel %vm288_vm2, %v539_v22, %v543_v23  ;;  %v797_v58 = vshll.u32 %v2015_v45, 16  ;;  %v2357_v9 = vld [vmem:[%s2104_s21 + $0x68] sm:$0xff]  }
  0x2e   : > { %v790_v44 = vrot.slane %v788_v34, 2  ;;  %v663_v59 = vrot.slane %v2338_v48, 1  ;;  %v806_v39 = vshll.u32 %v2017_v7, 16  ;;  %v665_v50 = vrot.slane %v2357_v9, 1 }
  0x2f   : > { %v799_v60 = vrot.slane %v797_v58, 2 }
  0x30   : > { %v664_v5 = vsel %vm659_vm4, %v661_v36, %v663_v59  ;;  %v808_v13 = vrot.slane %v806_v39, 2  ;;  %v666_v22 = vsel %vm659_vm4, %v663_v59, %v665_v50  ;;  %v948_v59 = vshrl.u32 %v2357_v9, 16 }
  0x32   : > { %1810 = vmatmul.mubr.msk.bf16.vlgmr.msra.gmra.mxu0 %vm328_vm3, %v522_v27  ;;  %v2012_v27 = vld [vmem:[%s2104_s21 + $0x78] sm:$0xff]   ;;  %v950_v7 = vrot.slane %v948_v59, 1 }
  0x33   : > { %1792 = vmatmul.mubr.msk.bf16.gmra.mxu1 %vm328_vm3, %v1605_v62  ;;  %1852 = vmatpush3.bf16.msra.mxu0 %v836_v31  ;;  %v2252_v62 = vsel %vm288_vm2, %v1093_v51, %v1097_v52  ;;  %v545_v31 = vshrl.u32 %v1625_v55, 16  ;;  %v777_v32 = vshrl.u32 %v2012_v27, 16  ;;  %v780_v53 = vshll.u32 %v2012_v27, 16 }
  0x34   : > { %1795 = vmatprep.mubr.msk.bf16.mxu1 %vm2047_vm1, %v2046_v1  ;;  %1813 = vmatprep.mubr.msk.bf16.mxu0 %vm2047_vm1, %v2046_v1  ;;  %v794_v55 = vshrl.u32 %v2015_v45, 16 }
  0x35   : > { %1895 = vmatprep.subr.bf16.mxu0 %v2046_v1  ;;  %v547_v37 = vor.u32 %v545_v31, %v543_v23  ;;  %v779_v41 = vrot.slane %v777_v32, 1  ;;  %v782_v42 = vrot.slane %v780_v53, 2  ;;  %v2371_v23 = vld [vmem:[%s2104_s21 + $0x70] sm:$0xff]  }
  0x36   : > { %v796_v2 = vrot.slane %v794_v55, 1  ;;  %v667_v27 = vrot.slane %v2371_v23, 1 }
  0x37   : > { %v783_v51 = vor.u32 %v782_v42, %v779_v41 }
  0x38   : > { %v800_v15 = vor.u32 %v799_v60, %v796_v2  ;;  %v668_v53 = vsel %vm659_vm4, %v665_v50, %v667_v27 }
  0x3a   : > { %1814 = vmatmul.mubr.msk.bf16.gmra.mxu0 %vm328_vm3, %v529_v49  ;;  %v981_v49 = vsel %vm344_vm0, %v1654_v40, 0 }
  0x3b   : > { %1796 = vmatmul.mubr.msk.bf16.gmra.mxu1 %vm328_vm3, %v1606_v24  ;;  %1817 = vmatprep.mubr.msk.bf16.mxu0 %vm2047_vm1, %v2046_v1  ;;  %v216_v24 = vld [vmem:[%s2104_s21 + $0x54] sm:$0xf] }
  0x3c   : > { %1799 = vmatprep.mubr.msk.bf16.mxu1 %vm2047_vm1, %v2046_v1  ;;  %v2319_v29 = vcombine.low %v215_v6, %v216_v24  ;;  %v1126_v6 = vsel %vm344_vm0, %v1665_v63, 0  ;;  %v951_v63 = vshll.u32 %v2357_v9, 16  ;;  %v957_v9 = vshrl.u32 %v2371_v23, 16 }
  0x3e   : > { %v660_v35 = vrot.slane %v2319_v29, 1  ;;  %v922_v34 = vshrl.u32 %v2319_v29, 16  ;;  %v959_v39 = vrot.slane %v957_v9, 1 }
  0x40   : > { %v662_v47 = vsel %vm659_vm4, %v660_v35, %v661_v36  ;;  %v925_v35 = vshll.u32 %v2319_v29, 16  ;;  %v930_v36 = vshrl.u32 %v2322_v30, 16  ;;  %v924_v41 = vrot.slane %v922_v34, 1 }
  0x42   : > { %1818 = vmatmul.mubr.msk.bf16.gmra.mxu0 %vm328_vm3, %v536_v54  ;;  %v805_v54 = vrot.slane %v803_v19, 1  ;;  %v927_v42 = vrot.slane %v925_v35, 2 }
  0x43   : > { %1800 = vmatmul.mubr.msk.bf16.gmra.mxu1 %vm328_vm3, %v2220_v33  ;;  %1821 = vmatprep.mubr.msk.bf16.mxu0 %vm2047_vm1, %v2046_v1  ;;  %v785_v33 = vshrl.u32 %v2013_v28, 16 }
  0x44   : > { %1803 = vmatprep.mubr.msk.bf16.mxu1 %vm2047_vm1, %v2046_v1  ;;  %v809_v24 = vor.u32 %v808_v13, %v805_v54  ;;  %v928_v29 = vor.u32 %v927_v42, %v924_v41 }
  0x45   : > { %v787_v43 = vrot.slane %v785_v33, 1 }
  0x46   : > { %v810_v28 = vsel %vm775_vm5, %v800_v15, %v809_v24 }
  0x47   : > { %v791_v52 = vor.u32 %v790_v44, %v787_v43  ;;  %v932_v43 = vrot.slane %v930_v36, 1 }
  0x49   : > { %v792_v0 = vsel %vm775_vm5, %v783_v51, %v791_v52  ;;  %v801_v11 = vsel %vm775_vm5, %v791_v52, %v800_v15  ;;  %v960_v15 = vshll.u32 %v2371_v23, 16 }
  0x4a   : > { %1822 = vmatmul.mubr.msk.bf16.gmra.mxu0 %vm328_vm3, %v544_v26  ;;  %v815_v26 = vshll.u32 %v2018_v56, 16 }
  0x4b   : > { %1804 = vmatmul.mubr.msk.bf16.gmra.mxu1 %vm328_vm3, %v1608_v25  ;;  %1825 = vmatprep.mubr.msk.bf16.mxu0 %vm2047_vm1, %v2046_v1  ;;  %v812_v25 = vshrl.u32 %v2018_v56, 16  ;;  %v962_v50 = vrot.slane %v960_v15, 2 }
  0x4c   : > { %1831 = vmatprep.mubr.msk.bf16.mxu1 %vm2047_vm1, %v2046_v1  ;;  %v817_v32 = vrot.slane %v815_v26, 2 }
  0x4d   : > { %v814_v31 = vrot.slane %v812_v25, 1 }
  0x4f   : > { %v818_v33 = vor.u32 %v817_v32, %v814_v31 }
  0x51   : > { %v819_v40 = vsel %vm775_vm5, %v809_v24, %v818_v33 }
  0x52   : > { %1826 = vmatmul.mubr.msk.bf16.gmra.mxu0 %vm328_vm3, %v547_v37  ;;  %v933_v37 = vshll.u32 %v2322_v30, 16  ;;  %v939_v30 = vshrl.u32 %v2338_v48, 16 }
  0x53   : > { %1832 = vmatmul.mubr.msk.bf16.vlgmr.msra.gmra.mxu1 %vm328_vm3, %v662_v47  ;;  %1853 = vmatprep.mubr.msk.bf16.mxu0 %vm2047_vm1, %v2046_v1  ;;  %v942_v47 = vshll.u32 %v2338_v48, 16 }
  0x54   : > { %1874 = vmatpush3.bf16.msra.mxu1 %v981_v49  ;;  %1835 = vmatprep.mubr.msk.bf16.mxu1 %vm2047_vm1, %v2046_v1  ;;  %v935_v44 = vrot.slane %v933_v37, 2  ;;  %v1676_v49 = vld [vmem:[%s2598_s1 + $0xe] sm:$0x3]  ;;  %v941_v52 = vrot.slane %v939_v30, 1 }
  0x55   : > { %1917 = vmatprep.subr.bf16.mxu1 %v2046_v1  ;;  %v944_v55 = vrot.slane %v942_v47, 2  ;;  %v1246_v58 = vsel %vm344_vm0, %v1676_v49, 0 }
  0x56   : > { %v936_v45 = vor.u32 %v935_v44, %v932_v43 }
  0x57   : > { %v945_v48 = vor.u32 %v944_v55, %v941_v52 }
  0x58   : > { %v937_v51 = vsel %vm775_vm5, %v928_v29, %v936_v45 }
  0x59   : > { %v946_v2 = vsel %vm775_vm5, %v936_v45, %v945_v48 }
  0x5a   : > { %1854 = vmatmul.mubr.msk.bf16.vlgmr.msra.gmra.mxu0 %vm328_vm3, %v792_v0  ;;  %v1682_v0 = vld [vmem:[%s2598_s1 + $0x10] sm:$0x3] }
  0x5b   : > { %1836 = vmatmul.mubr.msk.bf16.gmra.mxu1 %vm328_vm3, %v664_v5  ;;  %1896 = vmatpush3.bf16.msra.mxu0 %v1126_v6  ;;  %v1361_v60 = vsel %vm344_vm0, %v1682_v0, 0  ;;  %v953_v5 = vrot.slane %v951_v63, 2 }
  0x5c   : > { %1839 = vmatprep.mubr.msk.bf16.mxu1 %vm2047_vm1, %v2046_v1  ;;  %1857 = vmatprep.mubr.msk.bf16.mxu0 %vm2047_vm1, %v2046_v1 }
  0x5d   : > { %1939 = vmatprep.subr.bf16.mxu0 %v2046_v1  ;;  %v954_v6 = vor.u32 %v953_v5, %v950_v7 }
  0x5f   : > { %v955_v19 = vsel %vm775_vm5, %v945_v48, %v954_v6 }
  0x62   : > { %1858 = vmatmul.mubr.msk.bf16.gmra.mxu0 %vm328_vm3, %v801_v11 }
  0x63   : > { %1840 = vmatmul.mubr.msk.bf16.gmra.mxu1 %vm328_vm3, %v666_v22  ;;  %1861 = vmatprep.mubr.msk.bf16.mxu0 %vm2047_vm1, %v2046_v1 }
  0x64   : > { %1843 = vmatprep.mubr.msk.bf16.mxu1 %vm2047_vm1, %v2046_v1 }
  0x6a   : > { %1862 = vmatmul.mubr.msk.bf16.gmra.mxu0 %vm328_vm3, %v810_v28 }
  0x6b   : > { %1844 = vmatmul.mubr.msk.bf16.gmra.mxu1 %vm328_vm3, %v668_v53  ;;  %1865 = vmatprep.mubr.msk.bf16.mxu0 %vm2047_vm1, %v2046_v1 }
  0x6c   : > { %1847 = vmatprep.mubr.msk.bf16.mxu1 %vm2047_vm1, %v2046_v1 }
  0x72   : > { %1866 = vmatmul.mubr.msk.bf16.gmra.mxu0 %vm328_vm3, %v819_v40 }
  0x73   : > { %1848 = vmatmul.mubr.msk.bf16.gmra.mxu1 %vm328_vm3, %v667_v27  ;;  %1869 = vmatprep.mubr.msk.bf16.mxu0 %vm2047_vm1, %v2046_v1 }
  0x74   : > { %1875 = vmatprep.mubr.msk.bf16.mxu1 %vm2047_vm1, %v2046_v1 }
  0x7a   : > { %1870 = vmatmul.mubr.msk.bf16.gmra.mxu0 %vm328_vm3, %v818_v33 }
  0x7b   : > { %1876 = vmatmul.mubr.msk.bf16.vlgmr.msra.gmra.mxu1 %vm328_vm3, %v937_v51  ;;  %1897 = vmatprep.mubr.msk.bf16.mxu0 %vm2047_vm1, %v2046_v1 }
  0x7c   : > { %1918 = vmatpush3.bf16.msra.mxu1 %v1246_v58  ;;  %1879 = vmatprep.mubr.msk.bf16.mxu1 %vm2047_vm1, %v2046_v1 }
  0x82   : > { %1898 = vmatmul.mubr.msk.bf16.vlgmr.msra.gmra.mxu0 %vm328_vm3, %v2226_v38  ;;  %v963_v38 = vor.u32 %v962_v50, %v959_v39 }
  0x83   : > { %1880 = vmatmul.mubr.msk.bf16.gmra.mxu1 %vm328_vm3, %v946_v2  ;;  %1940 = vmatpush3.bf16.msra.mxu0 %v1361_v60 }
  0x84   : > { %1883 = vmatprep.mubr.msk.bf16.mxu1 %vm2047_vm1, %v2046_v1  ;;  %1901 = vmatprep.mubr.msk.bf16.mxu0 %vm2047_vm1, %v2046_v1  ;;  %v964_v11 = vsel %vm775_vm5, %v954_v6, %v963_v38 }
  0x8a   : > { %1902 = vmatmul.mubr.msk.bf16.gmra.mxu0 %vm328_vm3, %v2237_v46  ;;  %v1107_v46 = vshrl.u32 %v2191_v61, 16 }
  0x8b   : > { %1884 = vmatmul.mubr.msk.bf16.gmra.mxu1 %vm328_vm3, %v955_v19  ;;  %1905 = vmatprep.mubr.msk.bf16.mxu0 %vm2047_vm1, %v2046_v1 }
  0x8c   : > { %1887 = vmatprep.mubr.msk.bf16.mxu1 %vm2047_vm1, %v2046_v1 }
  0x92   : > { %1906 = vmatmul.mubr.msk.bf16.gmra.mxu0 %vm328_vm3, %v2252_v62  ;;  %v1109_v62 = vor.u32 %v1107_v46, %v2243_v57 }
  0x93   : > { %1888 = vmatmul.mubr.msk.bf16.gmra.mxu1 %vm328_vm3, %v964_v11  ;;  %1909 = vmatprep.mubr.msk.bf16.mxu0 %vm2047_vm1, %v2046_v1 }
  0x94   : > { %1891 = vmatprep.mubr.msk.bf16.mxu1 %vm2047_vm1, %v2046_v1 }
  0x9a   : > { %1910 = vmatmul.mubr.msk.bf16.gmra.mxu0 %vm328_vm3, %v2268_v8 }
  0x9b   : > { %1892 = vmatmul.mubr.msk.bf16.gmra.mxu1 %vm328_vm3, %v963_v38  ;;  %1913 = vmatprep.mubr.msk.bf16.mxu0 %vm2047_vm1, %v2046_v1 }
  0x9c   : > { %1919 = vmatprep.mubr.msk.bf16.mxu1 %vm2047_vm1, %v2046_v1 }
  0xa2   : > { %1914 = vmatmul.mubr.msk.bf16.gmra.mxu0 %vm328_vm3, %v1109_v62 }
  0xa3   : > { %1920 = vmatmul.mubr.msk.bf16.vlgmr.msra.gmra.mxu1 %vm328_vm3, %v2259_v4  ;;  %1941 = vmatprep.mubr.msk.bf16.mxu0 %vm2047_vm1, %v2046_v1 }
  0xa4   : > { %1923 = vmatprep.mubr.msk.bf16.mxu1 %vm2047_vm1, %v2046_v1 }
  0xaa   : > { %1942 = vmatmul.mubr.msk.bf16.vlgmr.msra.gmra.mxu0 %vm328_vm3, %v2276_v20 }
  0xab   : > { %1924 = vmatmul.mubr.msk.bf16.gmra.mxu1 %vm328_vm3, %v2281_v3  ;;  %1945 = vmatprep.mubr.msk.bf16.mxu0 %vm2047_vm1, %v2046_v1 }
  0xac   : > { %1927 = vmatprep.mubr.msk.bf16.mxu1 %vm2047_vm1, %v2046_v1 }
  0xb2   : > { %1946 = vmatmul.mubr.msk.bf16.gmra.mxu0 %vm328_vm3, %v2284_v14 }
  0xb3   : > { %1928 = vmatmul.mubr.msk.bf16.gmra.mxu1 %vm328_vm3, %v2294_v16  ;;  %1949 = vmatprep.mubr.msk.bf16.mxu0 %vm2047_vm1, %v2046_v1 }
  0xb4   : > { %1931 = vmatprep.mubr.msk.bf16.mxu1 %vm2047_vm1, %v2046_v1 }
  0xba   : > { %1950 = vmatmul.mubr.msk.bf16.gmra.mxu0 %vm328_vm3, %v2289_v12 }
  0xbb   : > { %1932 = vmatmul.mubr.msk.bf16.gmra.mxu1 %vm328_vm3, %v2298_v17  ;;  %1953 = vmatprep.mubr.msk.bf16.mxu0 %vm2047_vm1, %v2046_v1 }
  0xbc   : > { %1935 = vmatprep.mubr.msk.bf16.mxu1 %vm2047_vm1, %v2046_v1 }
  0xc2   : > { %1954 = vmatmul.mubr.msk.bf16.gmra.mxu0 %vm328_vm3, %v2305_v21 }
  0xc3   : > { %1936 = vmatmul.mubr.msk.bf16.gmra.mxu1 %vm328_vm3, %v2286_v10  ;;  %1957 = vmatprep.mubr.msk.bf16.mxu0 %vm2047_vm1, %v2046_v1 }
  0xca   : > { %1958 = vmatmul.mubr.msk.bf16.gmra.mxu0 %vm328_vm3, %v1343_v18 }
  0xda   : > { %v382_v57 = vpop.f32.mrf.mxu0 }
  0xdb   : > { %v406_v4 = vpop.f32.mrf.mxu1 }
  0xdc   : > { %v1767_v8 = vpop.f32.mrf.mxu0 }
  0xdd   : > { %v1779_v20 = vpop.f32.mrf.mxu1 }
  0xde   : > { %v385_v3 = vpop.f32.mrf.mxu0 }
  0xdf   : > { %v409_v14 = vpop.f32.mrf.mxu1 }
  0xe0   : > { %v1768_v12 = vpop.f32.mrf.mxu0 }
  0xe1   : > { %v1780_v16 = vpop.f32.mrf.mxu1 }
  0xe2   : > { %v390_v17 = vpop.f32.mrf.mxu0 }
  0xe3   : > { %v414_v21 = vpop.f32.mrf.mxu1 }
  0xe4   : > { %v1771_v54 = vpop.f32.mrf.mxu0 }
  0xe5   : > { %v1783_v13 = vpop.f32.mrf.mxu1 }
  0xe6   : > { %v393_v10 = vpop.f32.mrf.mxu0 }
  0xe7   : > { %v417_v56 = vpop.f32.mrf.mxu1 }
  0xe8   : > { %v1772_v22 = vpop.f32.mrf.mxu0 }
  0xe9   : > { %v1784_v1 = vpop.f32.mrf.mxu1 }
  0xea   : > { %v398_v23 = vpop.f32.mrf.mxu0 }
  0xeb   : > { %v472_v61 = vpop.f32.mrf.mxu1 }
  0xec   : > { %v473_v24 = vadd.f32 %v472_v61, %v382_v57  ;;  %v1775_v18 = vpop.f32.mrf.mxu0 }
  0xed   : > { %v1789_v25 = vpop.f32.mrf.mxu1 }
  0xee   : > { %v401_v26 = vpop.f32.mrf.mxu0 }
  0xef   : > { %v475_v27 = vpop.f32.mrf.mxu1 }
  0xf0   : > { %v476_v28 = vadd.f32 %v475_v27, %v385_v3  ;;  %v1776_v31 = vpop.f32.mrf.mxu0 }
  0xf1   : > { %v1790_v32 = vpop.f32.mrf.mxu1 }
  0xf2   : > { %v600_v53 = vpop.f32.mrf.mxu0 }
  0xf3   : > { %v480_v33 = vpop.f32.mrf.mxu1  ;;  %v638_v34 = vadd.f32 %v600_v53, %v473_v24 }
  0xf4   : > { %v481_v35 = vadd.f32 %v480_v33, %v390_v17  ;;  %v1811_v36 = vpop.f32.mrf.mxu0 }
  0xf5   : > { %v1793_v37 = vpop.f32.mrf.mxu1 }
  0xf6   : > { %v603_v40 = vpop.f32.mrf.mxu0 }
  0xf7   : > { %v483_v41 = vpop.f32.mrf.mxu1  ;;  %v639_v42 = vadd.f32 %v603_v40, %v476_v28 }
  0xf8   : > { %v484_v43 = vadd.f32 %v483_v41, %v393_v10  ;;  %v1812_v44 = vpop.f32.mrf.mxu0 }
  0xf9   : > { %v1794_v29 = vpop.f32.mrf.mxu1 }
  0xfa   : > { %v608_v45 = vpop.f32.mrf.mxu0 }
  0xfb   : > { %v488_v30 = vpop.f32.mrf.mxu1  ;;  %v640_v47 = vadd.f32 %v608_v45, %v481_v35 }
  0xfc   : > { %v489_v49 = vadd.f32 %v488_v30, %v398_v23  ;;  %v1815_v51 = vpop.f32.mrf.mxu0 }
  0xfd   : > { %v1797_v52 = vpop.f32.mrf.mxu1 }
  0xfe   : > { %v611_v55 = vpop.f32.mrf.mxu0 }
  0xff   : > { %v491_v58 = vpop.f32.mrf.mxu1  ;;  %v641_v48 = vadd.f32 %v611_v55, %v484_v43 }
 0x100   : > { %v492_v59 = vadd.f32 %v491_v58, %v401_v26  ;;  %v1816_v63 = vpop.f32.mrf.mxu0 }
 0x101   : > { %v1798_v0 = vpop.f32.mrf.mxu1 }
 0x102   : > { %v616_v2 = vpop.f32.mrf.mxu0 }
 0x103   : > { %v496_v60 = vpop.f32.mrf.mxu1  ;;  %v642_v7 = vadd.f32 %v616_v2, %v489_v49 }
 0x104   : > { %v497_v5 = vadd.f32 %v496_v60, %v406_v4  ;;  %v1819_v6 = vpop.f32.mrf.mxu0 }
 0x105   : > { %v1801_v9 = vpop.f32.mrf.mxu1 }
 0x106   : > { %v619_v15 = vpop.f32.mrf.mxu0 }
 0x107   : > { %v499_v19 = vpop.f32.mrf.mxu1  ;;  %v643_v39 = vadd.f32 %v619_v15, %v492_v59 }
 0x108   : > { %v500_v50 = vadd.f32 %v499_v19, %v409_v14  ;;  %v1820_v38 = vpop.f32.mrf.mxu0 }
 0x109   : > { %v1802_v11 = vpop.f32.mrf.mxu1 }
 0x10a   : > { %v624_v46 = vpop.f32.mrf.mxu0 }
 0x10b   : > { %v504_v62 = vpop.f32.mrf.mxu1  ;;  %v644_v57 = vadd.f32 %v624_v46, %v497_v5 }
 0x10c   : > { %v505_v8 = vadd.f32 %v504_v62, %v414_v21  ;;  %v1823_v20 = vpop.f32.mrf.mxu0 }
 0x10d   : > { %v1805_v3 = vpop.f32.mrf.mxu1 }
 0x10e   : > { %v627_v12 = vpop.f32.mrf.mxu0 }
 0x10f   : > { %v507_v16 = vpop.f32.mrf.mxu1  ;;  %v645_v17 = vadd.f32 %v627_v12, %v500_v50 }
 0x110   : > { %v1824_v54 = vpop.f32.mrf.mxu0 }
 0x111   : > { %v1806_v13 = vpop.f32.mrf.mxu1 }
 0x112   : > { %v632_v4 = vpop.f32.mrf.mxu0 }
 0x113   : > { %v646_v10 = vadd.f32 %v632_v4, %v505_v8  ;;  %v721_v56 = vpop.f32.mrf.mxu1 }
 0x114   : > { %v759_v22 = vadd.f32 %v721_v56, %v638_v34  ;;  %v1827_v1 = vpop.f32.mrf.mxu0 }
 0x115   : > { %v1833_v23 = vpop.f32.mrf.mxu1 }
 0x116   : > { %v635_v14 = vpop.f32.mrf.mxu0 }
 0x117   : > { %v724_v61 = vpop.f32.mrf.mxu1 }
 0x118   : > { %v760_v24 = vadd.f32 %v724_v61, %v639_v42  ;;  %v1828_v18 = vpop.f32.mrf.mxu0 }
 0x119   : > { %v1834_v25 = vpop.f32.mrf.mxu1 }
 0x11a   : > { %v872_v26 = vpop.f32.mrf.mxu0 }
 0x11b   : > { %v729_v21 = vpop.f32.mrf.mxu1  ;;  %v2493_v27 = vadd.f32 %v872_v26, %v759_v22 }
 0x11c   : > { %v761_v28 = vadd.f32 %v729_v21, %v640_v47  ;;  %v1855_v31 = vpop.f32.mrf.mxu0 }
 0x11d   : > { %v1837_v32 = vpop.f32.mrf.mxu1 }
 0x11e   : > { %v875_v53 = vpop.f32.mrf.mxu0 }
 0x11f   : > { %v732_v33 = vpop.f32.mrf.mxu1  ;;  %v2495_v35 = vadd.f32 %v875_v53, %v760_v24 }
 0x120   : > { %v762_v36 = vadd.f32 %v732_v33, %v641_v48  ;;  %v1856_v34 = vpop.f32.mrf.mxu0 }
 0x121   : > { %v1838_v37 = vpop.f32.mrf.mxu1 }
 0x122   : > { %v880_v40 = vpop.f32.mrf.mxu0 }
 0x123   : > { %v737_v41 = vpop.f32.mrf.mxu1  ;;  %v2497_v43 = vadd.f32 %v880_v40, %v761_v28 }
 0x124   : > { %v763_v42 = vadd.f32 %v737_v41, %v642_v7  ;;  %v1859_v44 = vpop.f32.mrf.mxu0 }
 0x125   : > { %v1841_v29 = vpop.f32.mrf.mxu1 }
 0x126   : > { %v883_v45 = vpop.f32.mrf.mxu0 }
 0x127   : > { %v740_v30 = vpop.f32.mrf.mxu1  ;;  %v2499_v49 = vadd.f32 %v883_v45, %v762_v36 }
 0x128   : > { %v764_v47 = vadd.f32 %v740_v30, %v643_v39  ;;  %v1860_v51 = vpop.f32.mrf.mxu0 }
 0x129   : > { %v1842_v52 = vpop.f32.mrf.mxu1 }
 0x12a   : > { %v888_v55 = vpop.f32.mrf.mxu0 }
 0x12b   : > { %v745_v58 = vpop.f32.mrf.mxu1  ;;  %v2501_v59 = vadd.f32 %v888_v55, %v763_v42 }
 0x12c   : > { %v765_v48 = vadd.f32 %v745_v58, %v644_v57  ;;  %v1863_v63 = vpop.f32.mrf.mxu0 }
 0x12d   : > { %v1845_v0 = vpop.f32.mrf.mxu1 }
 0x12e   : > { %v891_v2 = vpop.f32.mrf.mxu0 }
 0x12f   : > { %v748_v60 = vpop.f32.mrf.mxu1  ;;  %v2503_v5 = vadd.f32 %v891_v2, %v764_v47 }
 0x130   : > { %v766_v7 = vadd.f32 %v748_v60, %v645_v17  ;;  %v1864_v6 = vpop.f32.mrf.mxu0 }
 0x131   : > { %v1846_v9 = vpop.f32.mrf.mxu1 }
 0x132   : > { %v896_v15 = vpop.f32.mrf.mxu0 }
 0x133   : > { %v753_v19 = vpop.f32.mrf.mxu1  ;;  %v2505_v50 = vadd.f32 %v896_v15, %v765_v48 }
 0x134   : > { %v767_v39 = vadd.f32 %v753_v19, %v646_v10  ;;  %v1867_v38 = vpop.f32.mrf.mxu0 }
 0x135   : > { %v1849_v11 = vpop.f32.mrf.mxu1 }
 0x136   : > { %v899_v46 = vpop.f32.mrf.mxu0 }
 0x137   : > { %v756_v62 = vpop.f32.mrf.mxu1  ;;  %v2507_v8 = vadd.f32 %v899_v46, %v766_v7 }
 0x138   : > { %v1868_v57 = vpop.f32.mrf.mxu0 }
 0x139   : > { %v1850_v20 = vpop.f32.mrf.mxu1  ;;  %v2536_v57 = vld [vmem:[%s2599_s2] ss:$0 sm:$0xff] }
 0x13a   : > { %v904_v3 = vpop.f32.mrf.mxu0 }
 0x13b   : > { %v2509_v12 = vadd.f32 %v904_v3, %v767_v39  ;;  %v1017_v16 = vpop.f32.mrf.mxu1 }
 0x13c   : > { %v1871_v17 = vpop.f32.mrf.mxu0  ;;  %v1055_v7 = vadd.f32 %v1017_v16, %v2493_v27 }
 0x13d   : > { %v1877_v54 = vpop.f32.mrf.mxu1 }
 0x13e   : > { %v907_v13 = vpop.f32.mrf.mxu0 }
 0x13f   : > { %v1020_v4 = vpop.f32.mrf.mxu1 }
 0x140   : > { %v1872_v56 = vpop.f32.mrf.mxu0  ;;  %v1056_v38 = vadd.f32 %v1020_v4, %v2495_v35 }
 0x141   : > { %v1878_v22 = vpop.f32.mrf.mxu1 }
 0x142   : > { %v1162_v1 = vpop.f32.mrf.mxu0 }
 0x143   : > { %v1025_v10 = vpop.f32.mrf.mxu1  ;;  %v1200_v15 = vadd.f32 %v1162_v1, %v1055_v7 }
 0x144   : > { %v1899_v23 = vpop.f32.mrf.mxu0  ;;  %v1057_v16 = vadd.f32 %v1025_v10, %v2497_v43 }
 0x145   : > { %v1881_v14 = vpop.f32.mrf.mxu1 }
 0x146   : > { %v1165_v61 = vpop.f32.mrf.mxu0 }
 0x147   : > { %v1028_v24 = vpop.f32.mrf.mxu1  ;;  %v1201_v20 = vadd.f32 %v1165_v61, %v1056_v38 }
 0x148   : > { %v1900_v18 = vpop.f32.mrf.mxu0  ;;  %v1058_v61 = vadd.f32 %v1028_v24, %v2499_v49 }
 0x149   : > { %v1882_v25 = vpop.f32.mrf.mxu1 }
 0x14a   : > { %v1170_v26 = vpop.f32.mrf.mxu0 }
 0x14b   : > { %v2511_v21 = vpop.f32.mrf.mxu1  ;;  %v1202_v4 = vadd.f32 %v1170_v26, %v1057_v16 }
 0x14c   : > { %v1903_v28 = vpop.f32.mrf.mxu0 }
 0x14d   : > { %v1885_v31 = vpop.f32.mrf.mxu1 }
 0x14e   : > { %v1173_v32 = vpop.f32.mrf.mxu0 }
 0x14f   : > { %v2513_v53 = vpop.f32.mrf.mxu1  ;;  %v1203_v28 = vadd.f32 %v1173_v32, %v1058_v61 }
 0x150   : > { %v1904_v33 = vpop.f32.mrf.mxu0 }
 0x151   : > { %v1886_v36 = vpop.f32.mrf.mxu1 }
 0x152   : > { %v2515_v34 = vpop.f32.mrf.mxu0 }
 0x153   : > { %v2517_v37 = vpop.f32.mrf.mxu1 }
 0x154   : > { %v1907_v40 = vpop.f32.mrf.mxu0  ;;  %v1061_v38 = vadd.f32 %v2517_v37, %v2505_v50 }
 0x155   : > { %v1889_v41 = vpop.f32.mrf.mxu1 }
 0x156   : > { %v2519_v42 = vpop.f32.mrf.mxu0  ;;  %v1059_v41 = vadd.f32 %v2511_v21, %v2501_v59 }
 0x157   : > { %v2521_v44 = vpop.f32.mrf.mxu1 }
 0x158   : > { %v1908_v29 = vpop.f32.mrf.mxu0  ;;  %v1062_v16 = vadd.f32 %v2521_v44, %v2507_v8 }
 0x159   : > { %v1890_v45 = vpop.f32.mrf.mxu1 }
 0x15a   : > { %v2523_v30 = vpop.f32.mrf.mxu0 }
 0x15b   : > { %v2525_v47 = vpop.f32.mrf.mxu1 }
 0x15c   : > { %v1911_v51 = vpop.f32.mrf.mxu0 }
 0x15d   : > { %v1893_v52 = vpop.f32.mrf.mxu1 }
 0x15e   : > { %v2527_v55 = vpop.f32.mrf.mxu0  ;;  %v1204_v52 = vadd.f32 %v2515_v34, %v1059_v41 }
 0x15f   : > { %v1052_v58 = vpop.f32.mrf.mxu1 }
 0x160   : > { %v1912_v48 = vpop.f32.mrf.mxu0 }
 0x161   : > { %v1894_v63 = vpop.f32.mrf.mxu1 }
 0x162   : > { %v2529_v0 = vpop.f32.mrf.mxu0 }
 0x163   : > { %v1282_v2 = vpop.f32.mrf.mxu1 }
 0x164   : > { %v1915_v60 = vpop.f32.mrf.mxu0  ;;  %v1320_v11 = vadd.f32 %v1282_v2, %v1200_v15  ;;  %v1060_v2 = vadd.f32 %v2513_v53, %v2503_v5 }
 0x165   : > { %v1921_v6 = vpop.f32.mrf.mxu1 }
 0x166   : > { %v1197_v9 = vpop.f32.mrf.mxu0 }
 0x167   : > { %v1285_v19 = vpop.f32.mrf.mxu1  ;;  %v1205_v9 = vadd.f32 %v2519_v42, %v1060_v2 }
 0x168   : > { %v1916_v39 = vpop.f32.mrf.mxu0  ;;  %v1321_v54 = vadd.f32 %v1285_v19, %v1201_v20  ;;  %v1206_v20 = vadd.f32 %v2523_v30, %v1061_v38 }
 0x169   : > { %v1922_v46 = vpop.f32.mrf.mxu1 }
 0x16a   : > { %v1397_v62 = vpop.f32.mrf.mxu0 }
 0x16b   : > { %v1290_v3 = vpop.f32.mrf.mxu1  ;;  %v1435_v17 = vadd.f32 %v1397_v62, %v1320_v11 }
 0x16c   : > { %v1943_v27 = vpop.f32.mrf.mxu0  ;;  %v1322_v43 = vadd.f32 %v1290_v3, %v1202_v4 }
 0x16d   : > { %v1451_v13 = vadd.f32 %v2536_v57, %v1435_v17  ;;  %v1925_v56 = vpop.f32.mrf.mxu1 }
 0x16e   : > { %v1400_v35 = vpop.f32.mrf.mxu0 }
 0x16f   : > { %v1460_v22 = vmax.f32 %v1451_v13, 0.0  ;;  %v1293_v1 = vpop.f32.mrf.mxu1  ;;  %v1436_v23 = vadd.f32 %v1400_v35, %v1321_v54  ;;  %v1207_v35 = vadd.f32 %v2527_v55, %v1062_v16 }
 0x170   : > { %v1944_v14 = vpop.f32.mrf.mxu0  ;;  %v1323_v29 = vadd.f32 %v1293_v1, %v1203_v28 }
 0x171   : > { %v1700_v10 = vpack.c.bf16 %v1460_v22, %v1460_v22  ;;  %v1452_v18 = vadd.f32 %v2536_v57, %v1436_v23  ;;  %v1926_v25 = vpop.f32.mrf.mxu1  ;;  %v1063_v23 = vadd.f32 %v2525_v47, %v2509_v12 }
 0x172   : > { %v1405_v26 = vpop.f32.mrf.mxu0 }
 0x173   : > { %1507 = vst.msk [vmem:[%s2544_s20] sm:$0xf] %vm1506_vm6, %v1700_v10  ;;  %v1461_v31 = vmax.f32 %v1452_v18, 0.0  ;;  %v1298_v33 = vpop.f32.mrf.mxu1  ;;  %v1437_v36 = vadd.f32 %v1405_v26, %v1322_v43  ;;  %v1208_v10 = vadd.f32 %v2529_v0, %v1063_v23 }
 0x174   : > { %v1947_v40 = vpop.f32.mrf.mxu0  ;;  %v1324_v60 = vadd.f32 %v1298_v33, %v1204_v52 }
 0x175   : > { %v1701_v45 = vpack.c.bf16 %v1461_v31, %v1461_v31  ;;  %v1453_v49 = vadd.f32 %v2536_v57, %v1437_v36  ;;  %v1929_v24 = vpop.f32.mrf.mxu1 }
 0x176   : > { %v1408_v51 = vpop.f32.mrf.mxu0 }
 0x177   : > { %1508 = vst.msk [vmem:[%s2544_s20 + $0x4] sm:$0xf] %vm1506_vm6, %v1701_v45  ;;  %v1462_v32 = vmax.f32 %v1453_v49, 0.0  ;;  %v1301_v58 = vpop.f32.mrf.mxu1  ;;  %v1438_v48 = vadd.f32 %v1408_v51, %v1323_v29 }
 0x178   : > { %v1948_v63 = vpop.f32.mrf.mxu0  ;;  %v1325_v11 = vadd.f32 %v1301_v58, %v1205_v9 }
 0x179   : > { %v1702_v59 = vpack.c.bf16 %v1462_v32, %v1462_v32  ;;  %v1454_v21 = vadd.f32 %v2536_v57, %v1438_v48  ;;  %v1930_v7 = vpop.f32.mrf.mxu1 }
 0x17a   : > { %v1413_v6 = vpop.f32.mrf.mxu0 }
 0x17b   : > { %1509 = vst.msk [vmem:[%s2544_s20 + $0x8] sm:$0xf] %vm1506_vm6, %v1702_v59  ;;  %v1463_v34 = vmax.f32 %v1454_v21, 0.0  ;;  %v1306_v15 = vpop.f32.mrf.mxu1  ;;  %v1439_v19 = vadd.f32 %v1413_v6, %v1324_v60 }
 0x17c   : > { %v1951_v39 = vpop.f32.mrf.mxu0  ;;  %v1326_v54 = vadd.f32 %v1306_v15, %v1206_v20 }
 0x17d   : > { %v1703_v5 = vpack.c.bf16 %v1463_v34, %v1463_v34  ;;  %v1455_v53 = vadd.f32 %v2536_v57, %v1439_v19  ;;  %v1933_v46 = vpop.f32.mrf.mxu1 }
 0x17e   : > { %v1416_v62 = vpop.f32.mrf.mxu0 }
 0x17f   : > { %1510 = vst.msk [vmem:[%s2544_s20 + $0xc] sm:$0xf] %vm1506_vm6, %v1703_v5  ;;  %v1464_v42 = vmax.f32 %v1455_v53, 0.0  ;;  %v1309_v3 = vpop.f32.mrf.mxu1  ;;  %v1440_v17 = vadd.f32 %v1416_v62, %v1325_v11 }
 0x180   : > { %v1952_v27 = vpop.f32.mrf.mxu0  ;;  %v1327_v14 = vadd.f32 %v1309_v3, %v1207_v35 }
 0x181   : > { %v1704_v50 = vpack.c.bf16 %v1464_v42, %v1464_v42  ;;  %v1456_v37 = vadd.f32 %v2536_v57, %v1440_v17  ;;  %v1934_v13 = vpop.f32.mrf.mxu1 }
 0x182   : > { %v1421_v56 = vpop.f32.mrf.mxu0 }
 0x183   : > { %1511 = vst.msk [vmem:[%s2544_s20 + $0x10] sm:$0xf] %vm1506_vm6, %v1704_v50  ;;  %v1465_v30 = vmax.f32 %v1456_v37, 0.0  ;;  %v1314_v4 = vpop.f32.mrf.mxu1  ;;  %v1441_v22 = vadd.f32 %v1421_v56, %v1326_v54 }
 0x184   : > { %v1955_v1 = vpop.f32.mrf.mxu0  ;;  %v1328_v28 = vadd.f32 %v1314_v4, %v1208_v10 }
 0x185   : > { %v1705_v8 = vpack.c.bf16 %v1465_v30, %v1465_v30  ;;  %v1457_v44 = vadd.f32 %v2536_v57, %v1441_v22  ;;  %v1937_v61 = vpop.f32.mrf.mxu1 }
 0x186   : > { %v1424_v43 = vpop.f32.mrf.mxu0 }
 0x187   : > { %1512 = vst.msk [vmem:[%s2544_s20 + $0x14] sm:$0xf] %vm1506_vm6, %v1705_v8  ;;  %v1466_v55 = vmax.f32 %v1457_v44, 0.0  ;;  %v1317_v18 = vpop.f32.mrf.mxu1  ;;  %v1442_v25 = vadd.f32 %v1424_v43, %v1327_v14 }
 0x188   : > { %v1956_v26 = vpop.f32.mrf.mxu0 }
 0x189   : > { %v1706_v31 = vpack.c.bf16 %v1466_v55, %v1466_v55  ;;  %v1458_v12 = vadd.f32 %v2536_v57, %v1442_v25  ;;  %v1938_v47 = vpop.f32.mrf.mxu1 }
 0x18a   : > { %v1429_v33 = vpop.f32.mrf.mxu0 }
 0x18b   : > { %1513 = vst.msk [vmem:[%s2544_s20 + $0x18] sm:$0xf] %vm1506_vm6, %v1706_v31  ;;  %v1467_v36 = vmax.f32 %v1458_v12, 0.0  ;;  %v1443_v40 = vadd.f32 %v1429_v33, %v1328_v28 }
 0x18c   : > { %v1959_v41 = vpop.f32.mrf.mxu0 }
 0x18d   : > { %v1707_v0 = vpack.c.bf16 %v1467_v36, %v1467_v36  ;;  %v1459_v29 = vadd.f32 %v2536_v57, %v1443_v40 }
 0x18e   : > { %v1432_v45 = vpop.f32.mrf.mxu0 }
 0x18f   : > { %1514 = vst.msk [vmem:[%s2544_s20 + $0x1c] sm:$0xf] %vm1506_vm6, %v1707_v0  ;;  %v1468_v49 = vmax.f32 %v1459_v29, 0.0 }
 0x190   : > { %v1960_v24 = vpop.f32.mrf.mxu0 }
 0x191   : > { %v1708_v51 = vpack.c.bf16 %v1468_v49, %v1468_v49 }
 0x193   : > { %1515 = vst.msk [vmem:[%s2544_s20 + $0x20] sm:$0xf] %vm1506_vm6, %v1708_v51 }
 0x194 PF: > { %s13_s14 = sadd.s32 1, %s2044_s14   ;;  %s2601_s12 = smov %s2040_s13 }
 0x195   : > { %p10_p5 = scmp.ge.s32.totalorder %s13_s14, 4   ;;  %s2602_s13 = smov %s2604_s15 }
 0x197   :  { %12 = sbr.rel (!%p10_p5) target bundleno = 2 (0x2), region = 70 }

// kernel: vae_forward.9
= control target key start
LH: loop header
LB: loop body
LE: loop exit
PB: predicated region body
PF: predicated region fallthrough
CT: control target
= control target key end

     0   :  { %s1210_s12 = smov 0   ;;  %s1212_s13 = smov 0   ;;  %s1365_s0 = inlined_call_operand.vmem [shape: bf16[2,108,8], index: 0, kind: input, shape index: {}]   ;;  %s1366_s1 = inlined_call_operand.vmem [shape: bf16[9,8,16], index: 1, kind: input, shape index: {}]   ;;  %s1367_s2 = inlined_call_operand.vmem [shape: f32[1,16], index: 2, kind: input, shape index: {}]   ;;  %s1368_s3 = inlined_call_operand.vmem [shape: bf16[2,20,16], index: 3, kind: output, shape index: {}]  }
   0x1   :  { %s1214_s14 = smov 0  }
   0x2 LB: > { %s25_s15 = sadd.s32 1, %s1184_s13  ;;  %p992_p0 = scmp.ge.s32.totalorder %s1188_s14, 1  ;;  %s1188_s14 = sphi %s1214_s14, %s13_s14   ;;  %s1184_s13 = sphi %s1212_s13, %s1370_s13   ;;  %s1180_s12 = sphi %s1210_s12, %s1369_s12  }
   0x3   : > { %p27_p1 = scmp.ge.s32.totalorder %s25_s15, 2  ;;  %p151_p2 = scmp.lt.s32.totalorder %s1188_s14, 3 }
   0x5   : > { %s1372_s15 = smov (%p27_p1, %s25_s15), 0  ;;  %p152_p3 = pnand %p992_p0, %p151_p2 }
   0x6   : > { %p179_p4 = scmp.lt.s32.totalorder (!%p152_p3), %s1180_s12, 1 }
   0x7   : > { %155 = sbr.rel (%p152_p3) target bundleno = 268 (0x10c), region = 32 }
   0xc   : > { %v999_v0 = vld [vmem:[%s1366_s1 + $0x4] sm:$0xf]  ;;  %vm249_vm0 = vcmask 1043456   ;;  %v221_v1 = vld [vmem:[%s1366_s1] sm:$0xf]  ;;  %s1374_s12 = smov (!%p179_p4, %s1180_s12), 1 }
   0xd   : > { %1121 = vmatprep.subr.msk.bf16.mxu0 %vm249_vm0, %v999_v0  ;;  %v251_v2 = vsel %vm249_vm0, %v999_v0, 0  ;;  %1122 = vmatprep.subr.msk.bf16.mxu1 %vm249_vm0, %v221_v1  ;;  %v308_v3 = vsel %vm249_vm0, %v221_v1, 0  ;;  %v1004_v4 = vld [vmem:[%s1366_s1 + $0x8] sm:$0xf]  ;;  %v1009_v5 = vld [vmem:[%s1366_s1 + $0xc] sm:$0xf] }
   0xe   : > { %1068 = vmatpush3.bf16.msra.mxu0 %v251_v2  ;;  %1074 = vmatpush3.bf16.msra.mxu1 %v308_v3  ;;  %s1130_s24 = smul.u32 56, %s1374_s12  ;;  %vm226_vm1 = vsmask.f32 7424  ;;  %vm242_vm2 = vcmask 64512   ;;  %v380_v6 = vsel %vm249_vm0, %v1004_v4, 0  ;;  %vm439_vm3 = vcmask 1046528  }
   0xf   : > { %1123 = vmatprep.subr.msk.bf16.mxu0 %vm249_vm0, %v1004_v4  ;;  %1124 = vmatprep.subr.msk.bf16.mxu1 %vm249_vm0, %v1009_v5  ;;  %v450_v13 = vsel %vm249_vm0, %v1009_v5, 0  ;;  %v1017_v21 = vld [vmem:[%s1366_s1 + $0x14] sm:$0xf]  ;;  %v1014_v49 = vld [vmem:[%s1366_s1 + $0x10] sm:$0xf]  ;;  %vm745_vm5 = vcmask 1044480  }
  0x10   : > { %s1252_s27 = scalar_lea.vmem %s1365_s0, %s1130_s24  ;;  %v611_v56 = vsel %vm249_vm0, %v1017_v21, 0  ;;  %v1025_v63 = vld [vmem:[%s1366_s1 + $0x1c] sm:$0xf]  ;;  %vm507_vm4 = vsmask.f32 6400  ;;  %v532_v5 = vsel %vm249_vm0, %v1014_v49, 0 }
  0x11   : > { %v198_v7 = vld [vmem:[%s1252_s27 + $0xc] sm:$0xf]  ;;  %v199_v8 = vld [vmem:[%s1252_s27 + $0x10] sm:$0xf]  ;;  %v1258_v9 = vld [vmem:[%s1252_s27 + $0x14] sm:$0xf] }
  0x12   : > { %v1260_v10 = vcombine.low %v198_v7, %v199_v8  ;;  %v998_v11 = vcombine.low %v1258_v9, %v1258_v9  ;;  %v1265_v12 = vld [vmem:[%s1252_s27] sm:$0xff]   ;;  %v197_v14 = vld [vmem:[%s1252_s27 + $0x8] sm:$0xf]  ;;  %v1270_v15 = vld [vmem:[%s1252_s27 + $0x18] sm:$0xf]  ;;  %s1131_s17 = smul.u32 12, %s1374_s12 }
  0x13   : > { %v202_v16 = vld [vmem:[%s1252_s27 + $0x1c] sm:$0xf]  ;;  %1075 = vmatprep.mubr.msk.bf16.mxu1 %vm242_vm2, %v1265_v12  ;;  %v996_v22 = vcombine.low %v197_v14, %v197_v14  ;;  %v360_v23 = vshrl.u32 %v1265_v12, 16  ;;  %v362_v24 = vshll.u32 %v1265_v12, 16  ;;  %v1162_v25 = vld [vmem:[%s1252_s27 + $0x20] ss:$0 sps:$4 sm:$0xff]   ;;  %v1285_v29 = vcombine.low %v197_v14, %v198_v7 }
  0x14   : > { %v228_v17 = vshrl.u32 %v1260_v10, 16  ;;  %v230_v18 = vshll.u32 %v1260_v10, 16  ;;  %v235_v19 = vshll.u32 %v998_v11, 16  ;;  %v239_v20 = vshrl.u32 %v998_v11, 16  ;;  %v1163_v33 = vld [vmem:[%s1252_s27 + $0x24] sm:$0xff]   ;;  %s192_s20 = scalar_lea.vmem %s1368_s3, %s1131_s17 }
  0x15   : > { %v1007_v28 = vcombine.low %v1270_v15, %v202_v16  ;;  %1076 = vmatmul.mubr.msk.bf16.vlgmr.msra.gmra.mxu1 %vm242_vm2, %v996_v22  ;;  %v364_v30 = vrot.slane %v362_v24, 1  ;;  %v366_v31 = vshll.u32 %v996_v22, 16  ;;  %v441_v32 = vrot.slane %v1162_v25, 1  ;;  %v1164_v37 = vld [vmem:[%s1252_s27 + $0x2c] ss:$0 sps:$4 sm:$0xff]  }
  0x16   : > { %v232_v26 = vrot.slane %v230_v18, 1  ;;  %v237_v27 = vrot.slane %v235_v19, 1  ;;  %1086 = vmatpush3.bf16.msra.mxu1 %v450_v13  ;;  %v509_v41 = vshrl.u32 %v1163_v33, 16  ;;  %v512_v42 = vshll.u32 %v1163_v33, 16  ;;  %v1021_v18 = vld [vmem:[%s1366_s1 + $0x18] sm:$0xf] }
  0x17   : > { %v440_v36 = vrot.slane %v1007_v28, 1  ;;  %v588_v38 = vshrl.u32 %v1007_v28, 16  ;;  %v365_v39 = vor.u32 %v364_v30, %v360_v23  ;;  %v368_v40 = vrot.slane %v366_v31, 1  ;;  %1126 = vmatprep.subr.msk.bf16.mxu1 %vm249_vm0, %v1017_v21 }
  0x18   : > { %v233_v34 = vor.u32 %v232_v26, %v228_v17  ;;  %v241_v35 = vor.u32 %v239_v20, %v237_v27  ;;  %v517_v45 = vshrl.u32 %v1164_v37, 16  ;;  %v520_v46 = vshll.u32 %v1164_v37, 16 }
  0x19   : > { %v442_v44 = vsel %vm439_vm3, %v440_v36, %v441_v32  ;;  %v369_v47 = vsel %vm226_vm1, %v365_v39, %v368_v40  ;;  %v370_v48 = vshrl.u32 %v996_v22, 16  ;;  %v511_v50 = vrot.slane %v509_v41, 1 }
  0x1a   : > { %v238_v43 = vsel %vm226_vm1, %v233_v34, %v237_v27  ;;  %1087 = vmatprep.mubr.msk.bf16.mxu1 %vm242_vm2, %v442_v44  ;;  %v514_v51 = vrot.slane %v512_v42, 2  ;;  %v519_v52 = vrot.slane %v517_v45, 1  ;;  %v522_v53 = vrot.slane %v520_v46, 2 }
  0x1b   : > { %1069 = vmatprep.mubr.msk.bf16.mxu0 %vm242_vm2, %v238_v43  ;;  %v590_v54 = vrot.slane %v588_v38, 1  ;;  %v591_v55 = vshll.u32 %v1007_v28, 16  ;;  %v596_v57 = vshrl.u32 %v1162_v25, 16  ;;  %v599_v58 = vshll.u32 %v1162_v25, 16 }
  0x1c   : > { %1070 = vmatmul.mubr.msk.bf16.vlgmr.msra.gmra.mxu0 %vm242_vm2, %v241_v35  ;;  %v1024_v59 = vcombine.low %v1258_v9, %v1270_v15  ;;  %v515_v60 = vor.u32 %v514_v51, %v511_v50  ;;  %v523_v61 = vor.u32 %v522_v53, %v519_v52  ;;  %v672_v0 = vshrl.u32 %v1285_v29, 16 }
  0x1d   : > { %1080 = vmatpush3.bf16.msra.mxu0 %v380_v6  ;;  %1081 = vmatprep.mubr.msk.bf16.mxu0 %vm242_vm2, %v369_v47  ;;  %v593_v62 = vrot.slane %v591_v55, 2  ;;  %v598_v1 = vrot.slane %v596_v57, 1  ;;  %v601_v2 = vrot.slane %v599_v58, 2  ;;  %v675_v3 = vshll.u32 %v1285_v29, 16 }
  0x1e   : > { %1125 = vmatprep.subr.msk.bf16.mxu0 %vm249_vm0, %v1014_v49  ;;  %1088 = vmatmul.mubr.msk.bf16.vlgmr.msra.gmra.mxu1 %vm242_vm2, %v441_v32  ;;  %v372_v4 = vor.u32 %v370_v48, %v368_v40  ;;  %v668_v8 = vrot.slane %v360_v23, 2  ;;  %v746_v9 = vrot.slane %v1260_v10, 3  ;;  %v747_v11 = vrot.slane %v1024_v59, 3 }
  0x1f   : > { %1098 = vmatpush3.bf16.msra.mxu1 %v611_v56  ;;  %v594_v6 = vor.u32 %v593_v62, %v590_v54  ;;  %v602_v7 = vor.u32 %v601_v2, %v598_v1  ;;  %v524_v13 = vsel %vm507_vm4, %v515_v60, %v523_v61  ;;  %v669_v14 = vrot.slane %v362_v24, 3  ;;  %v1028_v24 = vld [vmem:[%s1366_s1 + $0x20] sm:$0xf] }
  0x20   : > { %1128 = vmatprep.subr.msk.bf16.mxu1 %vm249_vm0, %v1025_v63  ;;  %v674_v15 = vrot.slane %v672_v0, 2  ;;  %v677_v16 = vrot.slane %v675_v3, 3  ;;  %v756_v10 = vsel %vm249_vm0, %v1025_v63, 0  ;;  %v748_v19 = vsel %vm745_vm5, %v746_v9, %v747_v11 }
  0x21   : > { %v603_v17 = vsel %vm507_vm4, %v594_v6, %v602_v7  ;;  %v670_v20 = vor.u32 %v669_v14, %v668_v8  ;;  %vm667_vm6 = vsmask.f32 5376  ;;  %v687_v22 = vsel %vm249_vm0, %v1021_v18, 0 }
  0x22   : > { %1099 = vmatprep.mubr.msk.bf16.mxu1 %vm242_vm2, %v603_v17  ;;  %v678_v21 = vor.u32 %v677_v16, %v674_v15  ;;  %v813_v25 = vrot.slane %v1265_v12, 3  ;;  %v814_v26 = vrot.slane %v1285_v29, 3  ;;  %v823_v27 = vsel %vm249_vm0, %v1028_v24, 0  ;;  %v1031_v16 = vld [vmem:[%s1367_s2] ss:$0 sm:$0xff] }
  0x23   : > { %vm905_vm7 = vcmask 123904   ;;  %vm902_vm8 = vcmask 125952  }
  0x24   : > { %1082 = vmatmul.mubr.msk.bf16.vlgmr.msra.gmra.mxu0 %vm242_vm2, %v372_v4  ;;  %v679_v23 = vsel %vm667_vm6, %v670_v20, %v678_v21  ;;  %v815_v28 = vsel %vm745_vm5, %v813_v25, %v814_v26 }
  0x25   : > { %1092 = vmatpush3.bf16.msra.mxu0 %v532_v5  ;;  %1093 = vmatprep.mubr.msk.bf16.mxu0 %vm242_vm2, %v524_v13 }
  0x26   : > { %1127 = vmatprep.subr.msk.bf16.mxu0 %vm249_vm0, %v1021_v18  ;;  %1100 = vmatmul.mubr.msk.bf16.vlgmr.msra.gmra.mxu1 %vm242_vm2, %v602_v7 }
  0x27   : > { %1110 = vmatpush3.bf16.msra.mxu1 %v756_v10  ;;  %1111 = vmatprep.mubr.msk.bf16.mxu1 %vm242_vm2, %v748_v19 }
  0x2c   : > { %1094 = vmatmul.mubr.msk.bf16.vlgmr.msra.gmra.mxu0 %vm242_vm2, %v523_v61 }
  0x2d   : > { %1104 = vmatpush3.bf16.msra.mxu0 %v687_v22  ;;  %1105 = vmatprep.mubr.msk.bf16.mxu0 %vm242_vm2, %v679_v23 }
  0x2e   : > { %1129 = vmatprep.subr.msk.bf16.mxu0 %vm249_vm0, %v1028_v24  ;;  %1112 = vmatmul.mubr.msk.bf16.vlgmr.msra.gmra.mxu1 %vm242_vm2, %v747_v11 }
  0x34   : > { %1106 = vmatmul.mubr.msk.bf16.vlgmr.msra.gmra.mxu0 %vm242_vm2, %v678_v21 }
  0x35   : > { %1116 = vmatpush3.bf16.msra.mxu0 %v823_v27  ;;  %1117 = vmatprep.mubr.msk.bf16.mxu0 %vm242_vm2, %v815_v28 }
  0x3c   : > { %1118 = vmatmul.mubr.msk.bf16.vlgmr.msra.gmra.mxu0 %vm242_vm2, %v814_v26 }
  0xd5   : > { %v1077_v30 = vpop.f32.mrf.mxu1 }
  0xd7   : > { %v344_v31 = vpop.f32.mrf.mxu1 }
  0xd9   : > { %v1078_v32 = vpop.f32.mrf.mxu1 }
  0xdb   : > { %v347_v12 = vpop.f32.mrf.mxu1 }
  0xdc   : > { %v1071_v33 = vpop.f32.mrf.mxu0 }
  0xdd   : > { %v353_v44 = vadd.f32 %v1077_v30, %v1071_v33 }
  0xde   : > { %v287_v34 = vpop.f32.mrf.mxu0  ;;  %v1089_v29 = vpop.f32.mrf.mxu1 }
  0xdf   : > { %v345_v47 = vadd.f32 %v344_v31, %v287_v34 }
  0xe0   : > { %v1072_v35 = vpop.f32.mrf.mxu0  ;;  %v486_v36 = vpop.f32.mrf.mxu1 }
  0xe2   : > { %v290_v37 = vpop.f32.mrf.mxu0  ;;  %v1090_v38 = vpop.f32.mrf.mxu1 }
  0xe3   : > { %v348_v54 = vadd.f32 %v347_v12, %v290_v37 }
  0xe4   : > { %v1083_v39 = vpop.f32.mrf.mxu0  ;;  %v489_v40 = vpop.f32.mrf.mxu1 }
  0xe5   : > { %v432_v48 = vadd.f32 %v1083_v39, %v353_v44 }
  0xe6   : > { %v416_v41 = vpop.f32.mrf.mxu0  ;;  %v1101_v42 = vpop.f32.mrf.mxu1 }
  0xe7   : > { %v430_v51 = vadd.f32 %v416_v41, %v345_v47  ;;  %v502_v55 = vadd.f32 %v1089_v29, %v432_v48 }
  0xe8   : > { %v1084_v43 = vpop.f32.mrf.mxu0  ;;  %v647_v45 = vpop.f32.mrf.mxu1 }
  0xe9   : > { %v500_v58 = vadd.f32 %v486_v36, %v430_v51 }
  0xea   : > { %v419_v46 = vpop.f32.mrf.mxu0  ;;  %v1102_v49 = vpop.f32.mrf.mxu1 }
  0xeb   : > { %v431_v59 = vadd.f32 %v419_v46, %v348_v54 }
  0xec   : > { %v1095_v50 = vpop.f32.mrf.mxu0  ;;  %v650_v52 = vpop.f32.mrf.mxu1 }
  0xed   : > { %v584_v60 = vadd.f32 %v1095_v50, %v502_v55  ;;  %v501_v2 = vadd.f32 %v489_v40, %v431_v59 }
  0xee   : > { %v568_v53 = vpop.f32.mrf.mxu0  ;;  %v1113_v56 = vpop.f32.mrf.mxu1 }
  0xef   : > { %v582_v63 = vadd.f32 %v568_v53, %v500_v58  ;;  %v663_v3 = vadd.f32 %v1101_v42, %v584_v60 }
  0xf0   : > { %v1096_v57 = vpop.f32.mrf.mxu0  ;;  %v792_v61 = vpop.f32.mrf.mxu1 }
  0xf1   : > { %v661_v5 = vadd.f32 %v647_v45, %v582_v63 }
  0xf2   : > { %v571_v62 = vpop.f32.mrf.mxu0  ;;  %v1114_v0 = vpop.f32.mrf.mxu1 }
  0xf3   : > { %v583_v6 = vadd.f32 %v571_v62, %v501_v2 }
  0xf4   : > { %v1107_v1 = vpop.f32.mrf.mxu0  ;;  %v795_v22 = vpop.f32.mrf.mxu1 }
  0xf5   : > { %v739_v7 = vadd.f32 %v1107_v1, %v663_v3  ;;  %v662_v13 = vadd.f32 %v650_v52, %v583_v6 }
  0xf6   : > { %v723_v4 = vpop.f32.mrf.mxu0 }
  0xf7   : > { %v737_v9 = vadd.f32 %v723_v4, %v661_v5  ;;  %v808_v14 = vadd.f32 %v1113_v56, %v739_v7 }
  0xf8   : > { %v1108_v8 = vpop.f32.mrf.mxu0 }
  0xf9   : > { %v806_v17 = vadd.f32 %v792_v61, %v737_v9 }
  0xfa   : > { %v726_v11 = vpop.f32.mrf.mxu0 }
  0xfb   : > { %v738_v18 = vadd.f32 %v726_v11, %v662_v13 }
  0xfc   : > { %v1119_v15 = vpop.f32.mrf.mxu0 }
  0xfd   : > { %v875_v10 = vadd.f32 %v1119_v15, %v808_v14  ;;  %v807_v24 = vadd.f32 %v795_v22, %v738_v18 }
  0xfe   : > { %v859_v19 = vpop.f32.mrf.mxu0 }
  0xff   : > { %v885_v20 = vadd.f32 %v1031_v16, %v875_v10  ;;  %v873_v21 = vadd.f32 %v859_v19, %v806_v17 }
 0x100   : > { %v1120_v23 = vpop.f32.mrf.mxu0 }
 0x101   : > { %v888_v25 = vmax.f32 %v885_v20, 0.0  ;;  %v883_v26 = vadd.f32 %v1031_v16, %v873_v21 }
 0x102   : > { %v862_v27 = vpop.f32.mrf.mxu0 }
 0x103   : > { %v1039_v28 = vpack.c.bf16 %v888_v25, %v888_v25  ;;  %v886_v30 = vmax.f32 %v883_v26, 0.0  ;;  %v874_v31 = vadd.f32 %v862_v27, %v807_v24 }
 0x105   : > { %906 = vst.msk [vmem:[%s192_s20 + $0x8] sm:$0x3] %vm905_vm7, %v1039_v28  ;;  %v1037_v32 = vpack.c.bf16 %v886_v30, %v886_v30  ;;  %v884_v33 = vadd.f32 %v1031_v16, %v874_v31 }
 0x107   : > { %903 = vst.msk [vmem:[%s192_s20] sm:$0xf] %vm902_vm8, %v1037_v32  ;;  %v887_v12 = vmax.f32 %v884_v33, 0.0 }
 0x109   : > { %v1038_v34 = vpack.c.bf16 %v887_v12, %v887_v12 }
 0x10b   : > { %904 = vst.msk [vmem:[%s192_s20 + $0x4] sm:$0xf] %vm902_vm8, %v1038_v34 }
 0x10c PF: > { %s13_s14 = sadd.s32 1, %s1188_s14   ;;  %s1369_s12 = smov %s1184_s13 }
 0x10d   : > { %p10_p5 = scmp.ge.s32.totalorder %s13_s14, 4   ;;  %s1370_s13 = smov %s1372_s15 }
 0x10f   :  { %12 = sbr.rel (!%p10_p5) target bundleno = 2 (0x2), region = 70 }

// kernel: vae_forward.10
= control target key start
LH: loop header
LB: loop body
LE: loop exit
PB: predicated region body
PF: predicated region fallthrough
CT: control target
= control target key end

     0   :  { %s1020_s12 = smov 0   ;;  %s1022_s13 = smov 0   ;;  %s1123_s0 = inlined_call_operand.vmem [shape: bf16[2,44,16], index: 0, kind: input, shape index: {}]   ;;  %s1124_s1 = inlined_call_operand.vmem [shape: bf16[9,16,32], index: 1, kind: input, shape index: {}]   ;;  %s1125_s2 = inlined_call_operand.vmem [shape: f32[1,32], index: 2, kind: input, shape index: {}]   ;;  %s1126_s3 = inlined_call_operand.vmem [shape: bf16[2,6,32], index: 3, kind: output, shape index: {}]  }
   0x1   :  { %s1024_s14 = smov 0  }
   0x2 LB: > { %s25_s15 = sadd.s32 1, %s992_s13  ;;  %p812_p0 = scmp.ge.s32.totalorder %s996_s14, 1  ;;  %s996_s14 = sphi %s1024_s14, %s13_s14   ;;  %s992_s13 = sphi %s1022_s13, %s1128_s13   ;;  %s988_s12 = sphi %s1020_s12, %s1127_s12  }
   0x3   : > { %p27_p1 = scmp.ge.s32.totalorder %s25_s15, 2  ;;  %p151_p2 = scmp.lt.s32.totalorder %s996_s14, 3 }
   0x5   : > { %s1130_s15 = smov (%p27_p1, %s25_s15), 0  ;;  %p152_p3 = pnand %p812_p0, %p151_p2 }
   0x6   : > { %p177_p4 = scmp.lt.s32.totalorder (!%p152_p3), %s988_s12, 1 }
   0x7   : > { %155 = sbr.rel (%p152_p3) target bundleno = 259 (0x103), region = 32 }
   0xc   : > { %v958_v0 = vld [vmem:[%s1124_s1 + $0x8] sm:$0xff]   ;;  %v998_v1 = vmov 0.0   ;;  %v959_v2 = vld [vmem:[%s1124_s1] sm:$0xff]   ;;  %vm999_vm0 = vmmov 0   ;;  %s1132_s12 = smov (!%p177_p4, %s988_s12), 1  ;;  %vm220_vm1 = vcmask 130048  }
   0xd   : > { %877 = vmatprep.subr.bf16.mxu0 %v998_v1  ;;  %883 = vmatprep.subr.bf16.mxu1 %v998_v1  ;;  %s931_s20 = smul.u32 24, %s1132_s12  ;;  %v964_v3 = vld [vmem:[%s1124_s1 + $0x18] sm:$0xff]   ;;  %v963_v16 = vld [vmem:[%s1124_s1 + $0x10] sm:$0xff]   ;;  %v967_v22 = vld [vmem:[%s1124_s1 + $0x28] sm:$0xff]   ;;  %s814_s17 = sshll.u32 %s1132_s12, 2  ;;  %vm735_vm2 = vcmask 256000  }
   0xe   : > { %878 = vmatpush3.bf16.msra.mxu0 %v958_v0  ;;  %879 = vmatprep.mubr.msk.bf16.mxu0 %vm999_vm0, %v998_v1  ;;  %v966_v31 = vld [vmem:[%s1124_s1 + $0x20] sm:$0xff]   ;;  %v971_v33 = vld [vmem:[%s1124_s1 + $0x38] sm:$0xff]   ;;  %v970_v41 = vld [vmem:[%s1124_s1 + $0x30] sm:$0xff]  }
   0xf   : > { %884 = vmatpush3.bf16.msra.mxu1 %v959_v2  ;;  %885 = vmatprep.mubr.msk.bf16.mxu1 %vm999_vm0, %v998_v1  ;;  %s181_s23 = scalar_lea.vmem %s1123_s0, %s931_s20  ;;  %v973_v46 = vld [vmem:[%s1124_s1 + $0x40] sm:$0xff]   ;;  %s188_s20 = scalar_lea.vmem %s1126_s3, %s814_s17 }
  0x10   : > { %889 = vmatprep.subr.bf16.mxu0 %v998_v1  ;;  %895 = vmatprep.subr.bf16.mxu1 %v998_v1  ;;  %v191_v4 = vld [vmem:[%s181_s23 + $0x4] sm:$0xf]  ;;  %v190_v5 = vld [vmem:[%s181_s23] sm:$0xf]  ;;  %v192_v6 = vld [vmem:[%s181_s23 + $0x8] sm:$0xf] }
  0x11   : > { %v816_v7 = vcombine.low %v191_v4, %v191_v4  ;;  %v815_v8 = vcombine.low %v190_v5, %v190_v5  ;;  %v193_v9 = vld [vmem:[%s181_s23 + $0xc] sm:$0xf]  ;;  %v827_v12 = vcombine.low %v192_v6, %v192_v6  ;;  %v194_v17 = vld [vmem:[%s181_s23 + $0x10] sm:$0x1]  ;;  %v842_v34 = vcombine.low %v190_v5, %v191_v4 }
  0x12   : > { %v837_v13 = vcombine.low %v192_v6, %v193_v9  ;;  %v832_v25 = vcombine.low %v193_v9, %v194_v17  ;;  %v847_v37 = vcombine.low %v191_v4, %v192_v6 }
  0x13   : > { %v208_v10 = vshrl.u32 %v816_v7, 16  ;;  %v210_v11 = vshll.u32 %v816_v7, 16  ;;  %886 = vmatmul.mubr.msk.bf16.vlgmr.msra.gmra.mxu1 %vm220_vm1, %v815_v8  ;;  %v318_v15 = vshll.u32 %v815_v8, 16  ;;  %v377_v19 = vrot.slane %v827_v12, 1 }
  0x14   : > { %896 = vmatpush3.bf16.msra.mxu1 %v964_v3  ;;  %897 = vmatprep.mubr.msk.bf16.mxu1 %vm999_vm0, %v998_v1  ;;  %v495_v20 = vshrl.u32 %v837_v13, 16  ;;  %v498_v21 = vshll.u32 %v837_v13, 16  ;;  %v316_v23 = vshrl.u32 %v815_v8, 16  ;;  %v433_v29 = vshrl.u32 %v832_v25, 16 }
  0x15   : > { %v212_v14 = vrot.slane %v210_v11, 1  ;;  %907 = vmatprep.subr.bf16.mxu1 %v998_v1  ;;  %v320_v24 = vrot.slane %v318_v15, 1  ;;  %v436_v30 = vshll.u32 %v832_v25, 16  ;;  %v557_v38 = vshrl.u32 %v842_v34, 16 }
  0x16   : > { %v497_v26 = vrot.slane %v495_v20, 1  ;;  %v500_v27 = vrot.slane %v498_v21, 2  ;;  %v435_v35 = vrot.slane %v433_v29, 1  ;;  %v560_v39 = vshll.u32 %v842_v34, 16 }
  0x17   : > { %v213_v18 = vor.u32 %v212_v14, %v208_v10  ;;  %v321_v28 = vor.u32 %v320_v24, %v316_v23  ;;  %v438_v36 = vrot.slane %v436_v30, 2  ;;  %v619_v42 = vrot.slane %v847_v37, 2  ;;  %v856_v24 = vld [vmem:[%s1125_s2] ss:$0 sm:$0xff] }
  0x18   : > { %v501_v32 = vor.u32 %v500_v27, %v497_v26  ;;  %v559_v43 = vrot.slane %v557_v38, 1  ;;  %v562_v44 = vrot.slane %v560_v39, 2  ;;  %v674_v47 = vrot.slane %v842_v34, 2 }
  0x19   : > { %880 = vmatmul.mubr.msk.bf16.vlgmr.msra.gmra.mxu0 %vm220_vm1, %v213_v18  ;;  %v439_v40 = vor.u32 %v438_v36, %v435_v35 }
  0x1a   : > { %890 = vmatpush3.bf16.msra.mxu0 %v963_v16  ;;  %891 = vmatprep.mubr.msk.bf16.mxu0 %vm999_vm0, %v998_v1  ;;  %v563_v45 = vor.u32 %v562_v44, %v559_v43 }
  0x1b   : > { %901 = vmatprep.subr.bf16.mxu0 %v998_v1  ;;  %898 = vmatmul.mubr.msk.bf16.vlgmr.msra.gmra.mxu1 %vm220_vm1, %v377_v19 }
  0x1c   : > { %908 = vmatpush3.bf16.msra.mxu1 %v967_v22  ;;  %909 = vmatprep.mubr.msk.bf16.mxu1 %vm999_vm0, %v998_v1 }
  0x1d   : > { %919 = vmatprep.subr.bf16.mxu1 %v998_v1 }
  0x21   : > { %892 = vmatmul.mubr.msk.bf16.vlgmr.msra.gmra.mxu0 %vm220_vm1, %v321_v28 }
  0x22   : > { %902 = vmatpush3.bf16.msra.mxu0 %v966_v31  ;;  %903 = vmatprep.mubr.msk.bf16.mxu0 %vm999_vm0, %v998_v1 }
  0x23   : > { %913 = vmatprep.subr.bf16.mxu0 %v998_v1  ;;  %910 = vmatmul.mubr.msk.bf16.vlgmr.msra.gmra.mxu1 %vm220_vm1, %v501_v32 }
  0x24   : > { %920 = vmatpush3.bf16.msra.mxu1 %v971_v33  ;;  %921 = vmatprep.mubr.msk.bf16.mxu1 %vm999_vm0, %v998_v1 }
  0x29   : > { %904 = vmatmul.mubr.msk.bf16.vlgmr.msra.gmra.mxu0 %vm220_vm1, %v439_v40 }
  0x2a   : > { %914 = vmatpush3.bf16.msra.mxu0 %v970_v41  ;;  %915 = vmatprep.mubr.msk.bf16.mxu0 %vm999_vm0, %v998_v1 }
  0x2b   : > { %925 = vmatprep.subr.bf16.mxu0 %v998_v1  ;;  %922 = vmatmul.mubr.msk.bf16.vlgmr.msra.gmra.mxu1 %vm220_vm1, %v619_v42 }
  0x31   : > { %916 = vmatmul.mubr.msk.bf16.vlgmr.msra.gmra.mxu0 %vm220_vm1, %v563_v45 }
  0x32   : > { %926 = vmatpush3.bf16.msra.mxu0 %v973_v46  ;;  %927 = vmatprep.mubr.msk.bf16.mxu0 %vm999_vm0, %v998_v1 }
  0x39   : > { %928 = vmatmul.mubr.msk.bf16.vlgmr.msra.gmra.mxu0 %vm220_vm1, %v674_v47 }
  0xd3   : > { %v307_v48 = vpop.f32.mrf.mxu1 }
  0xd5   : > { %v887_v49 = vpop.f32.mrf.mxu1 }
  0xd7   : > { %v310_v50 = vpop.f32.mrf.mxu1 }
  0xd9   : > { %v258_v51 = vpop.f32.mrf.mxu0  ;;  %v888_v52 = vpop.f32.mrf.mxu1 }
  0xda   : > { %v308_v1 = vadd.f32 %v307_v48, %v258_v51 }
  0xdb   : > { %v881_v53 = vpop.f32.mrf.mxu0  ;;  %v421_v54 = vpop.f32.mrf.mxu1 }
  0xdd   : > { %v261_v55 = vpop.f32.mrf.mxu0  ;;  %v899_v56 = vpop.f32.mrf.mxu1 }
  0xdf   : > { %v882_v57 = vpop.f32.mrf.mxu0  ;;  %v424_v58 = vpop.f32.mrf.mxu1 }
  0xe1   : > { %v365_v59 = vpop.f32.mrf.mxu0  ;;  %v900_v60 = vpop.f32.mrf.mxu1 }
  0xe2   : > { %v371_v4 = vadd.f32 %v365_v59, %v308_v1 }
  0xe3   : > { %v893_v61 = vpop.f32.mrf.mxu0  ;;  %v545_v62 = vpop.f32.mrf.mxu1 }
  0xe4   : > { %v427_v9 = vadd.f32 %v421_v54, %v371_v4 }
  0xe5   : > { %v368_v63 = vpop.f32.mrf.mxu0  ;;  %v911_v0 = vpop.f32.mrf.mxu1 }
  0xe7   : > { %v894_v2 = vpop.f32.mrf.mxu0  ;;  %v548_v3 = vpop.f32.mrf.mxu1 }
  0xe9   : > { %v483_v5 = vpop.f32.mrf.mxu0  ;;  %v912_v6 = vpop.f32.mrf.mxu1 }
  0xea   : > { %v489_v12 = vadd.f32 %v483_v5, %v427_v9 }
  0xeb   : > { %v905_v7 = vpop.f32.mrf.mxu0  ;;  %v663_v8 = vpop.f32.mrf.mxu1 }
  0xec   : > { %v551_v17 = vadd.f32 %v545_v62, %v489_v12 }
  0xed   : > { %v486_v10 = vpop.f32.mrf.mxu0  ;;  %v923_v11 = vpop.f32.mrf.mxu1 }
  0xef   : > { %v906_v13 = vpop.f32.mrf.mxu0  ;;  %v666_v14 = vpop.f32.mrf.mxu1 }
  0xf1   : > { %v607_v15 = vpop.f32.mrf.mxu0  ;;  %v924_v16 = vpop.f32.mrf.mxu1 }
  0xf2   : > { %v613_v19 = vadd.f32 %v607_v15, %v551_v17 }
  0xf3   : > { %v917_v18 = vpop.f32.mrf.mxu0 }
  0xf4   : > { %v669_v22 = vadd.f32 %v663_v8, %v613_v19 }
  0xf5   : > { %v610_v20 = vpop.f32.mrf.mxu0 }
  0xf7   : > { %v918_v21 = vpop.f32.mrf.mxu0 }
  0xf9   : > { %v718_v23 = vpop.f32.mrf.mxu0 }
  0xfa   : > { %v724_v25 = vadd.f32 %v718_v23, %v669_v22 }
  0xfb   : > { %v929_v26 = vpop.f32.mrf.mxu0 }
  0xfc   : > { %v732_v27 = vadd.f32 %v856_v24, %v724_v25 }
  0xfd   : > { %v721_v28 = vpop.f32.mrf.mxu0 }
  0xfe   : > { %v733_v29 = vmax.f32 %v732_v27, 0.0 }
  0xff   : > { %v930_v30 = vpop.f32.mrf.mxu0 }
 0x100   : > { %v734_v31 = vpack.c.bf16 %v733_v29, %v733_v29 }
 0x102   : > { %736 = vst.msk [vmem:[%s188_s20] sm:$0x7] %vm735_vm2, %v734_v31 }
 0x103 PF: > { %s13_s14 = sadd.s32 1, %s996_s14   ;;  %s1127_s12 = smov %s992_s13 }
 0x104   : > { %p10_p5 = scmp.ge.s32.totalorder %s13_s14, 4   ;;  %s1128_s13 = smov %s1130_s15 }
 0x106   :  { %12 = sbr.rel (!%p10_p5) target bundleno = 2 (0x2), region = 70 }

// kernel: vae_forward.11
= control target key start
LH: loop header
LB: loop body
LE: loop exit
PB: predicated region body
PF: predicated region fallthrough
CT: control target
= control target key end

     0   :  { %16 = vsyncpa [#allocation3], 0  ;;  %v515_v1 = vmov 0.0   ;;  %vm516_vm0 = vmmov 0   ;;  %s652_s0 = inlined_call_operand.vmem [shape: bf16[2,128], index: 0, kind: input, shape index: {}]   ;;  %s653_s1 = inlined_call_operand.vmem [shape: bf16[128,16], index: 1, kind: input, shape index: {}]   ;;  %s654_s2 = inlined_call_operand.vmem [shape: f32[1,16], index: 2, kind: input, shape index: {}]   ;;  %s655_s3 = inlined_call_operand.vmem [shape: bf16[128,16], index: 3, kind: input, shape index: {}]   ;;  %s656_s4 = inlined_call_operand.vmem [shape: f32[1,16], index: 4, kind: input, shape index: {}]   ;;  %s657_s5 = inlined_call_operand.vmem [shape: f32[2,16], index: 5, kind: input, shape index: {}]   ;;  %s658_s6 = inlined_call_operand.vmem [shape: bf16[16,128], index: 6, kind: input, shape index: {}]   ;;  %s659_s7 = inlined_call_operand.vmem [shape: f32[1,128], index: 7, kind: input, shape index: {}]   ;;  %s660_s8 = inlined_call_operand.hbm [shape: f32[2,16], index: 8, kind: output, shape index: {0}]   ;;  %s661_s9 = inlined_call_operand.hbm [shape: f32[2,16], index: 9, kind: output, shape index: {1}]   ;;  %s662_s10 = inlined_call_operand.vmem [shape: bf16[2,128], index: 10, kind: output, shape index: {2}]  }
   0x1   :  { %v452_v0 = vld [vmem:[%s655_s3 + $0x38] sm:$0xff]   ;;  %422 = vmatprep.subr.bf16.mxu1 %v515_v1  ;;  %402 = vmatprep.subr.bf16.mxu0 %v515_v1  ;;  %v453_v2 = vld [vmem:[%s655_s3 + $0x30] sm:$0xff]   ;;  %v454_v4 = vld [vmem:[%s655_s3 + $0x28] sm:$0xff]  }
   0x2   :  { %423 = vmatpush3.bf16.msra.mxu1 %v452_v0  ;;  %438 = vmatprep.mubr.msk.bf16.mxu1 %vm516_vm0, %v515_v1  ;;  %v456_v3 = vld [vmem:[%s653_s1 + $0x38] sm:$0xff]   ;;  %v458_v5 = vld [vmem:[%s653_s1 + $0x30] sm:$0xff]   ;;  %v455_v6 = vld [vmem:[%s655_s3 + $0x20] sm:$0xff]  }
   0x3   :  { %424 = vmatprep.subr.bf16.mxu1 %v515_v1  ;;  %418 = vmatprep.mubr.msk.bf16.mxu0 %vm516_vm0, %v515_v1  ;;  %v460_v7 = vld [vmem:[%s653_s1 + $0x28] sm:$0xff]   ;;  %v457_v8 = vld [vmem:[%s655_s3 + $0x18] sm:$0xff]   ;;  %v462_v9 = vld [vmem:[%s653_s1 + $0x20] sm:$0xff]  }
   0x4   :  { %403 = vmatpush3.bf16.msra.mxu0 %v456_v3 }
   0x5   :  { %404 = vmatprep.subr.bf16.mxu0 %v515_v1 }
   0x6   :  { %425 = vmatpush3.bf16.msra.mxu1 %v453_v2 }
   0x7   :  { %426 = vmatprep.subr.bf16.mxu1 %v515_v1 }
   0x8   :  { %405 = vmatpush3.bf16.msra.mxu0 %v458_v5 }
   0x9   :  { %406 = vmatprep.subr.bf16.mxu0 %v515_v1 }
   0xa   :  { %427 = vmatpush3.bf16.msra.mxu1 %v454_v4 }
   0xb   :  { %428 = vmatprep.subr.bf16.mxu1 %v515_v1 }
   0xc   :  { %407 = vmatpush3.bf16.msra.mxu0 %v460_v7 }
   0xd   :  { %408 = vmatprep.subr.bf16.mxu0 %v515_v1 }
   0xe   :  { %429 = vmatpush3.bf16.msra.mxu1 %v455_v6 }
   0xf   :  { %430 = vmatprep.subr.bf16.mxu1 %v515_v1 }
  0x10   :  { %17 = vsyncpa [#allocation5], 0  ;;  %v459_v10 = vld [vmem:[%s655_s3 + $0x10] sm:$0xff]   ;;  %409 = vmatpush3.bf16.msra.mxu0 %v462_v9  ;;  %v464_v11 = vld [vmem:[%s653_s1 + $0x18] sm:$0xff]   ;;  %vm324_vm1 = vcmask 123904   ;;  %vm280_vm2 = vcmask 130048  }
  0x11   :  { %410 = vmatprep.subr.bf16.mxu0 %v515_v1  ;;  %v461_v12 = vld [vmem:[%s655_s3 + $0x8] sm:$0xff]   ;;  %v465_v13 = vld [vmem:[%s653_s1 + $0x10] sm:$0xff]   ;;  %v463_v14 = vld [vmem:[%s655_s3] sm:$0xff]   ;;  %s518_s11 = smov [#allocation4]  }
  0x12   :  { %431 = vmatpush3.bf16.msra.mxu1 %v457_v8  ;;  %v466_v15 = vld [vmem:[%s653_s1 + $0x8] sm:$0xff]   ;;  %v35_v16 = vld [vmem:[%s652_s0] sm:$0x1]  ;;  %s345_s12 = sshll.u32 %s518_s11, 4  ;;  %s346_s12 = int_to_ptr.vmem [resolvable:$true] %s345_s12 }
  0x13   :  { %432 = vmatprep.subr.bf16.mxu1 %v515_v1  ;;  %v467_v17 = vld [vmem:[%s653_s1] sm:$0xff]  }
  0x14   :  { %411 = vmatpush3.bf16.msra.mxu0 %v464_v11  ;;  %v468_v18 = vld [vmem:[%s658_s6] sm:$0xff]  }
  0x15   :  { %412 = vmatprep.subr.bf16.mxu0 %v515_v1  ;;  %v370_v19 = vld [vmem:[%s656_s4] ss:$0 sm:$0xff] }
  0x16   :  { %433 = vmatpush3.bf16.msra.mxu1 %v459_v10  ;;  %v361_v23 = vld [vmem:[%s654_s2] ss:$0 sm:$0xff]  ;;  %s517_s2 = smov [#allocation2]  }
  0x17   :  { %434 = vmatprep.subr.bf16.mxu1 %v515_v1  ;;  %v258_v33 = vld [vmem:[%s657_s5] sm:$0x3]  ;;  %s335_s30 = sshll.u32 %s517_s2, 4  ;;  %s336_s30 = int_to_ptr.vmem [resolvable:$true] %s335_s30 }
  0x18   :  { %413 = vmatpush3.bf16.msra.mxu0 %v465_v13  ;;  %s471_s13 = scalar_lea.vmem %s336_s30, 32  ;;  %p476_p1 = scmp.lt.s32.totalorder %s336_s30, %s336_s30 }
  0x19   :  { %414 = vmatprep.subr.bf16.mxu0 %v515_v1  ;;  %p472_p0 = scmp.ne.s32.totalorder %s336_s30, %s471_s13  ;;  %p477_p2 = scmp.lt.s32.totalorder %s471_s13, %s471_s13 }
  0x1a   :  { %435 = vmatpush3.bf16.msra.mxu1 %v461_v12 }
  0x1b   :  { %436 = vmatprep.subr.bf16.mxu1 %v515_v1  ;;  %p478_p3 = por %p477_p2, %p476_p1 }
  0x1c   :  { %415 = vmatpush3.bf16.msra.mxu0 %v466_v15 }
  0x1d   :  { %416 = vmatprep.subr.bf16.mxu0 %v515_v1  ;;  %p479_p4 = pnand %p478_p3, %p472_p0 }
  0x1e   :  { %437 = vmatpush3.bf16.msra.mxu1 %v463_v14 }
  0x20   :  { %417 = vmatpush3.bf16.msra.mxu0 %v467_v17 }
  0x21   :  { %439 = vmatmul.mubr.bf16.vlgmr.msra.gmra.mxu1 %v35_v16  ;;  %442 = vmatprep.subr.bf16.mxu0 %v515_v1 }
  0x23   :  { %419 = vmatmul.mubr.bf16.vlgmr.msra.gmra.mxu0 %v35_v16 }
  0x24   :  { %444 = vmatprep.mubr.msk.bf16.mxu0 %vm516_vm0, %v515_v1  ;;  %443 = vmatpush3.bf16.msra.mxu0 %v468_v18 }
  0xe1   :  { %v252_v20 = vpop.f32.mrf.mxu1 }
  0xe2   :  { %v253_v21 = vadd.f32 %v370_v19, %v252_v20 }
  0xe3   :  { %v440_v22 = vpop.f32.mrf.mxu1  ;;  %v141_v26 = vpop.f32.mrf.mxu0 }
  0xe4   :  { %v259_v24 = vmul.f32 0.5, %v253_v21  ;;  %326 = vst.msk [vmem:[#allocation4] sm:$0x3] %vm324_vm1, %v253_v21  ;;  %v142_v28 = vadd.f32 %v361_v23, %v141_v26 }
  0xe5   :  { %v255_v25 = vpop.f32.mrf.mxu1  ;;  %v420_v30 = vpop.f32.mrf.mxu0 }
  0xe6   :  { %v260_v27 = vmul.f32 1.442695, %v259_v24  ;;  %325 = vst.msk [vmem:[#allocation2] sm:$0x3] %vm324_vm1, %v142_v28 }
  0xe7   :  { %v441_v29 = vpop.f32.mrf.mxu1  ;;  %v144_v31 = vpop.f32.mrf.mxu0 }
  0xe8   :  { %469 = vpow2.f32 %v260_v27 }
  0xe9   :  { %v421_v32 = vpop.f32.mrf.mxu0 }
  0xf5   :  { %v470_v34 = vpop.eup %469 }
  0xf6   :  { %v262_v35 = vmul.f32 %v470_v34, %v258_v33 }
  0xf8   :  { %v263_v36 = vadd.f32 %v262_v35, %v142_v28 }
  0xfa   :  { %v264_v37 = vpack.c.bf16 %v263_v36, %v263_v36 }
  0xfc   :  { %445 = vmatmul.mubr.msk.bf16.vlgmr.msra.gmra.mxu0 %vm280_vm2, %v264_v37 }
  0xfd   :  { %482 = shalt.err (!%p479_p4)
}
  0xfe   :  { %338 = dma.vmem_to_hbm [thread:$0]  %s336_s30, 32, %s660_s8, [#allocation3]  }
  0xff   :  { %s491_s15 = scalar_lea.vmem %s346_s12, 32  ;;  %p496_p6 = scmp.lt.s32.totalorder %s346_s12, %s346_s12 }
 0x100   :  { %p492_p5 = scmp.ne.s32.totalorder %s346_s12, %s491_s15  ;;  %p497_p7 = scmp.lt.s32.totalorder %s491_s15, %s491_s15 }
 0x102   :  { %p498_p8 = por %p497_p7, %p496_p6 }
 0x104   :  { %p499_p9 = pnand %p498_p8, %p492_p5 }
 0x106   :  { %502 = shalt.err (!%p499_p9)
}
 0x107   :  { %348 = dma.vmem_to_hbm [thread:$0]  %s346_s12, 32, %s661_s9, [#allocation5]   ;;  %v379_v38 = vld [vmem:[%s659_s7] ss:$0 sm:$0xff] }
 0x1bc   :  { %v318_v39 = vpop.f32.mrf.mxu0 }
 0x1bd   :  { %v319_v40 = vadd.f32 %v379_v38, %v318_v39 }
 0x1be   :  { %v446_v41 = vpop.f32.mrf.mxu0 }
 0x1bf   :  { %v327_v42 = vpack.c.bf16 %v319_v40, %v319_v40 }
 0x1c0   :  { %v321_v43 = vpop.f32.mrf.mxu0 }
 0x1c1   :  { %328 = vst [vmem:[%s662_s10] sm:$0x1] %v327_v42 }
 0x1c2   :  { %v447_v44 = vpop.f32.mrf.mxu0 }
 0x1c3   :  { %511 = dma.done.wait [#allocation3], 32  }
 0x1c4   :  { %512 = vsyncadd [#allocation3], 4294967264 }
 0x1c5   :  { %513 = dma.done.wait [#allocation5], 32  }
 0x1c6   :  { %514 = vsyncadd [#allocation5], 4294967264 }
 0x1c7   :  { %359 = vsyncpa [#allocation3], 1 }
 0x1c8   :  { %360 = vsyncpa [#allocation5], 1 }

// kernel: vae_forward.12
= control target key start
LH: loop header
LB: loop body
LE: loop exit
PB: predicated region body
PF: predicated region fallthrough
CT: control target
= control target key end

     0   :  { %s1090_s12 = smov 0   ;;  %s1092_s13 = smov 0   ;;  %s1237_s0 = inlined_call_operand.vmem [shape: bf16[2,17,32], index: 0, kind: input, shape index: {}]   ;;  %s1238_s1 = inlined_call_operand.vmem [shape: bf16[9,32,64], index: 1, kind: input, shape index: {}]   ;;  %s1239_s2 = inlined_call_operand.vmem [shape: f32[1,64], index: 2, kind: input, shape index: {}]   ;;  %s1240_s3 = inlined_call_operand.vmem [shape: bf16[2,6,64], index: 3, kind: output, shape index: {}]  }
   0x1   :  { %s1094_s14 = smov 0  }
   0x2 LB: > { %s25_s15 = sadd.s32 1, %s1062_s13  ;;  %p831_p0 = scmp.ge.s32.totalorder %s1066_s14, 1  ;;  %s1066_s14 = sphi %s1094_s14, %s13_s14   ;;  %s1062_s13 = sphi %s1092_s13, %s1242_s13   ;;  %s1058_s12 = sphi %s1090_s12, %s1241_s12  }
   0x3   : > { %p27_p1 = scmp.ge.s32.totalorder %s25_s15, 2  ;;  %p151_p2 = scmp.lt.s32.totalorder %s1066_s14, 3 }
   0x5   : > { %s1244_s15 = smov (%p27_p1, %s25_s15), 0  ;;  %p152_p3 = pnand %p831_p0, %p151_p2 }
   0x6   : > { %p177_p4 = scmp.lt.s32.totalorder (!%p152_p3), %s1058_s12, 1 }
   0x7   : > { %155 = sbr.rel (%p152_p3) target bundleno = 259 (0x103), region = 32 }
   0xc   : > { %v1024_v0 = vld [vmem:[%s1238_s1 + $0x18] sm:$0xff]   ;;  %v1068_v1 = vmov 0.0   ;;  %v1025_v2 = vld [vmem:[%s1238_s1 + $0x8] sm:$0xff]   ;;  %v1026_v3 = vld [vmem:[%s1238_s1 + $0x10] sm:$0xff]   ;;  %vm1069_vm0 = vmmov 0   ;;  %s1246_s12 = smov (!%p177_p4, %s1058_s12), 1 }
   0xd   : > { %925 = vmatprep.subr.bf16.mxu0 %v1068_v1  ;;  %933 = vmatprep.subr.bf16.mxu1 %v1068_v1  ;;  %v1027_v4 = vld [vmem:[%s1238_s1] sm:$0xff]   ;;  %s997_s24 = smul.u32 12, %s1246_s12  ;;  %vm224_vm1 = vcmask 261120   ;;  %v1031_v9 = vld [vmem:[%s1238_s1 + $0x38] sm:$0xff]   ;;  %v1030_v16 = vld [vmem:[%s1238_s1 + $0x28] sm:$0xff]   ;;  %s833_s8 = sshll.u32 %s1246_s12, 2 }
   0xe   : > { %926 = vmatpush3.bf16.msra.mxu0 %v1024_v0  ;;  %929 = vmatprep.mubr.msk.bf16.mxu0 %vm1069_vm0, %v1068_v1  ;;  %v1033_v18 = vld [vmem:[%s1238_s1 + $0x30] sm:$0xff]   ;;  %v1032_v22 = vld [vmem:[%s1238_s1 + $0x20] sm:$0xff]   ;;  %v1035_v23 = vld [vmem:[%s1238_s1 + $0x58] sm:$0xff]   ;;  %s188_s11 = scalar_lea.vmem %s1240_s3, %s833_s8  ;;  %vm754_vm2 = vcmask 518144  }
   0xf   : > { %934 = vmatpush3.bf16.msra.mxu1 %v1025_v2  ;;  %927 = vmatprep.subr.bf16.mxu0 %v1068_v1  ;;  %s181_s27 = scalar_lea.vmem %s1237_s0, %s997_s24  ;;  %v1034_v24 = vld [vmem:[%s1238_s1 + $0x48] sm:$0xff]   ;;  %v1037_v25 = vld [vmem:[%s1238_s1 + $0x50] sm:$0xff]   ;;  %v1036_v26 = vld [vmem:[%s1238_s1 + $0x40] sm:$0xff]  }
  0x10   : > { %935 = vmatprep.subr.bf16.mxu1 %v1068_v1  ;;  %937 = vmatprep.mubr.msk.bf16.mxu1 %vm1069_vm0, %v1068_v1  ;;  %v190_v5 = vld [vmem:[%s181_s27] sm:$0xf]  ;;  %v191_v6 = vld [vmem:[%s181_s27 + $0x4] sm:$0x1]  ;;  %v1039_v27 = vld [vmem:[%s1238_s1 + $0x78] sm:$0xff]  }
  0x11   : > { %v834_v7 = vcombine.low %v190_v5, %v191_v6  ;;  %v1136_v8 = vcombine.low %v190_v5, %v190_v5  ;;  %v1038_v28 = vld [vmem:[%s1238_s1 + $0x68] sm:$0xff]   ;;  %v1041_v29 = vld [vmem:[%s1238_s1 + $0x70] sm:$0xff]   ;;  %v1040_v30 = vld [vmem:[%s1238_s1 + $0x60] sm:$0xff]  }
  0x12   : > { %928 = vmatpush3.bf16.msra.mxu0 %v1026_v3  ;;  %v1042_v31 = vld [vmem:[%s1238_s1 + $0x88] sm:$0xff]   ;;  %v1043_v32 = vld [vmem:[%s1238_s1 + $0x80] sm:$0xff]  }
  0x13   : > { %936 = vmatpush3.bf16.msra.mxu1 %v1027_v4  ;;  %941 = vmatprep.subr.bf16.mxu0 %v1068_v1  ;;  %v205_v10 = vshrl.u32 %v834_v7, 16  ;;  %v208_v11 = vshll.u32 %v834_v7, 16  ;;  %v269_v12 = vrot.slane %v834_v7, 2  ;;  %v392_v13 = vshll.u32 %v1136_v8, 16 }
  0x14   : > { %949 = vmatprep.subr.bf16.mxu1 %v1068_v1  ;;  %v390_v17 = vshrl.u32 %v1136_v8, 16 }
  0x15   : > { %v207_v14 = vrot.slane %v205_v10, 1  ;;  %v210_v15 = vrot.slane %v208_v11, 2  ;;  %v394_v19 = vrot.slane %v392_v13, 1 }
  0x16   : > { %938 = vmatmul.mubr.msk.bf16.vlgmr.msra.gmra.mxu1 %vm224_vm1, %v269_v12 }
  0x17   : > { %950 = vmatpush3.bf16.msra.mxu1 %v1031_v9  ;;  %953 = vmatprep.mubr.msk.bf16.mxu1 %vm1069_vm0, %v1068_v1  ;;  %v211_v20 = vor.u32 %v210_v15, %v207_v14  ;;  %v395_v21 = vor.u32 %v394_v19, %v390_v17  ;;  %v895_v9 = vld [vmem:[%s1239_s2] ss:$0 sm:$0xff] }
  0x18   : > { %951 = vmatprep.subr.bf16.mxu1 %v1068_v1 }
  0x19   : > { %930 = vmatmul.mubr.msk.bf16.vlgmr.msra.gmra.mxu0 %vm224_vm1, %v211_v20 }
  0x1a   : > { %942 = vmatpush3.bf16.msra.mxu0 %v1030_v16  ;;  %945 = vmatprep.mubr.msk.bf16.mxu0 %vm1069_vm0, %v1068_v1 }
  0x1b   : > { %952 = vmatpush3.bf16.msra.mxu1 %v1033_v18  ;;  %943 = vmatprep.subr.bf16.mxu0 %v1068_v1 }
  0x1c   : > { %965 = vmatprep.subr.bf16.mxu1 %v1068_v1 }
  0x1e   : > { %954 = vmatmul.mubr.msk.bf16.vlgmr.msra.gmra.mxu1 %vm224_vm1, %v395_v21  ;;  %944 = vmatpush3.bf16.msra.mxu0 %v1032_v22 }
  0x1f   : > { %966 = vmatpush3.bf16.msra.mxu1 %v1035_v23  ;;  %957 = vmatprep.subr.bf16.mxu0 %v1068_v1 }
  0x20   : > { %967 = vmatprep.subr.bf16.mxu1 %v1068_v1  ;;  %969 = vmatprep.mubr.msk.bf16.mxu1 %vm1069_vm0, %v1068_v1 }
  0x21   : > { %946 = vmatmul.mubr.msk.bf16.vlgmr.msra.gmra.mxu0 %vm224_vm1, %v211_v20 }
  0x22   : > { %958 = vmatpush3.bf16.msra.mxu0 %v1034_v24  ;;  %961 = vmatprep.mubr.msk.bf16.mxu0 %vm1069_vm0, %v1068_v1 }
  0x23   : > { %968 = vmatpush3.bf16.msra.mxu1 %v1037_v25  ;;  %959 = vmatprep.subr.bf16.mxu0 %v1068_v1 }
  0x24   : > { %981 = vmatprep.subr.bf16.mxu1 %v1068_v1 }
  0x26   : > { %970 = vmatmul.mubr.msk.bf16.vlgmr.msra.gmra.mxu1 %vm224_vm1, %v1136_v8  ;;  %960 = vmatpush3.bf16.msra.mxu0 %v1036_v26 }
  0x27   : > { %982 = vmatpush3.bf16.msra.mxu1 %v1039_v27  ;;  %973 = vmatprep.subr.bf16.mxu0 %v1068_v1 }
  0x28   : > { %983 = vmatprep.subr.bf16.mxu1 %v1068_v1  ;;  %985 = vmatprep.mubr.msk.bf16.mxu1 %vm1069_vm0, %v1068_v1 }
  0x29   : > { %962 = vmatmul.mubr.msk.bf16.vlgmr.msra.gmra.mxu0 %vm224_vm1, %v1136_v8 }
  0x2a   : > { %974 = vmatpush3.bf16.msra.mxu0 %v1038_v28  ;;  %977 = vmatprep.mubr.msk.bf16.mxu0 %vm1069_vm0, %v1068_v1 }
  0x2b   : > { %984 = vmatpush3.bf16.msra.mxu1 %v1041_v29  ;;  %975 = vmatprep.subr.bf16.mxu0 %v1068_v1 }
  0x2e   : > { %986 = vmatmul.mubr.msk.bf16.vlgmr.msra.gmra.mxu1 %vm224_vm1, %v1136_v8  ;;  %976 = vmatpush3.bf16.msra.mxu0 %v1040_v30 }
  0x2f   : > { %989 = vmatprep.subr.bf16.mxu0 %v1068_v1 }
  0x31   : > { %978 = vmatmul.mubr.msk.bf16.vlgmr.msra.gmra.mxu0 %vm224_vm1, %v395_v21 }
  0x32   : > { %990 = vmatpush3.bf16.msra.mxu0 %v1042_v31  ;;  %993 = vmatprep.mubr.msk.bf16.mxu0 %vm1069_vm0, %v1068_v1 }
  0x33   : > { %991 = vmatprep.subr.bf16.mxu0 %v1068_v1 }
  0x36   : > { %992 = vmatpush3.bf16.msra.mxu0 %v1043_v32 }
  0x39   : > { %994 = vmatmul.mubr.msk.bf16.vlgmr.msra.gmra.mxu0 %vm224_vm1, %v1136_v8 }
  0xd6   : > { %v319_v33 = vpop.f32.mrf.mxu1 }
  0xd8   : > { %v939_v34 = vpop.f32.mrf.mxu1 }
  0xd9   : > { %v262_v35 = vpop.f32.mrf.mxu0 }
  0xda   : > { %v322_v36 = vpop.f32.mrf.mxu1  ;;  %v320_v49 = vadd.f32 %v319_v33, %v262_v35 }
  0xdb   : > { %v931_v37 = vpop.f32.mrf.mxu0 }
  0xdc   : > { %v940_v38 = vpop.f32.mrf.mxu1 }
  0xdd   : > { %v265_v39 = vpop.f32.mrf.mxu0 }
  0xde   : > { %v445_v40 = vpop.f32.mrf.mxu1 }
  0xdf   : > { %v932_v41 = vpop.f32.mrf.mxu0 }
  0xe0   : > { %v955_v42 = vpop.f32.mrf.mxu1 }
  0xe1   : > { %v376_v43 = vpop.f32.mrf.mxu0 }
  0xe2   : > { %v448_v44 = vpop.f32.mrf.mxu1  ;;  %v382_v52 = vadd.f32 %v376_v43, %v320_v49 }
  0xe3   : > { %v947_v45 = vpop.f32.mrf.mxu0 }
  0xe4   : > { %v956_v46 = vpop.f32.mrf.mxu1  ;;  %v451_v57 = vadd.f32 %v445_v40, %v382_v52 }
  0xe5   : > { %v379_v47 = vpop.f32.mrf.mxu0 }
  0xe6   : > { %v563_v48 = vpop.f32.mrf.mxu1 }
  0xe7   : > { %v948_v50 = vpop.f32.mrf.mxu0 }
  0xe8   : > { %v971_v51 = vpop.f32.mrf.mxu1 }
  0xe9   : > { %v505_v53 = vpop.f32.mrf.mxu0 }
  0xea   : > { %v566_v54 = vpop.f32.mrf.mxu1  ;;  %v511_v60 = vadd.f32 %v505_v53, %v451_v57 }
  0xeb   : > { %v963_v55 = vpop.f32.mrf.mxu0 }
  0xec   : > { %v972_v56 = vpop.f32.mrf.mxu1  ;;  %v569_v1 = vadd.f32 %v563_v48, %v511_v60 }
  0xed   : > { %v508_v58 = vpop.f32.mrf.mxu0 }
  0xee   : > { %v679_v59 = vpop.f32.mrf.mxu1 }
  0xef   : > { %v964_v61 = vpop.f32.mrf.mxu0 }
  0xf0   : > { %v987_v62 = vpop.f32.mrf.mxu1 }
  0xf1   : > { %v621_v63 = vpop.f32.mrf.mxu0 }
  0xf2   : > { %v682_v0 = vpop.f32.mrf.mxu1  ;;  %v627_v4 = vadd.f32 %v621_v63, %v569_v1 }
  0xf3   : > { %v979_v2 = vpop.f32.mrf.mxu0 }
  0xf4   : > { %v988_v3 = vpop.f32.mrf.mxu1  ;;  %v685_v7 = vadd.f32 %v679_v59, %v627_v4 }
  0xf5   : > { %v624_v5 = vpop.f32.mrf.mxu0 }
  0xf7   : > { %v980_v6 = vpop.f32.mrf.mxu0 }
  0xf9   : > { %v737_v8 = vpop.f32.mrf.mxu0 }
  0xfa   : > { %v743_v10 = vadd.f32 %v737_v8, %v685_v7 }
  0xfb   : > { %v995_v11 = vpop.f32.mrf.mxu0 }
  0xfc   : > { %v751_v12 = vadd.f32 %v895_v9, %v743_v10 }
  0xfd   : > { %v740_v13 = vpop.f32.mrf.mxu0 }
  0xfe   : > { %v752_v14 = vmax.f32 %v751_v12, 0.0 }
  0xff   : > { %v996_v15 = vpop.f32.mrf.mxu0 }
 0x100   : > { %v753_v16 = vpack.c.bf16 %v752_v14, %v752_v14 }
 0x102   : > { %755 = vst.msk [vmem:[%s188_s11] sm:$0x7] %vm754_vm2, %v753_v16 }
 0x103 PF: > { %s13_s14 = sadd.s32 1, %s1066_s14   ;;  %s1241_s12 = smov %s1062_s13 }
 0x104   : > { %p10_p5 = scmp.ge.s32.totalorder %s13_s14, 4   ;;  %s1242_s13 = smov %s1244_s15 }
 0x106   :  { %12 = sbr.rel (!%p10_p5) target bundleno = 2 (0x2), region = 70 }

// kernel: vae_forward.13
= control target key start
LH: loop header
LB: loop body
LE: loop exit
PB: predicated region body
PF: predicated region fallthrough
CT: control target
= control target key end

     0   :  { %s1134_s12 = smov 0   ;;  %s1136_s13 = smov 0   ;;  %s1220_s0 = inlined_call_operand.vmem [shape: bf16[2,33,16], index: 0, kind: input, shape index: {}]   ;;  %s1221_s1 = inlined_call_operand.vmem [shape: bf16[9,16,32], index: 1, kind: input, shape index: {}]   ;;  %s1222_s2 = inlined_call_operand.vmem [shape: f32[1,32], index: 2, kind: input, shape index: {}]   ;;  %s1223_s3 = inlined_call_operand.vmem [shape: bf16[2,20,32], index: 3, kind: output, shape index: {}]  }
   0x1   :  { %s1138_s14 = smov 0  }
   0x2 LB: > { %s25_s15 = sadd.s32 1, %s1108_s13  ;;  %p913_p0 = scmp.ge.s32.totalorder %s1112_s14, 1  ;;  %s1112_s14 = sphi %s1138_s14, %s13_s14   ;;  %s1108_s13 = sphi %s1136_s13, %s1225_s13   ;;  %s1104_s12 = sphi %s1134_s12, %s1224_s12  }
   0x3   : > { %p27_p1 = scmp.ge.s32.totalorder %s25_s15, 2  ;;  %p151_p2 = scmp.lt.s32.totalorder %s1112_s14, 3 }
   0x5   : > { %s1227_s15 = smov (%p27_p1, %s25_s15), 0  ;;  %p152_p3 = pnand %p913_p0, %p151_p2 }
   0x6   : > { %p179_p4 = scmp.lt.s32.totalorder (!%p152_p3), %s1104_s12, 1 }
   0x7   : > { %155 = sbr.rel (%p152_p3) target bundleno = 267 (0x10b), region = 32 }
   0xc   : > { %v1078_v0 = vld [vmem:[%s1221_s1 + $0x8] sm:$0xff]   ;;  %v1079_v1 = vld [vmem:[%s1221_s1] sm:$0xff]   ;;  %s1229_s12 = smov (!%p179_p4, %s1104_s12), 1  ;;  %v1083_v2 = vld [vmem:[%s1221_s1 + $0x10] sm:$0xff]   ;;  %vm234_vm0 = vcmask 130048   ;;  %vm291_vm1 = vcmask 1044480  }
   0xd   : > { %998 = vmatprep.subr.bf16.mxu0 %v1078_v0  ;;  %1004 = vmatprep.subr.bf16.mxu1 %v1079_v1  ;;  %s1052_s22 = smul.u32 20, %s1229_s12  ;;  %v1084_v3 = vld [vmem:[%s1221_s1 + $0x18] sm:$0xff]   ;;  %vm419_vm2 = vsmask.f32 7424  ;;  %v1086_v23 = vld [vmem:[%s1221_s1 + $0x28] sm:$0xff]   ;;  %v1085_v30 = vld [vmem:[%s1221_s1 + $0x20] sm:$0xff]  }
   0xe   : > { %999 = vmatpush3.bf16.msra.mxu0 %v1078_v0  ;;  %1005 = vmatpush3.bf16.msra.mxu1 %v1079_v1  ;;  %vm210_vm3 = vsmask.f32 5376  ;;  %v1088_v32 = vld [vmem:[%s1221_s1 + $0x38] sm:$0xff]   ;;  %v1087_v33 = vld [vmem:[%s1221_s1 + $0x30] sm:$0xff]   ;;  %v1089_v34 = vld [vmem:[%s1221_s1 + $0x40] sm:$0xff]   ;;  %s1053_s17 = smul.u32 12, %s1229_s12 }
   0xf   : > { %1010 = vmatprep.subr.bf16.mxu0 %v1083_v2  ;;  %s183_s27 = scalar_lea.vmem %s1220_s0, %s1052_s22  ;;  %1016 = vmatprep.subr.bf16.mxu1 %v1084_v3  ;;  %vm826_vm4 = vcmask 254976   ;;  %vm823_vm5 = vcmask 257024  }
  0x10   : > { %v197_v4 = vld [vmem:[%s183_s27 + $0x8] sm:$0xf]  ;;  %v198_v5 = vld [vmem:[%s183_s27 + $0xc] sm:$0x1]  ;;  %v1080_v6 = vld [vmem:[%s183_s27] sm:$0xff]   ;;  %s192_s20 = scalar_lea.vmem %s1223_s3, %s1053_s17 }
  0x11   : > { %v931_v7 = vcombine.low %v197_v4, %v197_v4  ;;  %v917_v8 = vcombine.low %v197_v4, %v198_v5  ;;  %v212_v9 = vshrl.u32 %v1080_v6, 16  ;;  %v215_v10 = vshll.u32 %v1080_v6, 16 }
  0x12   : > { %v292_v11 = vrot.slane %v1080_v6, 3 }
  0x13   : > { %v423_v12 = vshll.u32 %v931_v7, 16  ;;  %v220_v13 = vshrl.u32 %v917_v8, 16  ;;  %v223_v14 = vshll.u32 %v917_v8, 16  ;;  %v293_v15 = vrot.slane %v917_v8, 3 }
  0x14   : > { %v214_v16 = vrot.slane %v212_v9, 2  ;;  %v217_v17 = vrot.slane %v215_v10, 3  ;;  %v420_v18 = vrot.slane %v215_v10, 1  ;;  %v427_v27 = vshrl.u32 %v931_v7, 16 }
  0x15   : > { %v425_v19 = vrot.slane %v423_v12, 1  ;;  %v222_v20 = vrot.slane %v220_v13, 2  ;;  %v225_v21 = vrot.slane %v223_v14, 3  ;;  %v294_v22 = vsel %vm291_vm1, %v292_v11, %v293_v15 }
  0x16   : > { %v218_v24 = vor.u32 %v217_v17, %v214_v16  ;;  %1006 = vmatprep.mubr.msk.bf16.mxu1 %vm234_vm0, %v294_v22  ;;  %v421_v25 = vor.u32 %v420_v18, %v212_v9 }
  0x17   : > { %v226_v26 = vor.u32 %v225_v21, %v222_v20  ;;  %1007 = vmatmul.mubr.msk.bf16.vlgmr.msra.gmra.mxu1 %vm234_vm0, %v293_v15  ;;  %v429_v31 = vor.u32 %v427_v27, %v425_v19  ;;  %v962_v21 = vld [vmem:[%s1222_s2] ss:$0 sm:$0xff] }
  0x18   : > { %1017 = vmatpush3.bf16.msra.mxu1 %v1084_v3  ;;  %v426_v28 = vsel %vm419_vm2, %v421_v25, %v425_v19 }
  0x19   : > { %v227_v29 = vsel %vm210_vm3, %v218_v24, %v226_v26  ;;  %1018 = vmatprep.mubr.msk.bf16.mxu1 %vm234_vm0, %v426_v28  ;;  %1028 = vmatprep.subr.bf16.mxu1 %v1086_v23 }
  0x1a   : > { %1000 = vmatprep.mubr.msk.bf16.mxu0 %vm234_vm0, %v227_v29 }
  0x1b   : > { %1001 = vmatmul.mubr.msk.bf16.vlgmr.msra.gmra.mxu0 %vm234_vm0, %v226_v26 }
  0x1c   : > { %1011 = vmatpush3.bf16.msra.mxu0 %v1083_v2  ;;  %1012 = vmatprep.mubr.msk.bf16.mxu0 %vm234_vm0, %v227_v29 }
  0x1d   : > { %1022 = vmatprep.subr.bf16.mxu0 %v1085_v30 }
  0x1f   : > { %1019 = vmatmul.mubr.msk.bf16.vlgmr.msra.gmra.mxu1 %vm234_vm0, %v429_v31 }
  0x20   : > { %1029 = vmatpush3.bf16.msra.mxu1 %v1086_v23  ;;  %1030 = vmatprep.mubr.msk.bf16.mxu1 %vm234_vm0, %v1080_v6 }
  0x21   : > { %1040 = vmatprep.subr.bf16.mxu1 %v1088_v32 }
  0x23   : > { %1013 = vmatmul.mubr.msk.bf16.vlgmr.msra.gmra.mxu0 %vm234_vm0, %v226_v26 }
  0x24   : > { %1023 = vmatpush3.bf16.msra.mxu0 %v1085_v30  ;;  %1024 = vmatprep.mubr.msk.bf16.mxu0 %vm234_vm0, %v1080_v6 }
  0x25   : > { %1034 = vmatprep.subr.bf16.mxu0 %v1087_v33 }
  0x27   : > { %1031 = vmatmul.mubr.msk.bf16.vlgmr.msra.gmra.mxu1 %vm234_vm0, %v931_v7 }
  0x28   : > { %1041 = vmatpush3.bf16.msra.mxu1 %v1088_v32  ;;  %1042 = vmatprep.mubr.msk.bf16.mxu1 %vm234_vm0, %v1080_v6 }
  0x2b   : > { %1025 = vmatmul.mubr.msk.bf16.vlgmr.msra.gmra.mxu0 %vm234_vm0, %v931_v7 }
  0x2c   : > { %1035 = vmatpush3.bf16.msra.mxu0 %v1087_v33  ;;  %1036 = vmatprep.mubr.msk.bf16.mxu0 %vm234_vm0, %v426_v28 }
  0x2d   : > { %1046 = vmatprep.subr.bf16.mxu0 %v1089_v34 }
  0x2f   : > { %1043 = vmatmul.mubr.msk.bf16.vlgmr.msra.gmra.mxu1 %vm234_vm0, %v931_v7 }
  0x33   : > { %1037 = vmatmul.mubr.msk.bf16.vlgmr.msra.gmra.mxu0 %vm234_vm0, %v429_v31 }
  0x34   : > { %1047 = vmatpush3.bf16.msra.mxu0 %v1089_v34  ;;  %1048 = vmatprep.mubr.msk.bf16.mxu0 %vm234_vm0, %v1080_v6 }
  0x3b   : > { %1049 = vmatmul.mubr.msk.bf16.vlgmr.msra.gmra.mxu0 %vm234_vm0, %v931_v7 }
  0xd7   : > { %v1008_v35 = vpop.f32.mrf.mxu1 }
  0xd9   : > { %v341_v36 = vpop.f32.mrf.mxu1 }
  0xdb   : > { %v1002_v37 = vpop.f32.mrf.mxu0  ;;  %v1009_v38 = vpop.f32.mrf.mxu1 }
  0xdc   : > { %v350_v51 = vadd.f32 %v1008_v35, %v1002_v37 }
  0xdd   : > { %v275_v39 = vpop.f32.mrf.mxu0  ;;  %v344_v40 = vpop.f32.mrf.mxu1 }
  0xde   : > { %v342_v54 = vadd.f32 %v341_v36, %v275_v39 }
  0xdf   : > { %v1003_v41 = vpop.f32.mrf.mxu0  ;;  %v1020_v42 = vpop.f32.mrf.mxu1 }
  0xe1   : > { %v278_v43 = vpop.f32.mrf.mxu0  ;;  %v476_v44 = vpop.f32.mrf.mxu1 }
  0xe2   : > { %v345_v61 = vadd.f32 %v344_v40, %v278_v43 }
  0xe3   : > { %v1014_v45 = vpop.f32.mrf.mxu0  ;;  %v1021_v46 = vpop.f32.mrf.mxu1 }
  0xe4   : > { %v414_v55 = vadd.f32 %v1014_v45, %v350_v51 }
  0xe5   : > { %v398_v47 = vpop.f32.mrf.mxu0  ;;  %v479_v48 = vpop.f32.mrf.mxu1 }
  0xe6   : > { %v412_v58 = vadd.f32 %v398_v47, %v342_v54  ;;  %v492_v62 = vadd.f32 %v1020_v42, %v414_v55 }
  0xe7   : > { %v1015_v49 = vpop.f32.mrf.mxu0  ;;  %v1032_v50 = vpop.f32.mrf.mxu1 }
  0xe8   : > { %v490_v1 = vadd.f32 %v476_v44, %v412_v58 }
  0xe9   : > { %v401_v52 = vpop.f32.mrf.mxu0  ;;  %v600_v53 = vpop.f32.mrf.mxu1 }
  0xea   : > { %v413_v2 = vadd.f32 %v401_v52, %v345_v61 }
  0xeb   : > { %v1026_v56 = vpop.f32.mrf.mxu0  ;;  %v1033_v57 = vpop.f32.mrf.mxu1 }
  0xec   : > { %v556_v3 = vadd.f32 %v1026_v56, %v492_v62  ;;  %v491_v9 = vadd.f32 %v479_v48, %v413_v2 }
  0xed   : > { %v540_v59 = vpop.f32.mrf.mxu0  ;;  %v603_v60 = vpop.f32.mrf.mxu1 }
  0xee   : > { %v554_v6 = vadd.f32 %v540_v59, %v490_v1  ;;  %v616_v10 = vadd.f32 %v1032_v50, %v556_v3 }
  0xef   : > { %v1027_v63 = vpop.f32.mrf.mxu0  ;;  %v1044_v0 = vpop.f32.mrf.mxu1 }
  0xf0   : > { %v614_v12 = vadd.f32 %v600_v53, %v554_v6 }
  0xf1   : > { %v543_v4 = vpop.f32.mrf.mxu0  ;;  %v720_v5 = vpop.f32.mrf.mxu1 }
  0xf2   : > { %v555_v13 = vadd.f32 %v543_v4, %v491_v9 }
  0xf3   : > { %v1038_v7 = vpop.f32.mrf.mxu0  ;;  %v1045_v8 = vpop.f32.mrf.mxu1 }
  0xf4   : > { %v676_v14 = vadd.f32 %v1038_v7, %v616_v10  ;;  %v615_v18 = vadd.f32 %v603_v60, %v555_v13 }
  0xf5   : > { %v660_v11 = vpop.f32.mrf.mxu0  ;;  %v723_v28 = vpop.f32.mrf.mxu1 }
  0xf6   : > { %v674_v16 = vadd.f32 %v660_v11, %v614_v12  ;;  %v736_v19 = vadd.f32 %v1044_v0, %v676_v14 }
  0xf7   : > { %v1039_v15 = vpop.f32.mrf.mxu0 }
  0xf8   : > { %v734_v22 = vadd.f32 %v720_v5, %v674_v16 }
  0xf9   : > { %v663_v17 = vpop.f32.mrf.mxu0 }
  0xfa   : > { %v675_v23 = vadd.f32 %v663_v17, %v615_v18 }
  0xfb   : > { %v1050_v20 = vpop.f32.mrf.mxu0 }
  0xfc   : > { %v796_v24 = vadd.f32 %v1050_v20, %v736_v19  ;;  %v735_v30 = vadd.f32 %v723_v28, %v675_v23 }
  0xfd   : > { %v780_v25 = vpop.f32.mrf.mxu0 }
  0xfe   : > { %v806_v26 = vadd.f32 %v962_v21, %v796_v24  ;;  %v794_v27 = vadd.f32 %v780_v25, %v734_v22 }
  0xff   : > { %v1051_v29 = vpop.f32.mrf.mxu0 }
 0x100   : > { %v809_v31 = vmax.f32 %v806_v26, 0.0  ;;  %v804_v32 = vadd.f32 %v962_v21, %v794_v27 }
 0x101   : > { %v783_v33 = vpop.f32.mrf.mxu0 }
 0x102   : > { %v970_v34 = vpack.c.bf16 %v809_v31, %v809_v31  ;;  %v807_v35 = vmax.f32 %v804_v32, 0.0  ;;  %v795_v36 = vadd.f32 %v783_v33, %v735_v30 }
 0x104   : > { %827 = vst.msk [vmem:[%s192_s20 + $0x8] sm:$0x3] %vm826_vm4, %v970_v34  ;;  %v968_v37 = vpack.c.bf16 %v807_v35, %v807_v35  ;;  %v805_v38 = vadd.f32 %v962_v21, %v795_v36 }
 0x106   : > { %824 = vst.msk [vmem:[%s192_s20] sm:$0xf] %vm823_vm5, %v968_v37  ;;  %v808_v39 = vmax.f32 %v805_v38, 0.0 }
 0x108   : > { %v969_v40 = vpack.c.bf16 %v808_v39, %v808_v39 }
 0x10a   : > { %825 = vst.msk [vmem:[%s192_s20 + $0x4] sm:$0xf] %vm823_vm5, %v969_v40 }
 0x10b PF: > { %s13_s14 = sadd.s32 1, %s1112_s14   ;;  %s1224_s12 = smov %s1108_s13 }
 0x10c   : > { %p10_p5 = scmp.ge.s32.totalorder %s13_s14, 4   ;;  %s1225_s13 = smov %s1227_s15 }
 0x10e   :  { %12 = sbr.rel (!%p10_p5) target bundleno = 2 (0x2), region = 70 }

// kernel: vae_forward.14
= control target key start
LH: loop header
LB: loop body
LE: loop exit
PB: predicated region body
PF: predicated region fallthrough
CT: control target
= control target key end

     0   :  { %s1719_s12 = smov 0   ;;  %s1721_s13 = smov 0   ;;  %s2160_s0 = inlined_call_operand.vmem [shape: bf16[2,89,8], index: 0, kind: input, shape index: {}]   ;;  %s2161_s1 = inlined_call_operand.vmem [shape: bf16[9,8,32], index: 1, kind: input, shape index: {}]   ;;  %s2162_s2 = inlined_call_operand.vmem [shape: f32[1,32], index: 2, kind: input, shape index: {}]   ;;  %s2163_s3 = inlined_call_operand.vmem [shape: bf16[2,72,32], index: 3, kind: output, shape index: {}]  }
   0x1   :  { %s1723_s14 = smov 0  }
   0x2 LB: > { %s25_s15 = sadd.s32 1, %s1691_s13  ;;  %p1292_p0 = scmp.ge.s32.totalorder %s1695_s14, 1  ;;  %s1695_s14 = sphi %s1723_s14, %s13_s14   ;;  %s1691_s13 = sphi %s1721_s13, %s2165_s13   ;;  %s1687_s12 = sphi %s1719_s12, %s2164_s12  }
   0x3   : > { %p27_p1 = scmp.ge.s32.totalorder %s25_s15, 2  ;;  %p151_p2 = scmp.lt.s32.totalorder %s1695_s14, 3 }
   0x5   : > { %s2167_s15 = smov (%p27_p1, %s25_s15), 0  ;;  %p152_p3 = pnand %p1292_p0, %p151_p2 }
   0x6   : > { %p179_p4 = scmp.lt.s32.totalorder (!%p152_p3), %s1687_s12, 1 }
   0x7   : > { %155 = sbr.rel (%p152_p3) target bundleno = 404 (0x194), region = 32 }
   0xc   : > { %v1300_v0 = vld [vmem:[%s2161_s1 + $0x4] sm:$0xf]  ;;  %vm281_vm0 = vcmask 1043456   ;;  %v1697_v1 = vmov 0.0   ;;  %s2169_s12 = smov (!%p179_p4, %s1687_s12), 1  ;;  %vm1698_vm1 = vmmov 0  }
   0xd   : > { %1434 = vmatprep.subr.bf16.mxu0 %v1697_v1  ;;  %1632 = vmatprep.subr.bf16.mxu1 %v1697_v1  ;;  %v283_v2 = vsel %vm281_vm0, %v1300_v0, 0  ;;  %s1634_s18 = smul.u32 48, %s2169_s12  ;;  %vm225_vm2 = vsmask.f32 7424  ;;  %v1311_v25 = vld [vmem:[%s2161_s1 + $0x8] sm:$0xf] }
   0xe   : > { %1435 = vmatpush3.bf16.msra.mxu0 %v283_v2  ;;  %1633 = vmatpush3.bf16.msra.mxu1 %v283_v2  ;;  %vm265_vm3 = vcmask 64512   ;;  %v222_v32 = vld [vmem:[%s2161_s1] sm:$0xf]  ;;  %v465_v34 = vsel %vm281_vm0, %v1311_v25, 0  ;;  %vm362_vm4 = vcmask 1046528   ;;  %s1635_s17 = smul.u32 36, %s2169_s12 }
   0xf   : > { %1436 = vmatprep.mubr.msk.bf16.mxu0 %vm1698_vm1, %v1697_v1  ;;  %1448 = vmatprep.mubr.msk.bf16.mxu1 %vm1698_vm1, %v1697_v1  ;;  %s1755_s21 = scalar_lea.vmem %s2160_s0, %s1634_s18  ;;  %v388_v37 = vsel %vm281_vm0, %v222_v32, 0  ;;  %v1322_v57 = vld [vmem:[%s2161_s1 + $0xc] sm:$0xf]  ;;  %v1329_v61 = vld [vmem:[%s2161_s1 + $0x10] sm:$0xf]  ;;  %vm1197_vm5 = vcmask 257024  }
  0x10   : > { %1478 = vmatprep.subr.bf16.mxu0 %v1697_v1  ;;  %1456 = vmatprep.subr.bf16.mxu1 %v1697_v1  ;;  %v1758_v3 = vld [vmem:[%s1755_s21 + $0x4] sm:$0xf]  ;;  %v1761_v4 = vld [vmem:[%s1755_s21 + $0x8] sm:$0xf]  ;;  %v1764_v5 = vld [vmem:[%s1755_s21 + $0xc] sm:$0xf]  ;;  %s2107_s20 = scalar_lea.vmem %s2163_s3, %s1635_s17 }
  0x11   : > { %v1767_v6 = vld [vmem:[%s1755_s21 + $0x10] sm:$0xf]  ;;  %v1771_v7 = vcombine.low %v1758_v3, %v1761_v4  ;;  %v202_v8 = vld [vmem:[%s1755_s21 + $0x1c] sm:$0xf]  ;;  %v1779_v10 = vld [vmem:[%s1755_s21 + $0x20] sm:$0xf] }
  0x12   : > { %v1776_v9 = vcombine.low %v1764_v5, %v1767_v6  ;;  %v204_v11 = vld [vmem:[%s1755_s21 + $0x24] sm:$0xf]  ;;  %v205_v12 = vld [vmem:[%s1755_s21 + $0x28] sm:$0x1]  ;;  %v1786_v15 = vcombine.low %v202_v8, %v1779_v10  ;;  %v1791_v17 = vld [vmem:[%s1755_s21 + $0x14] sm:$0xf]  ;;  %v1328_v32 = vcombine.low %v1779_v10, %v1779_v10 }
  0x13   : > { %v227_v13 = vshrl.u32 %v1771_v7, 16  ;;  %v229_v14 = vshll.u32 %v1771_v7, 16  ;;  %v1788_v16 = vcombine.low %v204_v11, %v205_v12  ;;  %v201_v18 = vld [vmem:[%s1755_s21 + $0x18] sm:$0xf]  ;;  %v1829_v43 = vcombine.low %v1779_v10, %v204_v11  ;;  %v1353_v10 = vld [vmem:[%s2161_s1 + $0x20] sm:$0xf] }
  0x14   : > { %v234_v19 = vshll.u32 %v1776_v9, 16  ;;  %v1796_v20 = vcombine.low %v1791_v17, %v201_v18  ;;  %v250_v22 = vshll.u32 %v1786_v15, 16  ;;  %v254_v23 = vshrl.u32 %v1786_v15, 16 }
  0x15   : > { %v231_v21 = vrot.slane %v229_v14, 1  ;;  %v258_v24 = vshll.u32 %v1788_v16, 16  ;;  %v238_v27 = vshrl.u32 %v1776_v9, 16  ;;  %v1805_v28 = vcombine.low %v201_v18, %v202_v8  ;;  %v195_v8 = vld [vmem:[%s1755_s21] sm:$0xf] }
  0x16   : > { %v236_v26 = vrot.slane %v234_v19, 1  ;;  %v252_v30 = vrot.slane %v250_v22, 1  ;;  %v242_v33 = vshll.u32 %v1796_v20, 16  ;;  %v262_v41 = vshrl.u32 %v1788_v16, 16  ;;  %v1335_v18 = vld [vmem:[%s2161_s1 + $0x14] sm:$0xf] }
  0x17   : > { %v232_v29 = vor.u32 %v231_v21, %v227_v13  ;;  %v260_v31 = vrot.slane %v258_v24, 1  ;;  %v579_v42 = vshll.u32 %v1805_v28, 16  ;;  %v246_v45 = vshrl.u32 %v1796_v20, 16 }
  0x18   : > { %v256_v36 = vor.u32 %v254_v23, %v252_v30  ;;  %v240_v39 = vor.u32 %v238_v27, %v236_v26  ;;  %v244_v40 = vrot.slane %v242_v33, 1  ;;  %v583_v46 = vshrl.u32 %v1805_v28, 16  ;;  %v1341_v23 = vld [vmem:[%s2161_s1 + $0x18] sm:$0xf]  ;;  %v1347_v33 = vld [vmem:[%s2161_s1 + $0x1c] sm:$0xf] }
  0x19   : > { %v237_v35 = vsel %vm225_vm2, %v232_v29, %v236_v26  ;;  %v1834_v47 = vor.u32 %v262_v41, %v260_v31  ;;  %v1836_v48 = vrot.slane %v579_v42, 1  ;;  %v587_v49 = vshll.u32 %v1829_v43, 16 }
  0x1a   : > { %1437 = vmatmul.mubr.msk.bf16.vlgmr.msra.gmra.mxu0 %vm265_vm3, %v237_v35  ;;  %v1816_v38 = vsel %vm225_vm2, %v256_v36, %v260_v31  ;;  %v245_v44 = vsel %vm225_vm2, %v240_v39, %v244_v40  ;;  %v248_v52 = vor.u32 %v246_v45, %v244_v40  ;;  %v363_v54 = vrot.slane %v1771_v7, 1 }
  0x1b   : > { %1479 = vmatpush3.bf16.msra.mxu0 %v465_v34  ;;  %1440 = vmatprep.mubr.msk.bf16.mxu0 %vm1698_vm1, %v1697_v1  ;;  %v585_v50 = vor.u32 %v583_v46, %v1836_v48  ;;  %v1841_v51 = vrot.slane %v587_v49, 1  ;;  %v364_v55 = vrot.slane %v1776_v9, 1  ;;  %v610_v59 = vsel %vm281_vm0, %v1322_v57, 0 }
  0x1c   : > { %1449 = vmatmul.mubr.msk.bf16.vlgmr.msra.gmra.mxu1 %vm265_vm3, %v1816_v38  ;;  %1522 = vmatprep.subr.bf16.mxu0 %v1697_v1  ;;  %v253_v56 = vsel %vm225_vm2, %v248_v52, %v252_v30  ;;  %v366_v60 = vrot.slane %v1796_v20, 1  ;;  %v708_v62 = vsel %vm281_vm0, %v1329_v61, 0  ;;  %v368_v0 = vrot.slane %v1786_v15, 1 }
  0x1d   : > { %1457 = vmatpush3.bf16.msra.mxu1 %v388_v37  ;;  %1452 = vmatprep.mubr.msk.bf16.mxu1 %vm1698_vm1, %v1697_v1  ;;  %v1849_v53 = vsel %vm225_vm2, %v585_v50, %v1841_v51  ;;  %v365_v58 = vsel %vm362_vm4, %v363_v54, %v364_v55  ;;  %v370_v7 = vrot.slane %v1788_v16, 1  ;;  %v1892_v9 = vcombine.low %v195_v8, %v1758_v3 }
  0x1e   : > { %1500 = vmatprep.subr.bf16.mxu1 %v1697_v1  ;;  %v367_v63 = vsel %vm362_vm4, %v364_v55, %v366_v60  ;;  %v369_v2 = vsel %vm362_vm4, %v366_v60, %v368_v0  ;;  %v1901_v12 = vcombine.low %v1761_v4, %v1764_v5  ;;  %v1915_v4 = vcombine.low %v1767_v6, %v1791_v17 }
  0x1f   : > { %v371_v11 = vsel %vm362_vm4, %v368_v0, %v370_v7  ;;  %v558_v13 = vshll.u32 %v1892_v9, 16  ;;  %v556_v3 = vshrl.u32 %v1892_v9, 16  ;;  %v794_v6 = vsel %vm281_vm0, %v1335_v18, 0 }
  0x20   : > { %v563_v15 = vshll.u32 %v1901_v12, 16  ;;  %v567_v20 = vshrl.u32 %v1901_v12, 16  ;;  %v571_v21 = vshll.u32 %v1915_v4, 16  ;;  %v880_v24 = vsel %vm281_vm0, %v1341_v23, 0 }
  0x21   : > { %v560_v14 = vrot.slane %v558_v13, 1  ;;  %v575_v26 = vshrl.u32 %v1915_v4, 16  ;;  %v591_v30 = vshrl.u32 %v1829_v43, 16  ;;  %v966_v34 = vsel %vm281_vm0, %v1347_v33, 0 }
  0x22   : > { %1441 = vmatmul.mubr.msk.bf16.gmra.mxu0 %vm265_vm3, %v245_v44  ;;  %v565_v16 = vrot.slane %v563_v15, 1  ;;  %v573_v22 = vrot.slane %v571_v21, 1 }
  0x23   : > { %1444 = vmatprep.mubr.msk.bf16.mxu0 %vm1698_vm1, %v1697_v1  ;;  %v561_v5 = vor.u32 %v560_v14, %v556_v3  ;;  %v593_v31 = vor.u32 %v591_v30, %v1841_v51 }
  0x24   : > { %1453 = vmatmul.mubr.msk.bf16.gmra.mxu1 %vm265_vm3, %v1834_v47  ;;  %v569_v17 = vor.u32 %v567_v20, %v565_v16  ;;  %v577_v27 = vor.u32 %v575_v26, %v573_v22 }
  0x25   : > { %1458 = vmatprep.mubr.msk.bf16.mxu1 %vm1698_vm1, %v1697_v1  ;;  %v566_v19 = vsel %vm225_vm2, %v561_v5, %v565_v16 }
  0x26   : > { %v574_v25 = vsel %vm225_vm2, %v569_v17, %v573_v22  ;;  %v582_v29 = vsel %vm225_vm2, %v577_v27, %v1836_v48 }
  0x2a   : > { %1445 = vmatmul.mubr.msk.bf16.gmra.mxu0 %vm265_vm3, %v253_v56 }
  0x2b   : > { %1480 = vmatprep.mubr.msk.bf16.mxu0 %vm1698_vm1, %v1697_v1 }
  0x2c   : > { %1459 = vmatmul.mubr.msk.bf16.vlgmr.msra.gmra.mxu1 %vm265_vm3, %v365_v58 }
  0x2d   : > { %1501 = vmatpush3.bf16.msra.mxu1 %v610_v59  ;;  %1462 = vmatprep.mubr.msk.bf16.mxu1 %vm1698_vm1, %v1697_v1 }
  0x2e   : > { %1544 = vmatprep.subr.bf16.mxu1 %v1697_v1 }
  0x32   : > { %1481 = vmatmul.mubr.msk.bf16.vlgmr.msra.gmra.mxu0 %vm265_vm3, %v237_v35  ;;  %v1052_v35 = vsel %vm281_vm0, %v1353_v10, 0 }
  0x33   : > { %1523 = vmatpush3.bf16.msra.mxu0 %v708_v62  ;;  %1484 = vmatprep.mubr.msk.bf16.mxu0 %vm1698_vm1, %v1697_v1 }
  0x34   : > { %1463 = vmatmul.mubr.msk.bf16.gmra.mxu1 %vm265_vm3, %v367_v63  ;;  %1566 = vmatprep.subr.bf16.mxu0 %v1697_v1 }
  0x35   : > { %1466 = vmatprep.mubr.msk.bf16.mxu1 %vm1698_vm1, %v1697_v1 }
  0x3a   : > { %1485 = vmatmul.mubr.msk.bf16.gmra.mxu0 %vm265_vm3, %v245_v44 }
  0x3b   : > { %1488 = vmatprep.mubr.msk.bf16.mxu0 %vm1698_vm1, %v1697_v1 }
  0x3c   : > { %1467 = vmatmul.mubr.msk.bf16.gmra.mxu1 %vm265_vm3, %v369_v2 }
  0x3d   : > { %1470 = vmatprep.mubr.msk.bf16.mxu1 %vm1698_vm1, %v1697_v1 }
  0x42   : > { %1489 = vmatmul.mubr.msk.bf16.gmra.mxu0 %vm265_vm3, %v253_v56 }
  0x43   : > { %1492 = vmatprep.mubr.msk.bf16.mxu0 %vm1698_vm1, %v1697_v1 }
  0x44   : > { %1471 = vmatmul.mubr.msk.bf16.gmra.mxu1 %vm265_vm3, %v371_v11 }
  0x45   : > { %1474 = vmatprep.mubr.msk.bf16.mxu1 %vm1698_vm1, %v1697_v1 }
  0x4a   : > { %1493 = vmatmul.mubr.msk.bf16.gmra.mxu0 %vm265_vm3, %v1816_v38 }
  0x4b   : > { %1496 = vmatprep.mubr.msk.bf16.mxu0 %vm1698_vm1, %v1697_v1 }
  0x4c   : > { %1475 = vmatmul.mubr.msk.bf16.gmra.mxu1 %vm265_vm3, %v370_v7 }
  0x4d   : > { %1502 = vmatprep.mubr.msk.bf16.mxu1 %vm1698_vm1, %v1697_v1 }
  0x52   : > { %1497 = vmatmul.mubr.msk.bf16.gmra.mxu0 %vm265_vm3, %v1834_v47 }
  0x53   : > { %1524 = vmatprep.mubr.msk.bf16.mxu0 %vm1698_vm1, %v1697_v1 }
  0x54   : > { %1503 = vmatmul.mubr.msk.bf16.vlgmr.msra.gmra.mxu1 %vm265_vm3, %v566_v19 }
  0x55   : > { %1545 = vmatpush3.bf16.msra.mxu1 %v794_v6  ;;  %1506 = vmatprep.mubr.msk.bf16.mxu1 %vm1698_vm1, %v1697_v1 }
  0x56   : > { %1588 = vmatprep.subr.bf16.mxu1 %v1697_v1 }
  0x5a   : > { %1525 = vmatmul.mubr.msk.bf16.vlgmr.msra.gmra.mxu0 %vm265_vm3, %v1892_v9 }
  0x5b   : > { %1567 = vmatpush3.bf16.msra.mxu0 %v880_v24  ;;  %1528 = vmatprep.mubr.msk.bf16.mxu0 %vm1698_vm1, %v1697_v1 }
  0x5c   : > { %1507 = vmatmul.mubr.msk.bf16.gmra.mxu1 %vm265_vm3, %v574_v25  ;;  %1610 = vmatprep.subr.bf16.mxu0 %v1697_v1 }
  0x5d   : > { %1510 = vmatprep.mubr.msk.bf16.mxu1 %vm1698_vm1, %v1697_v1 }
  0x62   : > { %1529 = vmatmul.mubr.msk.bf16.gmra.mxu0 %vm265_vm3, %v1901_v12 }
  0x63   : > { %1532 = vmatprep.mubr.msk.bf16.mxu0 %vm1698_vm1, %v1697_v1 }
  0x64   : > { %1511 = vmatmul.mubr.msk.bf16.gmra.mxu1 %vm265_vm3, %v582_v29 }
  0x65   : > { %1514 = vmatprep.mubr.msk.bf16.mxu1 %vm1698_vm1, %v1697_v1 }
  0x6a   : > { %1533 = vmatmul.mubr.msk.bf16.gmra.mxu0 %vm265_vm3, %v1915_v4 }
  0x6b   : > { %1536 = vmatprep.mubr.msk.bf16.mxu0 %vm1698_vm1, %v1697_v1 }
  0x6c   : > { %1515 = vmatmul.mubr.msk.bf16.gmra.mxu1 %vm265_vm3, %v1849_v53 }
  0x6d   : > { %1518 = vmatprep.mubr.msk.bf16.mxu1 %vm1698_vm1, %v1697_v1 }
  0x72   : > { %1537 = vmatmul.mubr.msk.bf16.gmra.mxu0 %vm265_vm3, %v1805_v28 }
  0x73   : > { %1540 = vmatprep.mubr.msk.bf16.mxu0 %vm1698_vm1, %v1697_v1 }
  0x74   : > { %1519 = vmatmul.mubr.msk.bf16.gmra.mxu1 %vm265_vm3, %v593_v31 }
  0x75   : > { %1546 = vmatprep.mubr.msk.bf16.mxu1 %vm1698_vm1, %v1697_v1 }
  0x7a   : > { %1541 = vmatmul.mubr.msk.bf16.gmra.mxu0 %vm265_vm3, %v1328_v32 }
  0x7b   : > { %1568 = vmatprep.mubr.msk.bf16.mxu0 %vm1698_vm1, %v1697_v1 }
  0x7c   : > { %1547 = vmatmul.mubr.msk.bf16.vlgmr.msra.gmra.mxu1 %vm265_vm3, %v1892_v9 }
  0x7d   : > { %1589 = vmatpush3.bf16.msra.mxu1 %v966_v34  ;;  %1550 = vmatprep.mubr.msk.bf16.mxu1 %vm1698_vm1, %v1697_v1 }
  0x82   : > { %1569 = vmatmul.mubr.msk.bf16.vlgmr.msra.gmra.mxu0 %vm265_vm3, %v566_v19 }
  0x83   : > { %1611 = vmatpush3.bf16.msra.mxu0 %v1052_v35  ;;  %1572 = vmatprep.mubr.msk.bf16.mxu0 %vm1698_vm1, %v1697_v1 }
  0x84   : > { %1551 = vmatmul.mubr.msk.bf16.gmra.mxu1 %vm265_vm3, %v1901_v12 }
  0x85   : > { %1554 = vmatprep.mubr.msk.bf16.mxu1 %vm1698_vm1, %v1697_v1 }
  0x8a   : > { %1573 = vmatmul.mubr.msk.bf16.gmra.mxu0 %vm265_vm3, %v574_v25 }
  0x8b   : > { %1576 = vmatprep.mubr.msk.bf16.mxu0 %vm1698_vm1, %v1697_v1 }
  0x8c   : > { %1555 = vmatmul.mubr.msk.bf16.gmra.mxu1 %vm265_vm3, %v1915_v4 }
  0x8d   : > { %1558 = vmatprep.mubr.msk.bf16.mxu1 %vm1698_vm1, %v1697_v1 }
  0x92   : > { %1577 = vmatmul.mubr.msk.bf16.gmra.mxu0 %vm265_vm3, %v582_v29 }
  0x93   : > { %1580 = vmatprep.mubr.msk.bf16.mxu0 %vm1698_vm1, %v1697_v1 }
  0x94   : > { %1559 = vmatmul.mubr.msk.bf16.gmra.mxu1 %vm265_vm3, %v1805_v28 }
  0x95   : > { %1562 = vmatprep.mubr.msk.bf16.mxu1 %vm1698_vm1, %v1697_v1 }
  0x9a   : > { %1581 = vmatmul.mubr.msk.bf16.gmra.mxu0 %vm265_vm3, %v1849_v53 }
  0x9b   : > { %1584 = vmatprep.mubr.msk.bf16.mxu0 %vm1698_vm1, %v1697_v1 }
  0x9c   : > { %1563 = vmatmul.mubr.msk.bf16.gmra.mxu1 %vm265_vm3, %v1328_v32 }
  0x9d   : > { %1590 = vmatprep.mubr.msk.bf16.mxu1 %vm1698_vm1, %v1697_v1 }
  0xa2   : > { %1585 = vmatmul.mubr.msk.bf16.gmra.mxu0 %vm265_vm3, %v593_v31 }
  0xa3   : > { %1612 = vmatprep.mubr.msk.bf16.mxu0 %vm1698_vm1, %v1697_v1 }
  0xa4   : > { %1591 = vmatmul.mubr.msk.bf16.vlgmr.msra.gmra.mxu1 %vm265_vm3, %v1892_v9 }
  0xa5   : > { %1594 = vmatprep.mubr.msk.bf16.mxu1 %vm1698_vm1, %v1697_v1 }
  0xaa   : > { %1613 = vmatmul.mubr.msk.bf16.vlgmr.msra.gmra.mxu0 %vm265_vm3, %v1892_v9 }
  0xab   : > { %1616 = vmatprep.mubr.msk.bf16.mxu0 %vm1698_vm1, %v1697_v1 }
  0xac   : > { %1595 = vmatmul.mubr.msk.bf16.gmra.mxu1 %vm265_vm3, %v1901_v12 }
  0xad   : > { %1598 = vmatprep.mubr.msk.bf16.mxu1 %vm1698_vm1, %v1697_v1 }
  0xb2   : > { %1617 = vmatmul.mubr.msk.bf16.gmra.mxu0 %vm265_vm3, %v1901_v12 }
  0xb3   : > { %1620 = vmatprep.mubr.msk.bf16.mxu0 %vm1698_vm1, %v1697_v1 }
  0xb4   : > { %1599 = vmatmul.mubr.msk.bf16.gmra.mxu1 %vm265_vm3, %v1915_v4 }
  0xb5   : > { %1602 = vmatprep.mubr.msk.bf16.mxu1 %vm1698_vm1, %v1697_v1 }
  0xba   : > { %1621 = vmatmul.mubr.msk.bf16.gmra.mxu0 %vm265_vm3, %v1915_v4 }
  0xbb   : > { %1624 = vmatprep.mubr.msk.bf16.mxu0 %vm1698_vm1, %v1697_v1 }
  0xbc   : > { %1603 = vmatmul.mubr.msk.bf16.gmra.mxu1 %vm265_vm3, %v1805_v28 }
  0xbd   : > { %1606 = vmatprep.mubr.msk.bf16.mxu1 %vm1698_vm1, %v1697_v1 }
  0xc2   : > { %1625 = vmatmul.mubr.msk.bf16.gmra.mxu0 %vm265_vm3, %v1805_v28 }
  0xc3   : > { %1628 = vmatprep.mubr.msk.bf16.mxu0 %vm1698_vm1, %v1697_v1 }
  0xc4   : > { %1607 = vmatmul.mubr.msk.bf16.gmra.mxu1 %vm265_vm3, %v1328_v32 }
  0xca   : > { %1629 = vmatmul.mubr.msk.bf16.gmra.mxu0 %vm265_vm3, %v1328_v32 }
  0xda   : > { %v319_v36 = vpop.f32.mrf.mxu0 }
  0xdc   : > { %v343_v37 = vpop.f32.mrf.mxu1  ;;  %v1438_v38 = vpop.f32.mrf.mxu0 }
  0xde   : > { %v1450_v39 = vpop.f32.mrf.mxu1  ;;  %v322_v40 = vpop.f32.mrf.mxu0 }
  0xe0   : > { %v346_v41 = vpop.f32.mrf.mxu1  ;;  %v1439_v42 = vpop.f32.mrf.mxu0 }
  0xe2   : > { %v1451_v43 = vpop.f32.mrf.mxu1  ;;  %v327_v44 = vpop.f32.mrf.mxu0 }
  0xe4   : > { %v351_v45 = vpop.f32.mrf.mxu1  ;;  %v1442_v46 = vpop.f32.mrf.mxu0 }
  0xe6   : > { %v1454_v47 = vpop.f32.mrf.mxu1  ;;  %v330_v28 = vpop.f32.mrf.mxu0 }
  0xe8   : > { %v354_v48 = vpop.f32.mrf.mxu1  ;;  %v1443_v49 = vpop.f32.mrf.mxu0 }
  0xea   : > { %v1455_v1 = vpop.f32.mrf.mxu1  ;;  %v335_v50 = vpop.f32.mrf.mxu0 }
  0xec   : > { %v424_v51 = vpop.f32.mrf.mxu1  ;;  %v1446_v52 = vpop.f32.mrf.mxu0 }
  0xed   : > { %v425_v53 = vadd.f32 %v424_v51, %v319_v36 }
  0xee   : > { %v1460_v54 = vpop.f32.mrf.mxu1  ;;  %v338_v55 = vpop.f32.mrf.mxu0 }
  0xf0   : > { %v427_v56 = vpop.f32.mrf.mxu1  ;;  %v1447_v57 = vpop.f32.mrf.mxu0 }
  0xf1   : > { %v428_v58 = vadd.f32 %v427_v56, %v322_v40 }
  0xf2   : > { %v1461_v59 = vpop.f32.mrf.mxu1  ;;  %v501_v60 = vpop.f32.mrf.mxu0 }
  0xf3   : > { %v539_v61 = vadd.f32 %v501_v60, %v425_v53 }
  0xf4   : > { %v432_v62 = vpop.f32.mrf.mxu1  ;;  %v1482_v63 = vpop.f32.mrf.mxu0 }
  0xf5   : > { %v433_v0 = vadd.f32 %v432_v62, %v327_v44 }
  0xf6   : > { %v1464_v2 = vpop.f32.mrf.mxu1  ;;  %v504_v7 = vpop.f32.mrf.mxu0 }
  0xf7   : > { %v540_v8 = vadd.f32 %v504_v7, %v428_v58 }
  0xf8   : > { %v435_v9 = vpop.f32.mrf.mxu1  ;;  %v1483_v11 = vpop.f32.mrf.mxu0 }
  0xf9   : > { %v436_v12 = vadd.f32 %v435_v9, %v330_v28 }
  0xfa   : > { %v1465_v13 = vpop.f32.mrf.mxu1  ;;  %v509_v3 = vpop.f32.mrf.mxu0 }
  0xfb   : > { %v541_v14 = vadd.f32 %v509_v3, %v433_v0 }
  0xfc   : > { %v440_v15 = vpop.f32.mrf.mxu1  ;;  %v1486_v4 = vpop.f32.mrf.mxu0 }
  0xfd   : > { %v441_v5 = vadd.f32 %v440_v15, %v335_v50 }
  0xfe   : > { %v1468_v16 = vpop.f32.mrf.mxu1  ;;  %v512_v18 = vpop.f32.mrf.mxu0 }
  0xff   : > { %v542_v19 = vadd.f32 %v512_v18, %v436_v12 }
 0x100   : > { %v443_v20 = vpop.f32.mrf.mxu1  ;;  %v1487_v21 = vpop.f32.mrf.mxu0 }
 0x101   : > { %v444_v6 = vadd.f32 %v443_v20, %v338_v55 }
 0x102   : > { %v1469_v17 = vpop.f32.mrf.mxu1  ;;  %v517_v22 = vpop.f32.mrf.mxu0 }
 0x103   : > { %v543_v23 = vadd.f32 %v517_v22, %v441_v5 }
 0x104   : > { %v448_v24 = vpop.f32.mrf.mxu1  ;;  %v1490_v25 = vpop.f32.mrf.mxu0 }
 0x105   : > { %v449_v26 = vadd.f32 %v448_v24, %v343_v37 }
 0x106   : > { %v1472_v27 = vpop.f32.mrf.mxu1  ;;  %v520_v29 = vpop.f32.mrf.mxu0 }
 0x107   : > { %v544_v30 = vadd.f32 %v520_v29, %v444_v6 }
 0x108   : > { %v451_v31 = vpop.f32.mrf.mxu1  ;;  %v1491_v32 = vpop.f32.mrf.mxu0 }
 0x109   : > { %v452_v33 = vadd.f32 %v451_v31, %v346_v41 }
 0x10a   : > { %v1473_v34 = vpop.f32.mrf.mxu1  ;;  %v525_v10 = vpop.f32.mrf.mxu0 }
 0x10b   : > { %v545_v35 = vadd.f32 %v525_v10, %v449_v26 }
 0x10c   : > { %v456_v36 = vpop.f32.mrf.mxu1  ;;  %v1494_v38 = vpop.f32.mrf.mxu0 }
 0x10d   : > { %v457_v39 = vadd.f32 %v456_v36, %v351_v45 }
 0x10e   : > { %v1476_v40 = vpop.f32.mrf.mxu1  ;;  %v528_v42 = vpop.f32.mrf.mxu0 }
 0x10f   : > { %v546_v43 = vadd.f32 %v528_v42, %v452_v33 }
 0x110   : > { %v459_v44 = vpop.f32.mrf.mxu1  ;;  %v1495_v46 = vpop.f32.mrf.mxu0 }
 0x112   : > { %v1477_v47 = vpop.f32.mrf.mxu1  ;;  %v533_v28 = vpop.f32.mrf.mxu0 }
 0x113   : > { %v547_v37 = vadd.f32 %v533_v28, %v457_v39 }
 0x114   : > { %v646_v48 = vpop.f32.mrf.mxu1  ;;  %v1498_v49 = vpop.f32.mrf.mxu0 }
 0x115   : > { %v684_v1 = vadd.f32 %v646_v48, %v539_v61 }
 0x116   : > { %v1504_v50 = vpop.f32.mrf.mxu1  ;;  %v536_v51 = vpop.f32.mrf.mxu0 }
 0x118   : > { %v649_v41 = vpop.f32.mrf.mxu1  ;;  %v1499_v52 = vpop.f32.mrf.mxu0 }
 0x119   : > { %v685_v53 = vadd.f32 %v649_v41, %v540_v8 }
 0x11a   : > { %v1505_v54 = vpop.f32.mrf.mxu1  ;;  %v744_v55 = vpop.f32.mrf.mxu0 }
 0x11b   : > { %v2056_v56 = vadd.f32 %v744_v55, %v684_v1 }
 0x11c   : > { %v654_v45 = vpop.f32.mrf.mxu1  ;;  %v1526_v57 = vpop.f32.mrf.mxu0 }
 0x11d   : > { %v686_v58 = vadd.f32 %v654_v45, %v541_v14 }
 0x11e   : > { %v1508_v59 = vpop.f32.mrf.mxu1  ;;  %v747_v60 = vpop.f32.mrf.mxu0 }
 0x11f   : > { %v2058_v62 = vadd.f32 %v747_v60, %v685_v53 }
 0x120   : > { %v657_v63 = vpop.f32.mrf.mxu1  ;;  %v1527_v0 = vpop.f32.mrf.mxu0 }
 0x121   : > { %v687_v2 = vadd.f32 %v657_v63, %v542_v19 }
 0x122   : > { %v1509_v61 = vpop.f32.mrf.mxu1  ;;  %v752_v7 = vpop.f32.mrf.mxu0 }
 0x123   : > { %v2060_v9 = vadd.f32 %v752_v7, %v686_v58 }
 0x124   : > { %v662_v11 = vpop.f32.mrf.mxu1  ;;  %v1530_v8 = vpop.f32.mrf.mxu0 }
 0x125   : > { %v688_v12 = vadd.f32 %v662_v11, %v543_v23 }
 0x126   : > { %v1512_v13 = vpop.f32.mrf.mxu1  ;;  %v755_v3 = vpop.f32.mrf.mxu0 }
 0x127   : > { %v2062_v15 = vadd.f32 %v755_v3, %v687_v2 }
 0x128   : > { %v665_v4 = vpop.f32.mrf.mxu1  ;;  %v1531_v14 = vpop.f32.mrf.mxu0 }
 0x129   : > { %v689_v5 = vadd.f32 %v665_v4, %v544_v30 }
 0x12a   : > { %v1513_v16 = vpop.f32.mrf.mxu1  ;;  %v760_v18 = vpop.f32.mrf.mxu0 }
 0x12b   : > { %v2064_v20 = vadd.f32 %v760_v18, %v688_v12 }
 0x12c   : > { %v670_v21 = vpop.f32.mrf.mxu1  ;;  %v1534_v19 = vpop.f32.mrf.mxu0 }
 0x12d   : > { %v690_v6 = vadd.f32 %v670_v21, %v545_v35 }
 0x12e   : > { %v1516_v17 = vpop.f32.mrf.mxu1  ;;  %v763_v22 = vpop.f32.mrf.mxu0 }
 0x12f   : > { %v2066_v24 = vadd.f32 %v763_v22, %v689_v5 }
 0x130   : > { %v673_v25 = vpop.f32.mrf.mxu1  ;;  %v1535_v23 = vpop.f32.mrf.mxu0 }
 0x131   : > { %v691_v26 = vadd.f32 %v673_v25, %v546_v43 }
 0x132   : > { %v1517_v27 = vpop.f32.mrf.mxu1  ;;  %v768_v29 = vpop.f32.mrf.mxu0 }
 0x133   : > { %v2068_v31 = vadd.f32 %v768_v29, %v690_v6 }
 0x134   : > { %v678_v32 = vpop.f32.mrf.mxu1  ;;  %v1538_v30 = vpop.f32.mrf.mxu0 }
 0x135   : > { %v692_v33 = vadd.f32 %v678_v32, %v547_v37 }
 0x136   : > { %v1520_v34 = vpop.f32.mrf.mxu1  ;;  %v771_v10 = vpop.f32.mrf.mxu0 }
 0x137   : > { %v2070_v36 = vadd.f32 %v771_v10, %v691_v26 }
 0x138   : > { %v681_v38 = vpop.f32.mrf.mxu1  ;;  %v1539_v35 = vpop.f32.mrf.mxu0 }
 0x139   : > { %v2099_v35 = vld [vmem:[%s2162_s2] ss:$0 sm:$0xff] }
 0x13a   : > { %v1521_v39 = vpop.f32.mrf.mxu1  ;;  %v776_v40 = vpop.f32.mrf.mxu0 }
 0x13b   : > { %v2072_v42 = vadd.f32 %v776_v40, %v692_v33 }
 0x13c   : > { %v830_v44 = vpop.f32.mrf.mxu1  ;;  %v1542_v46 = vpop.f32.mrf.mxu0 }
 0x13d   : > { %v868_v23 = vadd.f32 %v830_v44, %v2056_v56 }
 0x13e   : > { %v1548_v43 = vpop.f32.mrf.mxu1  ;;  %v779_v47 = vpop.f32.mrf.mxu0 }
 0x140   : > { %v833_v28 = vpop.f32.mrf.mxu1  ;;  %v1543_v48 = vpop.f32.mrf.mxu0 }
 0x141   : > { %v869_v33 = vadd.f32 %v833_v28, %v2058_v62 }
 0x142   : > { %v1549_v49 = vpop.f32.mrf.mxu1  ;;  %v916_v1 = vpop.f32.mrf.mxu0 }
 0x143   : > { %v954_v29 = vadd.f32 %v916_v1, %v868_v23 }
 0x144   : > { %v838_v50 = vpop.f32.mrf.mxu1  ;;  %v1570_v37 = vpop.f32.mrf.mxu0 }
 0x145   : > { %v870_v44 = vadd.f32 %v838_v50, %v2060_v9 }
 0x146   : > { %v1552_v51 = vpop.f32.mrf.mxu1  ;;  %v919_v41 = vpop.f32.mrf.mxu0 }
 0x147   : > { %v955_v39 = vadd.f32 %v919_v41, %v869_v33 }
 0x148   : > { %v841_v52 = vpop.f32.mrf.mxu1  ;;  %v1571_v53 = vpop.f32.mrf.mxu0 }
 0x149   : > { %v871_v41 = vadd.f32 %v841_v52, %v2062_v15 }
 0x14a   : > { %v1553_v54 = vpop.f32.mrf.mxu1  ;;  %v924_v55 = vpop.f32.mrf.mxu0 }
 0x14b   : > { %v956_v28 = vadd.f32 %v924_v55, %v870_v44 }
 0x14c   : > { %v2074_v45 = vpop.f32.mrf.mxu1  ;;  %v1574_v57 = vpop.f32.mrf.mxu0 }
 0x14e   : > { %v1556_v58 = vpop.f32.mrf.mxu1  ;;  %v927_v59 = vpop.f32.mrf.mxu0 }
 0x14f   : > { %v957_v57 = vadd.f32 %v927_v59, %v871_v41 }
 0x150   : > { %v2076_v60 = vpop.f32.mrf.mxu1  ;;  %v1575_v63 = vpop.f32.mrf.mxu0 }
 0x152   : > { %v1557_v0 = vpop.f32.mrf.mxu1  ;;  %v2078_v2 = vpop.f32.mrf.mxu0 }
 0x154   : > { %v2080_v61 = vpop.f32.mrf.mxu1  ;;  %v1578_v7 = vpop.f32.mrf.mxu0 }
 0x155   : > { %v874_v33 = vadd.f32 %v2080_v61, %v2068_v31 }
 0x156   : > { %v1560_v11 = vpop.f32.mrf.mxu1  ;;  %v2082_v8 = vpop.f32.mrf.mxu0 }
 0x157   : > { %v872_v11 = vadd.f32 %v2074_v45, %v2064_v20 }
 0x158   : > { %v2084_v12 = vpop.f32.mrf.mxu1  ;;  %v1579_v13 = vpop.f32.mrf.mxu0 }
 0x159   : > { %v875_v44 = vadd.f32 %v2084_v12, %v2070_v36 }
 0x15a   : > { %v1561_v3 = vpop.f32.mrf.mxu1  ;;  %v2086_v4 = vpop.f32.mrf.mxu0 }
 0x15c   : > { %v2088_v14 = vpop.f32.mrf.mxu1  ;;  %v1582_v5 = vpop.f32.mrf.mxu0 }
 0x15e   : > { %v1564_v16 = vpop.f32.mrf.mxu1  ;;  %v2090_v18 = vpop.f32.mrf.mxu0 }
 0x15f   : > { %v958_v16 = vadd.f32 %v2078_v2, %v872_v11 }
 0x160   : > { %v865_v21 = vpop.f32.mrf.mxu1  ;;  %v1583_v19 = vpop.f32.mrf.mxu0 }
 0x162   : > { %v1565_v6 = vpop.f32.mrf.mxu1  ;;  %v2092_v17 = vpop.f32.mrf.mxu0 }
 0x164   : > { %v1002_v22 = vpop.f32.mrf.mxu1  ;;  %v1586_v25 = vpop.f32.mrf.mxu0 }
 0x165   : > { %v1040_v34 = vadd.f32 %v1002_v22, %v954_v29  ;;  %v873_v22 = vadd.f32 %v2076_v60, %v2066_v24 }
 0x166   : > { %v1592_v26 = vpop.f32.mrf.mxu1  ;;  %v951_v27 = vpop.f32.mrf.mxu0 }
 0x167   : > { %v959_v27 = vadd.f32 %v2082_v8, %v873_v22 }
 0x168   : > { %v1005_v32 = vpop.f32.mrf.mxu1  ;;  %v1587_v30 = vpop.f32.mrf.mxu0 }
 0x169   : > { %v1041_v43 = vadd.f32 %v1005_v32, %v955_v39  ;;  %v960_v39 = vadd.f32 %v2086_v4, %v874_v33 }
 0x16a   : > { %v1593_v10 = vpop.f32.mrf.mxu1  ;;  %v1088_v38 = vpop.f32.mrf.mxu0 }
 0x16b   : > { %v1126_v40 = vadd.f32 %v1088_v38, %v1040_v34 }
 0x16c   : > { %v1010_v46 = vpop.f32.mrf.mxu1  ;;  %v1614_v56 = vpop.f32.mrf.mxu0 }
 0x16d   : > { %v1142_v47 = vadd.f32 %v2099_v35, %v1126_v40  ;;  %v1042_v9 = vadd.f32 %v1010_v46, %v956_v28 }
 0x16e   : > { %v1596_v48 = vpop.f32.mrf.mxu1  ;;  %v1091_v62 = vpop.f32.mrf.mxu0 }
 0x16f   : > { %v1151_v49 = vmax.f32 %v1142_v47, 0.0  ;;  %v1127_v1 = vadd.f32 %v1091_v62, %v1041_v43  ;;  %v961_v62 = vadd.f32 %v2090_v18, %v875_v44 }
 0x170   : > { %v1013_v37 = vpop.f32.mrf.mxu1  ;;  %v1615_v51 = vpop.f32.mrf.mxu0 }
 0x171   : > { %v1371_v50 = vpack.c.bf16 %v1151_v49, %v1151_v49  ;;  %v1143_v53 = vadd.f32 %v2099_v35, %v1127_v1  ;;  %v1043_v13 = vadd.f32 %v1013_v37, %v957_v57  ;;  %v876_v37 = vadd.f32 %v2088_v14, %v2072_v42 }
 0x172   : > { %v1597_v54 = vpop.f32.mrf.mxu1  ;;  %v1096_v55 = vpop.f32.mrf.mxu0 }
 0x173   : > { %1198 = vst.msk [vmem:[%s2107_s20] sm:$0xf] %vm1197_vm5, %v1371_v50  ;;  %v1152_v58 = vmax.f32 %v1143_v53, 0.0  ;;  %v1128_v63 = vadd.f32 %v1096_v55, %v1042_v9  ;;  %v962_v50 = vadd.f32 %v2092_v17, %v876_v37 }
 0x174   : > { %v1018_v0 = vpop.f32.mrf.mxu1  ;;  %v1618_v7 = vpop.f32.mrf.mxu0 }
 0x175   : > { %v1372_v3 = vpack.c.bf16 %v1152_v58, %v1152_v58  ;;  %v1144_v15 = vadd.f32 %v2099_v35, %v1128_v63  ;;  %v1044_v25 = vadd.f32 %v1018_v0, %v958_v16 }
 0x176   : > { %v1600_v52 = vpop.f32.mrf.mxu1  ;;  %v1099_v5 = vpop.f32.mrf.mxu0 }
 0x177   : > { %1199 = vst.msk [vmem:[%s2107_s20 + $0x4] sm:$0xf] %vm1197_vm5, %v1372_v3  ;;  %v1153_v59 = vmax.f32 %v1144_v15, 0.0  ;;  %v1129_v21 = vadd.f32 %v1099_v5, %v1043_v13 }
 0x178   : > { %v1021_v19 = vpop.f32.mrf.mxu1  ;;  %v1619_v6 = vpop.f32.mrf.mxu0 }
 0x179   : > { %v1373_v20 = vpack.c.bf16 %v1153_v59, %v1153_v59  ;;  %v1145_v45 = vadd.f32 %v2099_v35, %v1129_v21  ;;  %v1045_v34 = vadd.f32 %v1021_v19, %v959_v27 }
 0x17a   : > { %v1601_v23 = vpop.f32.mrf.mxu1  ;;  %v1104_v26 = vpop.f32.mrf.mxu0 }
 0x17b   : > { %1200 = vst.msk [vmem:[%s2107_s20 + $0x8] sm:$0xf] %vm1197_vm5, %v1373_v20  ;;  %v1154_v2 = vmax.f32 %v1145_v45, 0.0  ;;  %v1130_v29 = vadd.f32 %v1104_v26, %v1044_v25 }
 0x17c   : > { %v1026_v32 = vpop.f32.mrf.mxu1  ;;  %v1622_v30 = vpop.f32.mrf.mxu0 }
 0x17d   : > { %v1374_v24 = vpack.c.bf16 %v1154_v2, %v1154_v2  ;;  %v1146_v60 = vadd.f32 %v2099_v35, %v1130_v29  ;;  %v1046_v43 = vadd.f32 %v1026_v32, %v960_v39 }
 0x17e   : > { %v1604_v10 = vpop.f32.mrf.mxu1  ;;  %v1107_v38 = vpop.f32.mrf.mxu0 }
 0x17f   : > { %1201 = vst.msk [vmem:[%s2107_s20 + $0xc] sm:$0xf] %vm1197_vm5, %v1374_v24  ;;  %v1155_v8 = vmax.f32 %v1146_v60, 0.0  ;;  %v1131_v40 = vadd.f32 %v1107_v38, %v1045_v34 }
 0x180   : > { %v1029_v46 = vpop.f32.mrf.mxu1  ;;  %v1623_v56 = vpop.f32.mrf.mxu0 }
 0x181   : > { %v1375_v31 = vpack.c.bf16 %v1155_v8, %v1155_v8  ;;  %v1147_v61 = vadd.f32 %v2099_v35, %v1131_v40  ;;  %v1047_v51 = vadd.f32 %v1029_v46, %v961_v62 }
 0x182   : > { %v1605_v47 = vpop.f32.mrf.mxu1  ;;  %v1112_v48 = vpop.f32.mrf.mxu0 }
 0x183   : > { %1202 = vst.msk [vmem:[%s2107_s20 + $0x10] sm:$0xf] %vm1197_vm5, %v1375_v31  ;;  %v1156_v4 = vmax.f32 %v1147_v61, 0.0  ;;  %v1132_v28 = vadd.f32 %v1112_v48, %v1046_v43 }
 0x184   : > { %v1034_v49 = vpop.f32.mrf.mxu1  ;;  %v1626_v1 = vpop.f32.mrf.mxu0 }
 0x185   : > { %v1376_v36 = vpack.c.bf16 %v1156_v4, %v1156_v4  ;;  %v1148_v12 = vadd.f32 %v2099_v35, %v1132_v28  ;;  %v1048_v57 = vadd.f32 %v1034_v49, %v962_v50 }
 0x186   : > { %v1608_v41 = vpop.f32.mrf.mxu1  ;;  %v1115_v9 = vpop.f32.mrf.mxu0 }
 0x187   : > { %1203 = vst.msk [vmem:[%s2107_s20 + $0x14] sm:$0xf] %vm1197_vm5, %v1376_v36  ;;  %v1157_v18 = vmax.f32 %v1148_v12, 0.0  ;;  %v1133_v53 = vadd.f32 %v1115_v9, %v1047_v51 }
 0x188   : > { %v1037_v54 = vpop.f32.mrf.mxu1  ;;  %v1627_v55 = vpop.f32.mrf.mxu0 }
 0x189   : > { %v1377_v58 = vpack.c.bf16 %v1157_v18, %v1157_v18  ;;  %v1149_v42 = vadd.f32 %v2099_v35, %v1133_v53 }
 0x18a   : > { %v1609_v14 = vpop.f32.mrf.mxu1  ;;  %v1120_v63 = vpop.f32.mrf.mxu0 }
 0x18b   : > { %1204 = vst.msk [vmem:[%s2107_s20 + $0x18] sm:$0xf] %vm1197_vm5, %v1377_v58  ;;  %v1158_v0 = vmax.f32 %v1149_v42, 0.0  ;;  %v1134_v7 = vadd.f32 %v1120_v63, %v1048_v57 }
 0x18c   : > { %v1630_v11 = vpop.f32.mrf.mxu0 }
 0x18d   : > { %v1378_v17 = vpack.c.bf16 %v1158_v0, %v1158_v0  ;;  %v1150_v13 = vadd.f32 %v2099_v35, %v1134_v7 }
 0x18e   : > { %v1123_v3 = vpop.f32.mrf.mxu0 }
 0x18f   : > { %1205 = vst.msk [vmem:[%s2107_s20 + $0x1c] sm:$0xf] %vm1197_vm5, %v1378_v17  ;;  %v1159_v15 = vmax.f32 %v1150_v13, 0.0 }
 0x190   : > { %v1631_v52 = vpop.f32.mrf.mxu0 }
 0x191   : > { %v1379_v5 = vpack.c.bf16 %v1159_v15, %v1159_v15 }
 0x193   : > { %1206 = vst.msk [vmem:[%s2107_s20 + $0x20] sm:$0xf] %vm1197_vm5, %v1379_v5 }
 0x194 PF: > { %s13_s14 = sadd.s32 1, %s1695_s14   ;;  %s2164_s12 = smov %s1691_s13 }
 0x195   : > { %p10_p5 = scmp.ge.s32.totalorder %s13_s14, 4   ;;  %s2165_s13 = smov %s2167_s15 }
 0x197   :  { %12 = sbr.rel (!%p10_p5) target bundleno = 2 (0x2), region = 70 }

// kernel: vae_forward.15
= control target key start
LH: loop header
LB: loop body
LE: loop exit
PB: predicated region body
PF: predicated region fallthrough
CT: control target
= control target key end

     0   :  { %s2122_s12 = smov 0   ;;  %s2124_s13 = smov 0   ;;  %s2761_s0 = inlined_call_operand.vmem [shape: bf16[2,332,8], index: 0, kind: input, shape index: {}]   ;;  %s2762_s1 = inlined_call_operand.vmem [shape: bf16[9,8,4], index: 1, kind: input, shape index: {}]   ;;  %s2763_s2 = inlined_call_operand.vmem [shape: f32[1,4], index: 2, kind: input, shape index: {}]   ;;  %s2764_s3 = inlined_call_operand.vmem [shape: bf16[2,288,4], index: 3, kind: output, shape index: {}]  }
   0x1   :  { %s2126_s14 = smov 0   ;;  %s2128_s15 = smov 0  }
   0x2   :  { %s2130_s16 = smov 0  }
   0x3 LB: > { %s22_s17 = sadd.s32 1, %s2092_s14  ;;  %s25_s18 = sadd.s32 1, %s2096_s15  ;;  %s2100_s16 = sphi %s2130_s16, %s13_s16   ;;  %s2096_s15 = sphi %s2128_s15, %s2809_s15   ;;  %s2092_s14 = sphi %s2126_s14, %s2808_s14   ;;  %s2088_s13 = sphi %s2124_s13, %s2807_s13   ;;  %s2084_s12 = sphi %s2122_s12, %s2806_s12  }
   0x4   : > { %p23_p0 = scmp.ge.s32.totalorder %s22_s17, 3  ;;  %p1656_p1 = scmp.ge.s32.totalorder %s2100_s16, 1 }
   0x5   : > { %p151_p2 = scmp.lt.s32.totalorder %s2100_s16, 7 }
   0x6   : > { %s2811_s17 = smov (%p23_p0, %s22_s17), 0  ;;  %s2813_s18 = smov (!%p23_p0, %s25_s18), %s2096_s15 }
   0x7   : > { %p152_p3 = pnand %p1656_p1, %p151_p2  ;;  %p27_p4 = scmp.ge.s32.totalorder %s2813_s18, 2 }
   0x9   : > { %s2815_s18 = smov (%p27_p4, %s2813_s18), 0  ;;  %155 = sbr.rel (%p152_p3) target bundleno = 377 (0x179), region = 32 }
   0xe   : > { %v1667_v0 = vld [vmem:[%s2762_s1 + $0x4] sm:$0xf]  ;;  %vm316_vm0 = vcmask 1043456   ;;  %p179_p5 = scmp.lt.s32.totalorder %s2088_s13, 1  ;;  %s195_s21 = smul.u32 96, %s2084_s12  ;;  %vm297_vm2 = vcmask 64512  }
   0xf   : > { %1952 = vmatprep.subr.msk.bf16.mxu1 %vm316_vm0, %v1667_v0  ;;  %v318_v1 = vsel %vm316_vm0, %v1667_v0, 0  ;;  %v240_v2 = vld [vmem:[%s2762_s1] sm:$0xf]  ;;  %1951 = vmatprep.subr.msk.bf16.mxu0 %vm316_vm0, %v1667_v0  ;;  %v1680_v3 = vld [vmem:[%s2762_s1 + $0x8] sm:$0xf]  ;;  %vm506_vm3 = vcmask 1046528  }
  0x10   : > { %1950 = vmatpush3.bf16.msra.mxu1 %v318_v1  ;;  %s2817_s13 = smov (!%p179_p5, %s2088_s13), 1  ;;  %1824 = vmatpush3.bf16.msra.mxu0 %v318_v1  ;;  %s196_s26 = sshra.s32 %s195_s21, 3  ;;  %vm244_vm1 = vsmask.f32 7424  ;;  %v414_v31 = vsel %vm316_vm0, %v240_v2, 0  ;;  %v539_v39 = vsel %vm316_vm0, %v1680_v3, 0 }
  0x11   : > { %1953 = vmatprep.subr.msk.bf16.mxu1 %vm316_vm0, %v240_v2  ;;  %1954 = vmatprep.subr.msk.bf16.mxu0 %vm316_vm0, %v1680_v3  ;;  %s1961_s27 = smul.u32 168, %s2817_s13  ;;  %s1659_s28 = sshll.u32 %s196_s26, 2  ;;  %v1689_v41 = vld [vmem:[%s2762_s1 + $0xc] sm:$0xf]  ;;  %v1696_v48 = vld [vmem:[%s2762_s1 + $0x10] sm:$0xf] }
  0x12   : > { %v805_v54 = vsel %vm316_vm0, %v1696_v48, 0  ;;  %v2273_v56 = vld [vmem:[%s2762_s1 + $0x18] sm:$0xf]  ;;  %v651_v59 = vsel %vm316_vm0, %v1689_v41, 0  ;;  %v2289_v61 = vld [vmem:[%s2762_s1 + $0x14] sm:$0xf] }
  0x13   : > { %s183_s4 = scalar_lea.vmem %s2761_s0, %s1961_s27  ;;  %vm1298_vm4 = vcmask 1044480   ;;  %vm1144_vm5 = vsmask.f32 5376  ;;  %vm748_vm6 = vsmask.f32 6400  ;;  %vm902_vm7 = vcmask 1045504  }
  0x14   : > { %s2175_s5 = scalar_lea.vmem %s183_s4, %s1659_s28  ;;  %s184_s27 = smul.u32 12, %s2084_s12  ;;  %vm1553_vm8 = vcmask 27648  }
  0x15   : > { %v2178_v4 = vld [vmem:[%s2175_s5 + $0x10] sm:$0xff]   ;;  %v2181_v5 = vld [vmem:[%s2175_s5 + $0x18] sm:$0xff]   ;;  %v2184_v6 = vld [vmem:[%s2175_s5 + $0x20] sm:$0xff]   ;;  %s1962_s29 = smul.u32 36, %s2817_s13 }
  0x16   : > { %v2187_v7 = vshll.u32 %v2178_v4, 16  ;;  %v2190_v8 = vshrl.u32 %v2178_v4, 16  ;;  %v2193_v9 = vshll.u32 %v2181_v5, 16  ;;  %v2196_v10 = vshrl.u32 %v2181_v5, 16  ;;  %v2006_v12 = vld [vmem:[%s2175_s5] sm:$0xff]   ;;  %v2205_v15 = vld [vmem:[%s2175_s5 + $0x8] sm:$0xff]  }
  0x17   : > { %v2199_v11 = vshll.u32 %v2184_v6, 16  ;;  %v246_v17 = vshrl.u32 %v2006_v12, 16  ;;  %v248_v18 = vshll.u32 %v2006_v12, 16  ;;  %v2209_v19 = vld [vmem:[%s2175_s5 + $0x28] sm:$0xff]   ;;  %v253_v22 = vshll.u32 %v2205_v15, 16  ;;  %p2706_p6 = scmp.lt.s32.totalorder %s184_s27, 35 }
  0x18   : > { %v263_v13 = vrot.slane %v2187_v7, 1  ;;  %v271_v14 = vrot.slane %v2193_v9, 1  ;;  %v257_v23 = vshrl.u32 %v2205_v15, 16  ;;  %v2216_v24 = vld [vmem:[%s2175_s5 + $0x30] sm:$0xf]  ;;  %v2219_v26 = vshrl.u32 %v2184_v6, 16 }
  0x19   : > { %v279_v16 = vrot.slane %v2199_v11, 1  ;;  %v250_v25 = vrot.slane %v248_v18, 1  ;;  %v2222_v27 = vshll.u32 %v2209_v19, 16  ;;  %v2226_v28 = vcombine.low %v2216_v24, %v2216_v24  ;;  %s2819_s27 = smov (!%p2706_p6, %s184_s27), 35 }
  0x1a   : > { %v267_v20 = vor.u32 %v2190_v8, %v263_v13  ;;  %v275_v21 = vor.u32 %v2196_v10, %v271_v14  ;;  %v255_v32 = vrot.slane %v253_v22, 1  ;;  %v2235_v36 = vshrl.u32 %v2209_v19, 16  ;;  %s190_s30 = sadd.s32 %s1962_s29, %s2819_s27 }
  0x1b   : > { %v251_v33 = vor.u32 %v250_v25, %v246_v17  ;;  %v283_v34 = vor.u32 %v2219_v26, %v279_v16  ;;  %v287_v35 = vrot.slane %v2222_v27, 1  ;;  %v293_v38 = vshll.u32 %v2226_v28, 16  ;;  %v213_v25 = vld [vmem:[%s2175_s5 + $0x34] sm:$0xf]  ;;  %s1658_s13 = sshll.u32 %s190_s30, 2 }
  0x1c   : > { %v272_v29 = vsel %vm244_vm1, %v267_v20, %v271_v14  ;;  %v280_v30 = vsel %vm244_vm1, %v275_v21, %v279_v16  ;;  %v259_v37 = vor.u32 %v257_v23, %v255_v32  ;;  %v507_v40 = vrot.slane %v2006_v12, 1 }
  0x1d   : > { %1829 = vmatprep.mubr.msk.bf16.mxu1 %vm297_vm2, %v272_v29  ;;  %v256_v42 = vsel %vm244_vm1, %v251_v33, %v255_v32  ;;  %v288_v43 = vsel %vm244_vm1, %v283_v34, %v287_v35  ;;  %v291_v44 = vor.u32 %v2235_v36, %v287_v35  ;;  %v508_v45 = vrot.slane %v2205_v15, 1 }
  0x1e   : > { %1830 = vmatmul.mubr.msk.bf16.vlgmr.msra.gmra.mxu1 %vm297_vm2, %v280_v30  ;;  %1825 = vmatprep.mubr.msk.bf16.mxu0 %vm297_vm2, %v256_v42  ;;  %v264_v46 = vsel %vm244_vm1, %v259_v37, %v263_v13  ;;  %v295_v47 = vrot.slane %v293_v38, 1  ;;  %v510_v50 = vrot.slane %v2178_v4, 1  ;;  %v512_v52 = vrot.slane %v2181_v5, 1 }
  0x1f   : > { %1838 = vmatpush3.bf16.msra.mxu1 %v414_v31  ;;  %1833 = vmatprep.mubr.msk.bf16.mxu1 %vm297_vm2, %v288_v43  ;;  %v509_v49 = vsel %vm506_vm3, %v507_v40, %v508_v45  ;;  %v514_v57 = vrot.slane %v2184_v6, 1  ;;  %v2281_v58 = vrot.slane %v2209_v19, 1  ;;  %v750_v60 = vrot.slane %v253_v22, 2 }
  0x20   : > { %1826 = vmatmul.mubr.msk.bf16.vlgmr.msra.gmra.mxu0 %vm297_vm2, %v264_v46  ;;  %1955 = vmatprep.subr.msk.bf16.mxu1 %vm316_vm0, %v1689_v41  ;;  %v296_v51 = vsel %vm244_vm1, %v291_v44, %v295_v47  ;;  %v2263_v53 = vsel %vm506_vm3, %v508_v45, %v510_v50  ;;  %v2268_v55 = vsel %vm506_vm3, %v510_v50, %v512_v52  ;;  %v749_v63 = vrot.slane %v257_v23, 1 }
  0x21   : > { %1852 = vmatpush3.bf16.msra.mxu0 %v539_v39  ;;  %1853 = vmatprep.mubr.msk.bf16.mxu0 %vm297_vm2, %v509_v49  ;;  %v2294_v62 = vsel %vm506_vm3, %v512_v52, %v514_v57  ;;  %v752_v0 = vrot.slane %v2190_v8, 1  ;;  %v753_v1 = vrot.slane %v2187_v7, 2  ;;  %v2302_v2 = vsel %vm506_vm3, %v514_v57, %v2281_v58 }
  0x22   : > { %1956 = vmatprep.subr.msk.bf16.mxu0 %vm316_vm0, %v1696_v48  ;;  %v1299_v3 = vrot.slane %v2178_v4, 3  ;;  %v1302_v13 = vrot.slane %v2184_v6, 3  ;;  %v1145_v14 = vrot.slane %v2190_v8, 2  ;;  %v1146_v16 = vrot.slane %v2187_v7, 3 }
  0x23   : > { %v518_v17 = vrot.slane %v2226_v28, 1  ;;  %v1148_v20 = vrot.slane %v2196_v10, 2  ;;  %v1149_v21 = vrot.slane %v2193_v9, 3  ;;  %v751_v22 = vor.u32 %v750_v60, %v749_v63 }
  0x24   : > { %v754_v23 = vor.u32 %v753_v1, %v752_v0  ;;  %v1147_v7 = vor.u32 %v1146_v16, %v1145_v14  ;;  %v1152_v28 = vrot.slane %v2219_v26, 2  ;;  %v1153_v30 = vrot.slane %v2199_v11, 3  ;;  %v1719_v0 = vld [vmem:[%s2762_s1 + $0x1c] sm:$0xf] }
  0x25   : > { %v1150_v29 = vor.u32 %v1149_v21, %v1148_v20  ;;  %v1304_v31 = vrot.slane %v2209_v19, 3  ;;  %v1156_v32 = vrot.slane %v2235_v36, 2  ;;  %v1157_v33 = vrot.slane %v2222_v27, 3 }
  0x26   : > { %1834 = vmatmul.mubr.msk.bf16.gmra.mxu1 %vm297_vm2, %v296_v51  ;;  %v757_v34 = vrot.slane %v2193_v9, 2  ;;  %v1154_v37 = vor.u32 %v1153_v30, %v1152_v28  ;;  %v2340_v39 = vcombine.low %v2216_v24, %v213_v25  ;;  %v519_v40 = vsel %vm506_vm3, %v2281_v58, %v518_v17 }
  0x27   : > { %1839 = vmatprep.mubr.msk.bf16.mxu1 %vm297_vm2, %v2006_v12  ;;  %v1300_v12 = vrot.slane %v2181_v5, 3  ;;  %v2332_v35 = vsel %vm1144_vm5, %v1147_v7, %v1150_v29  ;;  %v2337_v38 = vsel %vm1298_vm4, %v1302_v13, %v1304_v31  ;;  %v756_v9 = vrot.slane %v2196_v10, 1 }
  0x28   : > { %1854 = vmatmul.mubr.msk.bf16.vlgmr.msra.gmra.mxu0 %vm297_vm2, %v2263_v53  ;;  %v2347_v41 = vor.u32 %v1157_v33, %v1156_v32  ;;  %v755_v42 = vsel %vm748_vm6, %v751_v22, %v754_v23  ;;  %v760_v43 = vrot.slane %v2219_v26, 1  ;;  %v761_v24 = vrot.slane %v2199_v11, 2  ;;  %v214_v26 = vld [vmem:[%s2175_s5 + $0x38] sm:$0xf] }
  0x29   : > { %1880 = vmatpush3.bf16.msra.mxu0 %v805_v54  ;;  %1857 = vmatprep.mubr.msk.bf16.mxu0 %vm297_vm2, %v2268_v55  ;;  %v2315_v18 = vsel %vm1298_vm4, %v1299_v3, %v1300_v12  ;;  %v2322_v8 = vsel %vm1298_vm4, %v1300_v12, %v1302_v13  ;;  %v2355_v44 = vsel %vm1144_vm5, %v1150_v29, %v1154_v37  ;;  %v769_v47 = vshrl.u32 %v2340_v39, 16  ;;  %v2013_v33 = vld [vmem:[%s2175_s5 + $0x40] ss:$0 sps:$4 sm:$0x77]  }
  0x2a   : > { %1958 = vmatprep.subr.msk.bf16.mxu0 %vm316_vm0, %v2273_v56  ;;  %v2359_v45 = vsel %vm1144_vm5, %v1154_v37, %v2347_v41  ;;  %v758_v10 = vor.u32 %v757_v34, %v756_v9  ;;  %v762_v46 = vor.u32 %v761_v24, %v760_v43  ;;  %v772_v48 = vshll.u32 %v2340_v39, 16 }
  0x2b   : > { %v764_v49 = vrot.slane %v2235_v36, 1  ;;  %v765_v50 = vrot.slane %v2222_v27, 2  ;;  %v2371_v51 = vcombine.low %v214_v26, %v214_v26  ;;  %v1047_v52 = vsel %vm316_vm0, %v2273_v56, 0  ;;  %v1726_v27 = vld [vmem:[%s2762_s1 + $0x20] sm:$0xf] }
  0x2c   : > { %v759_v11 = vsel %vm748_vm6, %v754_v23, %v758_v10  ;;  %v763_v54 = vsel %vm748_vm6, %v758_v10, %v762_v46  ;;  %v771_v57 = vrot.slane %v769_v47, 1  ;;  %v935_v63 = vsel %vm316_vm0, %v2289_v61, 0  ;;  %v215_v23 = vld [vmem:[%s2175_s5 + $0x3c] sm:$0xf]  ;;  %s2720_s5 = scalar_lea.vmem %s2764_s3, %s1658_s13 }
  0x2d   : > { %v766_v36 = vor.u32 %v765_v50, %v764_v49  ;;  %v781_v56 = vshll.u32 %v2371_v51, 16  ;;  %v640_v14 = vrot.slane %v2340_v39, 1  ;;  %v906_v16 = vrot.slane %v2181_v5, 2 }
  0x2e   : > { %1840 = vmatmul.mubr.msk.bf16.vlgmr.msra.gmra.mxu1 %vm297_vm2, %v2205_v15  ;;  %v642_v20 = vrot.slane %v2371_v51, 1  ;;  %v1710_v29 = vcombine.low %v214_v26, %v215_v23  ;;  %v1201_v30 = vsel %vm316_vm0, %v1719_v0, 0  ;;  %v1038_v37 = vrot.slane %v2013_v33, 2 }
  0x2f   : > { %1866 = vmatpush3.bf16.msra.mxu1 %v651_v59  ;;  %1843 = vmatprep.mubr.msk.bf16.mxu1 %vm297_vm2, %v2178_v4  ;;  %v774_v59 = vrot.slane %v772_v48, 2  ;;  %v767_v1 = vsel %vm748_vm6, %v762_v46, %v766_v36  ;;  %v783_v12 = vrot.slane %v781_v56, 2  ;;  %v641_v17 = vsel %vm506_vm3, %v2281_v58, %v640_v14 }
  0x30   : > { %1957 = vmatprep.subr.msk.bf16.mxu1 %vm316_vm0, %v2289_v61  ;;  %1858 = vmatmul.mubr.msk.bf16.gmra.mxu0 %vm297_vm2, %v2294_v62  ;;  %v643_v58 = vsel %vm506_vm3, %v640_v14, %v642_v20  ;;  %v1036_v28 = vrot.slane %v1710_v29, 2  ;;  %v914_v9 = vrot.slane %v2371_v51, 2  ;;  %v1165_v43 = vshrl.u32 %v1710_v29, 16 }
  0x31   : > { %1861 = vmatprep.mubr.msk.bf16.mxu0 %vm297_vm2, %v2302_v2  ;;  %v775_v60 = vor.u32 %v774_v59, %v771_v57  ;;  %v1168_v24 = vshll.u32 %v1710_v29, 16  ;;  %v1306_v10 = vrot.slane %v2340_v39, 3  ;;  %v1161_v46 = vrot.slane %v772_v48, 3 }
  0x32   : > { %v1308_v26 = vrot.slane %v1710_v29, 3  ;;  %v1177_v50 = vshll.u32 %v2013_v33, 16  ;;  %v1310_v48 = vrot.slane %v2013_v33, 3 }
  0x33   : > { %v776_v13 = vsel %vm748_vm6, %v766_v36, %v775_v60  ;;  %v1170_v49 = vrot.slane %v1168_v24, 3 }
  0x36   : > { %1844 = vmatmul.mubr.msk.bf16.gmra.mxu1 %vm297_vm2, %v2181_v5  ;;  %v908_v5 = vrot.slane %v2184_v6, 2 }
  0x37   : > { %1847 = vmatprep.mubr.msk.bf16.mxu1 %vm297_vm2, %v2184_v6  ;;  %v912_v6 = vrot.slane %v2340_v39, 2 }
  0x38   : > { %1862 = vmatmul.mubr.msk.bf16.gmra.mxu0 %vm297_vm2, %v519_v40  ;;  %v909_v7 = vsel %vm902_vm7, %v906_v16, %v908_v5  ;;  %v1039_v40 = vsel %vm902_vm7, %v1036_v28, %v1038_v37 }
  0x39   : > { %1881 = vmatprep.mubr.msk.bf16.mxu0 %vm297_vm2, %v755_v42  ;;  %v1037_v34 = vsel %vm902_vm7, %v912_v6, %v1036_v28  ;;  %v915_v42 = vsel %vm902_vm7, %v912_v6, %v914_v9 }
  0x3e   : > { %1848 = vmatmul.mubr.msk.bf16.gmra.mxu1 %vm297_vm2, %v2209_v19 }
  0x3f   : > { %1867 = vmatprep.mubr.msk.bf16.mxu1 %vm297_vm2, %v2263_v53  ;;  %v778_v53 = vshrl.u32 %v2371_v51, 16  ;;  %v1179_v51 = vrot.slane %v1177_v50, 3 }
  0x40   : > { %1882 = vmatmul.mubr.msk.bf16.vlgmr.msra.gmra.mxu0 %vm297_vm2, %v759_v11  ;;  %v1167_v11 = vrot.slane %v1165_v43, 2 }
  0x41   : > { %1908 = vmatpush3.bf16.msra.mxu0 %v1047_v52  ;;  %1885 = vmatprep.mubr.msk.bf16.mxu0 %vm297_vm2, %v763_v54  ;;  %v780_v3 = vrot.slane %v778_v53, 1 }
  0x42   : > { %1960 = vmatprep.subr.msk.bf16.mxu0 %vm316_vm0, %v1726_v27  ;;  %v1171_v39 = vor.u32 %v1170_v49, %v1167_v11 }
  0x43   : > { %v784_v61 = vor.u32 %v783_v12, %v780_v3 }
  0x46   : > { %1868 = vmatmul.mubr.msk.bf16.vlgmr.msra.gmra.mxu1 %vm297_vm2, %v2268_v55  ;;  %v904_v55 = vrot.slane %v2178_v4, 2  ;;  %v903_v4 = vrot.slane %v2205_v15, 2  ;;  %v1331_v15 = vsel %vm316_vm0, %v1726_v27, 0 }
  0x47   : > { %1894 = vmatpush3.bf16.msra.mxu1 %v935_v63  ;;  %1871 = vmatprep.mubr.msk.bf16.mxu1 %vm297_vm2, %v2294_v62  ;;  %v785_v62 = vsel %vm748_vm6, %v775_v60, %v784_v61 }
  0x48   : > { %1959 = vmatprep.subr.msk.bf16.mxu1 %vm316_vm0, %v1719_v0  ;;  %1886 = vmatmul.mubr.msk.bf16.gmra.mxu0 %vm297_vm2, %v767_v1  ;;  %v907_v21 = vsel %vm902_vm7, %v904_v55, %v906_v16  ;;  %v905_v22 = vsel %vm902_vm7, %v903_v4, %v904_v55 }
  0x49   : > { %1889 = vmatprep.mubr.msk.bf16.mxu0 %vm297_vm2, %v776_v13 }
  0x4e   : > { %1872 = vmatmul.mubr.msk.bf16.gmra.mxu1 %vm297_vm2, %v2302_v2  ;;  %v910_v2 = vrot.slane %v2209_v19, 2 }
  0x4f   : > { %1875 = vmatprep.mubr.msk.bf16.mxu1 %vm297_vm2, %v641_v17 }
  0x50   : > { %1890 = vmatmul.mubr.msk.bf16.gmra.mxu0 %vm297_vm2, %v785_v62  ;;  %v911_v25 = vsel %vm902_vm7, %v908_v5, %v910_v2  ;;  %v913_v32 = vsel %vm902_vm7, %v910_v2, %v912_v6 }
  0x51   : > { %1909 = vmatprep.mubr.msk.bf16.mxu0 %vm297_vm2, %v907_v21 }
  0x56   : > { %1876 = vmatmul.mubr.msk.bf16.gmra.mxu1 %vm297_vm2, %v643_v58 }
  0x57   : > { %1895 = vmatprep.mubr.msk.bf16.mxu1 %vm297_vm2, %v905_v22 }
  0x58   : > { %1910 = vmatmul.mubr.msk.bf16.vlgmr.msra.gmra.mxu0 %vm297_vm2, %v909_v7 }
  0x59   : > { %1936 = vmatpush3.bf16.msra.mxu0 %v1331_v15  ;;  %1913 = vmatprep.mubr.msk.bf16.mxu0 %vm297_vm2, %v911_v25 }
  0x5e   : > { %1896 = vmatmul.mubr.msk.bf16.vlgmr.msra.gmra.mxu1 %vm297_vm2, %v907_v21 }
  0x5f   : > { %1922 = vmatpush3.bf16.msra.mxu1 %v1201_v30  ;;  %1899 = vmatprep.mubr.msk.bf16.mxu1 %vm297_vm2, %v909_v7 }
  0x60   : > { %1914 = vmatmul.mubr.msk.bf16.gmra.mxu0 %vm297_vm2, %v913_v32 }
  0x61   : > { %1917 = vmatprep.mubr.msk.bf16.mxu0 %vm297_vm2, %v1037_v34 }
  0x66   : > { %1900 = vmatmul.mubr.msk.bf16.gmra.mxu1 %vm297_vm2, %v911_v25 }
  0x67   : > { %1903 = vmatprep.mubr.msk.bf16.mxu1 %vm297_vm2, %v913_v32 }
  0x68   : > { %1918 = vmatmul.mubr.msk.bf16.gmra.mxu0 %vm297_vm2, %v1039_v40 }
  0x69   : > { %1937 = vmatprep.mubr.msk.bf16.mxu0 %vm297_vm2, %v2315_v18  ;;  %v1160_v18 = vrot.slane %v769_v47, 2  ;;  %v1174_v47 = vshrl.u32 %v2013_v33, 16 }
  0x6b   : > { %v1176_v19 = vrot.slane %v1174_v47, 2 }
  0x6d   : > { %v1180_v52 = vor.u32 %v1179_v51, %v1176_v19 }
  0x6e   : > { %1904 = vmatmul.mubr.msk.bf16.gmra.mxu1 %vm297_vm2, %v915_v42 }
  0x6f   : > { %1923 = vmatprep.mubr.msk.bf16.mxu1 %vm297_vm2, %v2332_v35  ;;  %v1162_v35 = vor.u32 %v1161_v46, %v1160_v18  ;;  %v1181_v54 = vsel %vm1144_vm5, %v1171_v39, %v1180_v52 }
  0x70   : > { %1938 = vmatmul.mubr.msk.bf16.vlgmr.msra.gmra.mxu0 %vm297_vm2, %v2322_v8  ;;  %v1307_v8 = vsel %vm1298_vm4, %v1304_v31, %v1306_v10 }
  0x71   : > { %1941 = vmatprep.mubr.msk.bf16.mxu0 %vm297_vm2, %v2337_v38  ;;  %v1309_v38 = vsel %vm1298_vm4, %v1306_v10, %v1308_v26  ;;  %v1172_v31 = vsel %vm1144_vm5, %v1162_v35, %v1171_v39 }
  0x76   : > { %1924 = vmatmul.mubr.msk.bf16.vlgmr.msra.gmra.mxu1 %vm297_vm2, %v2355_v44  ;;  %v1163_v44 = vsel %vm1144_vm5, %v2347_v41, %v1162_v35 }
  0x77   : > { %1927 = vmatprep.mubr.msk.bf16.mxu1 %vm297_vm2, %v2359_v45  ;;  %v1311_v45 = vsel %vm1298_vm4, %v1308_v26, %v1310_v48 }
  0x78   : > { %1942 = vmatmul.mubr.msk.bf16.gmra.mxu0 %vm297_vm2, %v1307_v8 }
  0x79   : > { %1945 = vmatprep.mubr.msk.bf16.mxu0 %vm297_vm2, %v1309_v38 }
  0x7e   : > { %1928 = vmatmul.mubr.msk.bf16.gmra.mxu1 %vm297_vm2, %v1163_v44 }
  0x7f   : > { %1931 = vmatprep.mubr.msk.bf16.mxu1 %vm297_vm2, %v1172_v31 }
  0x80   : > { %1946 = vmatmul.mubr.msk.bf16.gmra.mxu0 %vm297_vm2, %v1311_v45 }
  0x86   : > { %1932 = vmatmul.mubr.msk.bf16.gmra.mxu1 %vm297_vm2, %v1181_v54 }
  0xde   : > { %v2478_v57 = vpop.f32.mrf.mxu1 }
  0xe0   : > { %v2480_v41 = vpop.f32.mrf.mxu1  ;;  %v2482_v59 = vpop.f32.mrf.mxu0 }
  0xe2   : > { %v2484_v27 = vpop.f32.mrf.mxu1  ;;  %v2486_v36 = vpop.f32.mrf.mxu0 }
  0xe4   : > { %v2488_v53 = vpop.f32.mrf.mxu1  ;;  %v2490_v56 = vpop.f32.mrf.mxu0 }
  0xe6   : > { %v2492_v60 = vpop.f32.mrf.mxu1  ;;  %v2494_v63 = vpop.f32.mrf.mxu0 }
  0xe8   : > { %v2496_v0 = vpop.f32.mrf.mxu1  ;;  %v2498_v1 = vpop.f32.mrf.mxu0 }
  0xea   : > { %v2500_v3 = vpop.f32.mrf.mxu1  ;;  %v2502_v12 = vpop.f32.mrf.mxu0 }
  0xec   : > { %v2504_v13 = vpop.f32.mrf.mxu1  ;;  %v2506_v14 = vpop.f32.mrf.mxu0 }
  0xee   : > { %v1841_v61 = vpop.f32.mrf.mxu1  ;;  %v2508_v55 = vpop.f32.mrf.mxu0 }
  0xf0   : > { %v450_v16 = vpop.f32.mrf.mxu1  ;;  %v2510_v17 = vpop.f32.mrf.mxu0 }
  0xf2   : > { %v1842_v62 = vpop.f32.mrf.mxu1  ;;  %v2512_v20 = vpop.f32.mrf.mxu0 }
  0xf4   : > { %v453_v21 = vpop.f32.mrf.mxu1  ;;  %v2514_v4 = vpop.f32.mrf.mxu0 }
  0xf6   : > { %v2516_v5 = vpop.f32.mrf.mxu1  ;;  %v2518_v58 = vpop.f32.mrf.mxu0 }
  0xf8   : > { %v2520_v2 = vpop.f32.mrf.mxu1  ;;  %v2522_v22 = vpop.f32.mrf.mxu0 }
  0xfa   : > { %v2524_v23 = vpop.f32.mrf.mxu1  ;;  %v2526_v7 = vpop.f32.mrf.mxu0 }
  0xfc   : > { %v2528_v15 = vpop.f32.mrf.mxu1  ;;  %v2530_v25 = vpop.f32.mrf.mxu0 }
  0xfe   : > { %v2532_v29 = vpop.f32.mrf.mxu1  ;;  %v2534_v6 = vpop.f32.mrf.mxu0 }
  0xff   : > { %2765 = vst [vmem:[#allocation2_spill] sm:$0xff] %v2534_v6 }
 0x100   : > { %v2536_v28 = vpop.f32.mrf.mxu1  ;;  %v1883_v30 = vpop.f32.mrf.mxu0 }
 0x102   : > { %v2538_v32 = vpop.f32.mrf.mxu1  ;;  %v2540_v33 = vpop.f32.mrf.mxu0 }
 0x104   : > { %v2542_v34 = vpop.f32.mrf.mxu1  ;;  %v2544_v37 = vpop.f32.mrf.mxu0 }
 0x106   : > { %v1869_v40 = vpop.f32.mrf.mxu1  ;;  %v2546_v9 = vpop.f32.mrf.mxu0 }
 0x108   : > { %v687_v42 = vpop.f32.mrf.mxu1  ;;  %v2548_v43 = vpop.f32.mrf.mxu0 }
 0x109   : > { %2766 = vst [vmem:[#allocation3_spill] sm:$0xff] %v2548_v43 }
 0x10a   : > { %v1870_v24 = vpop.f32.mrf.mxu1  ;;  %v2550_v10 = vpop.f32.mrf.mxu0 }
 0x10b   : > { %2767 = vst [vmem:[#allocation4_spill] sm:$0xff] %v2550_v10  ;;  %v459_v10 = vadd.f32 %v1841_v61, %v2482_v59  ;;  %v454_v59 = vadd.f32 %v453_v21, %v2494_v63  ;;  %v467_v63 = vadd.f32 %v2520_v2, %v2480_v41  ;;  %v491_v41 = vadd.f32 %v2532_v29, %v2492_v60 }
 0x10c   : > { %v690_v18 = vpop.f32.mrf.mxu1  ;;  %v2552_v46 = vpop.f32.mrf.mxu0 }
 0x10d   : > { %2768 = vst [vmem:[#allocation5_spill] sm:$0xff] %v2552_v46 }
 0x10e   : > { %v2554_v26 = vpop.f32.mrf.mxu1  ;;  %v2556_v11 = vpop.f32.mrf.mxu0 }
 0x10f   : > { %2769 = vst [vmem:[#allocation6_spill] sm:$0xff] %v2556_v11 }
 0x110   : > { %v2558_v49 = vpop.f32.mrf.mxu1  ;;  %v2560_v8 = vpop.f32.mrf.mxu0 }
 0x111   : > { %2770 = vst [vmem:[#allocation7_spill] sm:$0xff] %v2560_v8 }
 0x112   : > { %v2562_v35 = vpop.f32.mrf.mxu1  ;;  %v2564_v38 = vpop.f32.mrf.mxu0 }
 0x113   : > { %2771 = vst [vmem:[#allocation8_spill] sm:$0xff] %v2564_v38 }
 0x114   : > { %v2566_v47 = vpop.f32.mrf.mxu1  ;;  %v2568_v50 = vpop.f32.mrf.mxu0 }
 0x115   : > { %2772 = vst [vmem:[#allocation9_spill] sm:$0xff] %v2568_v50 }
 0x116   : > { %v2570_v39 = vpop.f32.mrf.mxu1  ;;  %v2572_v48 = vpop.f32.mrf.mxu0 }
 0x117   : > { %2773 = vst [vmem:[#allocation10_spill] sm:$0xff] %v2572_v48 }
 0x118   : > { %v2574_v44 = vpop.f32.mrf.mxu1  ;;  %v1911_v19 = vpop.f32.mrf.mxu0 }
 0x119   : > { %2774 = vst [vmem:[#allocation11_spill] sm:$0xff] %v2574_v44 }
 0x11a   : > { %v2576_v51 = vpop.f32.mrf.mxu1  ;;  %v2578_v31 = vpop.f32.mrf.mxu0 }
 0x11b   : > { %2775 = vst [vmem:[#allocation12_spill] sm:$0xff] %v2576_v51 }
 0x11c   : > { %v2580_v45 = vpop.f32.mrf.mxu1  ;;  %v2582_v52 = vpop.f32.mrf.mxu0 }
 0x11d   : > { %2776 = vst [vmem:[#allocation13_spill] sm:$0xff] %v2580_v45  ;;  %2777 = vst [vmem:[#allocation14_spill] sm:$0xff] %v2582_v52  ;;  %v451_v45 = vadd.f32 %v450_v16, %v2486_v36 }
 0x11e   : > { %v1897_v54 = vpop.f32.mrf.mxu1  ;;  %v2584_v38 = vpop.f32.mrf.mxu0 }
 0x11f   : > { %2778 = vst [vmem:[#allocation15_spill] sm:$0xff] %v2584_v38  ;;  %v462_v38 = vadd.f32 %v1842_v62, %v2490_v56  ;;  %v475_v56 = vadd.f32 %v2516_v5, %v2478_v57 }
 0x120   : > { %v971_v8 = vpop.f32.mrf.mxu1  ;;  %v2586_v50 = vpop.f32.mrf.mxu0 }
 0x121   : > { %2779 = vst [vmem:[#allocation16_spill] sm:$0xff] %v2586_v50  ;;  %v624_v50 = vadd.f32 %v2498_v1, %v459_v10  ;;  %v628_v2 = vadd.f32 %v2510_v17, %v475_v56 }
 0x122   : > { %v1898_v11 = vpop.f32.mrf.mxu1  ;;  %v2588_v46 = vpop.f32.mrf.mxu0 }
 0x123   : > { %2780 = vst [vmem:[#allocation17_spill] sm:$0xff] %v2588_v46  ;;  %v736_v61 = vadd.f32 %v1869_v40, %v624_v50  ;;  %v740_v60 = vadd.f32 %v2554_v26, %v628_v2  ;;  %v2785_v50 = vld [vmem:[#allocation11_spill] sm:$0xff] }
 0x124   : > { %v974_v48 = vpop.f32.mrf.mxu1  ;;  %v2591_v43 = vpop.f32.mrf.mxu0 }
 0x125   : > { %2781 = vst [vmem:[#allocation18_spill] sm:$0xff] %v2591_v43  ;;  %v622_v43 = vadd.f32 %v2502_v12, %v451_v45  ;;  %v623_v12 = vadd.f32 %v2508_v55, %v454_v59  ;;  %v890_v21 = vadd.f32 %v1883_v30, %v736_v61  ;;  %v483_v55 = vadd.f32 %v2536_v28, %v2496_v0  ;;  %v2786_v45 = vld [vmem:[#allocation2_spill] sm:$0xff] }
 0x126   : > { %v2593_v51 = vpop.f32.mrf.mxu1  ;;  %v2596_v6 = vpop.f32.mrf.mxu0  ;;  %v2794_v2 = vld [vmem:[#allocation15_spill] sm:$0xff] }
 0x127   : > { %2782 = vst [vmem:[#allocation19_spill] sm:$0xff] %v2593_v51  ;;  %2783 = vst [vmem:[#allocation20_spill] sm:$0xff] %v2596_v6  ;;  %v734_v16 = vadd.f32 %v687_v42, %v622_v43  ;;  %v625_v6 = vadd.f32 %v2506_v14, %v462_v38  ;;  %v478_v42 = vadd.f32 %v2524_v23, %v2484_v27 }
 0x128   : > { %v2598_v52 = vpop.f32.mrf.mxu1  ;;  %v2602_v44 = vpop.f32.mrf.mxu0  ;;  %v470_v14 = vadd.f32 %v2528_v15, %v2488_v53  ;;  %v735_v57 = vadd.f32 %v690_v18, %v623_v12  ;;  %v1020_v5 = vadd.f32 %v1897_v54, %v890_v21  ;;  %v494_v27 = vadd.f32 %v2538_v32, %v2500_v3  ;;  %v2787_v54 = vld [vmem:[#allocation3_spill] sm:$0xff]  ;;  %v2792_v21 = vld [vmem:[#allocation5_spill] sm:$0xff] }
 0x129   : > { %2784 = vst [vmem:[#allocation21_spill] sm:$0xff] %v2598_v52  ;;  %v737_v62 = vadd.f32 %v1870_v24, %v625_v6  ;;  %v888_v10 = vadd.f32 %v2540_v33, %v734_v16  ;;  %v626_v53 = vadd.f32 %v2512_v20, %v467_v63  ;;  %v486_v33 = vadd.f32 %v2542_v34, %v2504_v13 }
 0x12a   : > { %v2604_v46 = vpop.f32.mrf.mxu1  ;;  %v2608_v51 = vpop.f32.mrf.mxu0  ;;  %v629_v0 = vadd.f32 %v2514_v4, %v478_v42  ;;  %v627_v17 = vadd.f32 %v2518_v58, %v470_v14  ;;  %v889_v20 = vadd.f32 %v2546_v9, %v735_v57  ;;  %v1132_v32 = vadd.f32 %v1911_v19, %v1020_v5  ;;  %v2793_v14 = vld [vmem:[#allocation6_spill] sm:$0xff] }
 0x12b   : > { %v1018_v23 = vadd.f32 %v971_v8, %v888_v10  ;;  %v891_v15 = vadd.f32 %v2544_v37, %v737_v62  ;;  %v738_v28 = vadd.f32 %v2558_v49, %v626_v53  ;;  %v632_v13 = vadd.f32 %v2522_v22, %v491_v41  ;;  %v2664_v22 = vld [vmem:[%s2763_s2] ss:$0 sm:$0xff] }
 0x12c   : > { %v2610_v36 = vpop.f32.mrf.mxu1  ;;  %v2613_v52 = vpop.f32.mrf.mxu0  ;;  %v741_v37 = vadd.f32 %v2562_v35, %v629_v0  ;;  %v739_v18 = vadd.f32 %v2566_v47, %v627_v17  ;;  %v630_v34 = vadd.f32 %v2526_v7, %v483_v55  ;;  %v633_v58 = vadd.f32 %v2530_v25, %v494_v27  ;;  %v2788_v25 = vld [vmem:[#allocation4_spill] sm:$0xff] }
 0x12d   : > { %v1021_v3 = vadd.f32 %v1898_v11, %v891_v15  ;;  %v1019_v26 = vadd.f32 %v974_v48, %v889_v20  ;;  %v1130_v49 = vadd.f32 %v2578_v31, %v1018_v23  ;;  %v744_v9 = vadd.f32 %v2570_v39, %v632_v13  ;;  %v2789_v31 = vld [vmem:[#allocation14_spill] sm:$0xff]  ;;  %v2790_v39 = vld [vmem:[#allocation12_spill] sm:$0xff] }
 0x12e   : > { %v2617_v1 = vpop.f32.mrf.mxu1  ;;  %v2622_v40 = vpop.f32.mrf.mxu0  ;;  %v742_v19 = vadd.f32 %v2785_v50, %v630_v34  ;;  %v631_v35 = vadd.f32 %v2786_v45, %v486_v33  ;;  %v894_v47 = vadd.f32 %v2787_v54, %v740_v60  ;;  %v892_v48 = vadd.f32 %v2788_v25, %v738_v28  ;;  %v2791_v62 = vld [vmem:[#allocation19_spill] sm:$0xff]  ;;  %v2797_v0 = vld [vmem:[#allocation8_spill] sm:$0xff] }
 0x12f   : > { %v1133_v16 = vadd.f32 %v2789_v31, %v1021_v3  ;;  %v745_v63 = vadd.f32 %v2790_v39, %v633_v58  ;;  %v895_v42 = vadd.f32 %v2792_v21, %v741_v37  ;;  %v893_v57 = vadd.f32 %v2793_v14, %v739_v18  ;;  %v2796_v33 = vld [vmem:[#allocation7_spill] sm:$0xff]  ;;  %v2804_v14 = vld [vmem:[#allocation10_spill] sm:$0xff] }
 0x130   : > { %v2628_v43 = vpop.f32.mrf.mxu1  ;;  %v1939_v38 = vpop.f32.mrf.mxu0  ;;  %v1024_v12 = vadd.f32 %v2791_v62, %v894_v47  ;;  %v1131_v27 = vadd.f32 %v2794_v2, %v1019_v26  ;;  %v2795_v53 = vld [vmem:[#allocation21_spill] sm:$0xff]  ;;  %v898_v60 = vadd.f32 %v2796_v33, %v744_v9  ;;  %v896_v17 = vadd.f32 %v2797_v0, %v742_v19  ;;  %v2800_v26 = vld [vmem:[#allocation16_spill] sm:$0xff] }
 0x131   : > { %v1022_v23 = vadd.f32 %v2795_v53, %v892_v48  ;;  %v1025_v15 = vadd.f32 %v2604_v46, %v895_v42  ;;  %v1023_v34 = vadd.f32 %v2610_v36, %v893_v57  ;;  %v2801_v47 = vld [vmem:[#allocation17_spill] sm:$0xff] }
 0x132   : > { %v2636_v6 = vpop.f32.mrf.mxu1  ;;  %v1367_v30 = vpop.f32.mrf.mxu0  ;;  %v1028_v54 = vadd.f32 %v2617_v1, %v898_v60  ;;  %v1026_v31 = vadd.f32 %v2628_v43, %v896_v17 }
 0x134   : > { %v2647_v29 = vpop.f32.mrf.mxu1  ;;  %v1940_v24 = vpop.f32.mrf.mxu0  ;;  %v1138_v33 = vadd.f32 %v2608_v51, %v1026_v31 }
 0x136   : > { %v1925_v4 = vpop.f32.mrf.mxu1  ;;  %v1370_v11 = vpop.f32.mrf.mxu0 }
 0x137   : > { %v1286_v8 = vadd.f32 %v1925_v4, %v1132_v32  ;;  %v2799_v4 = vld [vmem:[#allocation9_spill] sm:$0xff] }
 0x138   : > { %v1237_v7 = vpop.f32.mrf.mxu1  ;;  %v1943_v56 = vpop.f32.mrf.mxu0  ;;  %v899_v58 = vadd.f32 %v2799_v4, %v745_v63 }
 0x139   : > { %v1416_v59 = vadd.f32 %v1939_v38, %v1286_v8  ;;  %v1284_v61 = vadd.f32 %v1237_v7, %v1130_v49  ;;  %v1136_v8 = vadd.f32 %v2800_v26, %v1024_v12  ;;  %v1134_v7 = vadd.f32 %v2801_v47, %v1022_v23 }
 0x13a   : > { %v1926_v5 = vpop.f32.mrf.mxu1  ;;  %v1383_v38 = vpop.f32.mrf.mxu0 }
 0x13b   : > { %v1435_v10 = vadd.f32 %v2664_v22, %v1416_v59  ;;  %v1414_v41 = vadd.f32 %v1367_v30, %v1284_v61  ;;  %v1287_v55 = vadd.f32 %v1926_v5, %v1133_v16  ;;  %v2798_v30 = vld [vmem:[#allocation13_spill] sm:$0xff] }
 0x13c   : > { %v1240_v28 = vpop.f32.mrf.mxu1  ;;  %v1944_v18 = vpop.f32.mrf.mxu0  ;;  %v743_v13 = vadd.f32 %v2798_v30, %v631_v35  ;;  %v2802_v35 = vld [vmem:[#allocation18_spill] sm:$0xff] }
 0x13d   : > { %v1447_v3 = vsub.f32 0.0, %v1435_v10  ;;  %v1433_v20 = vadd.f32 %v2664_v22, %v1414_v41  ;;  %v1417_v32 = vadd.f32 %v1940_v24, %v1287_v55  ;;  %v1285_v37 = vadd.f32 %v1240_v28, %v1131_v27 }
 0x13e   : > { %v1929_v46 = vpop.f32.mrf.mxu1  ;;  %v1386_v45 = vpop.f32.mrf.mxu0  ;;  %v1137_v48 = vadd.f32 %v2802_v35, %v1025_v15  ;;  %v897_v57 = vadd.f32 %v2804_v14, %v743_v13  ;;  %v1140_v55 = vadd.f32 %v2602_v44, %v1028_v54  ;;  %v1029_v27 = vadd.f32 %v2636_v6, %v899_v58 }
 0x13f   : > { %v1461_v49 = vmul.f32 1.442695, %v1447_v3  ;;  %v1445_v9 = vsub.f32 0.0, %v1433_v20  ;;  %v1436_v50 = vadd.f32 %v2664_v22, %v1417_v32  ;;  %v1415_v19 = vadd.f32 %v1370_v11, %v1285_v37  ;;  %v2803_v11 = vld [vmem:[#allocation20_spill] sm:$0xff] }
 0x140   : > { %v1290_v24 = vadd.f32 %v1929_v46, %v1136_v8  ;;  %v1253_v25 = vpop.f32.mrf.mxu1  ;;  %v1135_v62 = vadd.f32 %v2803_v11, %v1023_v34  ;;  %v1947_v42 = vpop.f32.mrf.mxu0  ;;  %v1027_v44 = vadd.f32 %v2647_v29, %v897_v57  ;;  %v1141_v51 = vadd.f32 %v2613_v52, %v1029_v27 }
 0x141   : > { %2014 = vpow2.f32 %v1461_v49  ;;  %v1457_v36 = vmul.f32 1.442695, %v1445_v9  ;;  %v1448_v59 = vsub.f32 0.0, %v1436_v50  ;;  %v1434_v61 = vadd.f32 %v2664_v22, %v1415_v19 }
 0x142   : > { %v1420_v16 = vadd.f32 %v1943_v56, %v1290_v24  ;;  %v1288_v39 = vadd.f32 %v1253_v25, %v1134_v7  ;;  %v1930_v63 = vpop.f32.mrf.mxu1  ;;  %v1139_v46 = vadd.f32 %v2622_v40, %v1027_v44 }
 0x143   : > { %2016 = vpow2.f32 %v1457_v36  ;;  %v1463_v1 = vmul.f32 1.442695, %v1448_v59  ;;  %v1446_v12 = vsub.f32 0.0, %v1434_v61  ;;  %v1291_v21 = vadd.f32 %v1930_v63, %v1137_v48 }
 0x144   : > { %v1439_v5 = vadd.f32 %v2664_v22, %v1420_v16  ;;  %v1418_v10 = vadd.f32 %v1383_v38, %v1288_v39  ;;  %v1256_v41 = vpop.f32.mrf.mxu1  ;;  %v1399_v38 = vpop.f32.mrf.mxu0 }
 0x145   : > { %2018 = vpow2.f32 %v1463_v1  ;;  %v1459_v43 = vmul.f32 1.442695, %v1446_v12  ;;  %v1421_v56 = vadd.f32 %v1944_v18, %v1291_v21  ;;  %v1289_v2 = vadd.f32 %v1256_v41, %v1135_v62 }
 0x146   : > { %v1451_v53 = vsub.f32 0.0, %v1439_v5  ;;  %v1437_v23 = vadd.f32 %v2664_v22, %v1418_v10  ;;  %v1933_v15 = vpop.f32.mrf.mxu1  ;;  %v1948_v26 = vpop.f32.mrf.mxu0 }
 0x147   : > { %2020 = vpow2.f32 %v1459_v43  ;;  %v1440_v60 = vadd.f32 %v2664_v22, %v1421_v56  ;;  %v1419_v0 = vadd.f32 %v1386_v45, %v1289_v2  ;;  %v1294_v17 = vadd.f32 %v1933_v15, %v1140_v55 }
 0x148   : > { %v1469_v28 = vmul.f32 1.442695, %v1451_v53  ;;  %v1449_v3 = vsub.f32 0.0, %v1437_v23  ;;  %v1269_v20 = vpop.f32.mrf.mxu1  ;;  %v1402_v25 = vpop.f32.mrf.mxu0 }
 0x149   : > { %v1452_v32 = vsub.f32 0.0, %v1440_v60  ;;  %v1438_v6 = vadd.f32 %v2664_v22, %v1419_v0  ;;  %v1424_v37 = vadd.f32 %v1947_v42, %v1294_v17  ;;  %v1292_v18 = vadd.f32 %v1269_v20, %v1138_v33 }
 0x14a   : > { %2022 = vpow2.f32 %v1469_v28  ;;  %v1465_v30 = vmul.f32 1.442695, %v1449_v3  ;;  %v1934_v13 = vpop.f32.mrf.mxu1 }
 0x14b   : > { %v1471_v34 = vmul.f32 1.442695, %v1452_v32  ;;  %v1450_v4 = vsub.f32 0.0, %v1438_v6  ;;  %v1443_v58 = vadd.f32 %v2664_v22, %v1424_v37  ;;  %v1422_v29 = vadd.f32 %v1399_v38, %v1292_v18 }
 0x14c   : > { %2024 = vpow2.f32 %v1465_v30  ;;  %v1295_v8 = vadd.f32 %v1934_v13, %v1141_v51  ;;  %v1272_v49 = vpop.f32.mrf.mxu1 }
 0x14d   : > { %2026 = vpow2.f32 %v1471_v34  ;;  %v1467_v9 = vmul.f32 1.442695, %v1450_v4  ;;  %v1455_v50 = vsub.f32 0.0, %v1443_v58  ;;  %v1441_v19 = vadd.f32 %v2664_v22, %v1422_v29 }
 0x14e   : > { %v2015_v52 = vpop.eup %2014  ;;  %v1425_v45 = vadd.f32 %v1948_v26, %v1295_v8  ;;  %v1293_v54 = vadd.f32 %v1272_v49, %v1139_v46 }
 0x14f   : > { %v1483_v24 = vadd.f32 1.0, %v2015_v52  ;;  %2028 = vpow2.f32 %v1467_v9  ;;  %v1477_v47 = vmul.f32 1.442695, %v1455_v50  ;;  %v1453_v7 = vsub.f32 0.0, %v1441_v19 }
 0x150   : > { %v2017_v35 = vpop.eup %2016  ;;  %v1444_v40 = vadd.f32 %v2664_v22, %v1425_v45  ;;  %v1423_v48 = vadd.f32 %v1402_v25, %v1293_v54 }
 0x151   : > { %2030 = vrcp.f32 %v1483_v24  ;;  %v1481_v36 = vadd.f32 1.0, %v2017_v35  ;;  %v1473_v59 = vmul.f32 1.442695, %v1453_v7 }
 0x152   : > { %v2019_v61 = vpop.eup %2018  ;;  %2032 = vpow2.f32 %v1477_v47  ;;  %v1456_v31 = vsub.f32 0.0, %v1444_v40  ;;  %v1442_v16 = vadd.f32 %v2664_v22, %v1423_v48 }
 0x153   : > { %2034 = vrcp.f32 %v1481_v36  ;;  %v1484_v39 = vadd.f32 1.0, %v2019_v61 }
 0x154   : > { %v2021_v63 = vpop.eup %2020  ;;  %2036 = vpow2.f32 %v1473_v59  ;;  %v1479_v11 = vmul.f32 1.442695, %v1456_v31  ;;  %v1454_v62 = vsub.f32 0.0, %v1442_v16 }
 0x155   : > { %2038 = vrcp.f32 %v1484_v39  ;;  %v1482_v1 = vadd.f32 1.0, %v2021_v63 }
 0x156   : > { %2040 = vpow2.f32 %v1479_v11  ;;  %v1475_v12 = vmul.f32 1.442695, %v1454_v62 }
 0x157   : > { %v2023_v21 = vpop.eup %2022  ;;  %2042 = vrcp.f32 %v1482_v1 }
 0x158   : > { %v1487_v42 = vadd.f32 1.0, %v2023_v21  ;;  %2044 = vpow2.f32 %v1475_v12 }
 0x159   : > { %v2025_v22 = vpop.eup %2024 }
 0x15a   : > { %v2027_v14 = vpop.eup %2026  ;;  %2046 = vrcp.f32 %v1487_v42  ;;  %v1485_v57 = vadd.f32 1.0, %v2025_v22 }
 0x15b   : > { %v1488_v5 = vadd.f32 1.0, %v2027_v14 }
 0x15c   : > { %v2029_v10 = vpop.eup %2028  ;;  %2048 = vrcp.f32 %v1485_v57 }
 0x15d   : > { %2050 = vrcp.f32 %v1488_v5  ;;  %v1486_v41 = vadd.f32 1.0, %v2029_v10 }
 0x15e   : > { %v2031_v55 = vpop.eup %2030 }
 0x15f   : > { %v2033_v43 = vpop.eup %2032  ;;  %v1750_v56 = vpack.c.bf16 %v2031_v55, %v2031_v55  ;;  %2052 = vrcp.f32 %v1486_v41 }
 0x160   : > { %v2035_v2 = vpop.eup %2034  ;;  %v1491_v27 = vadd.f32 1.0, %v2033_v43 }
 0x161   : > { %v2037_v53 = vpop.eup %2036  ;;  %1556 = vst.msk [vmem:[%s2720_s5 + $0x8] sm:$0xf] %vm1553_vm8, %v1750_v56  ;;  %v1748_v23 = vpack.c.bf16 %v2035_v2, %v2035_v2 }
 0x162   : > { %v2039_v15 = vpop.eup %2038  ;;  %2054 = vrcp.f32 %v1491_v27  ;;  %v1489_v33 = vadd.f32 1.0, %v2037_v53 }
 0x163   : > { %v2041_v60 = vpop.eup %2040  ;;  %1554 = vst.msk [vmem:[%s2720_s5] sm:$0xf] %vm1553_vm8, %v1748_v23  ;;  %v1751_v0 = vpack.c.bf16 %v2039_v15, %v2039_v15 }
 0x164   : > { %v2043_v38 = vpop.eup %2042  ;;  %2056 = vrcp.f32 %v1489_v33  ;;  %v1492_v17 = vadd.f32 1.0, %v2041_v60 }
 0x165   : > { %v2045_v44 = vpop.eup %2044  ;;  %1557 = vst.msk [vmem:[%s2720_s5 + $0xc] sm:$0xf] %vm1553_vm8, %v1751_v0  ;;  %v1749_v28 = vpack.c.bf16 %v2043_v38, %v2043_v38 }
 0x166   : > { %2058 = vrcp.f32 %v1492_v17  ;;  %v1490_v3 = vadd.f32 1.0, %v2045_v44 }
 0x167   : > { %v2047_v20 = vpop.eup %2046  ;;  %1555 = vst.msk [vmem:[%s2720_s5 + $0x4] sm:$0xf] %vm1553_vm8, %v1749_v28 }
 0x168   : > { %v1754_v32 = vpack.c.bf16 %v2047_v20, %v2047_v20  ;;  %2060 = vrcp.f32 %v1490_v3 }
 0x169   : > { %v2049_v6 = vpop.eup %2048 }
 0x16a   : > { %v2051_v37 = vpop.eup %2050  ;;  %1560 = vst.msk [vmem:[%s2720_s5 + $0x18] sm:$0xf] %vm1553_vm8, %v1754_v32  ;;  %v1752_v18 = vpack.c.bf16 %v2049_v6, %v2049_v6 }
 0x16b   : > { %v1755_v30 = vpack.c.bf16 %v2051_v37, %v2051_v37 }
 0x16c   : > { %v2053_v51 = vpop.eup %2052  ;;  %1558 = vst.msk [vmem:[%s2720_s5 + $0x10] sm:$0xf] %vm1553_vm8, %v1752_v18 }
 0x16d   : > { %1561 = vst.msk [vmem:[%s2720_s5 + $0x1c] sm:$0xf] %vm1553_vm8, %v1755_v30  ;;  %v1753_v13 = vpack.c.bf16 %v2053_v51, %v2053_v51 }
 0x16f   : > { %v2055_v34 = vpop.eup %2054  ;;  %1559 = vst.msk [vmem:[%s2720_s5 + $0x14] sm:$0xf] %vm1553_vm8, %v1753_v13 }
 0x170   : > { %v1758_v4 = vpack.c.bf16 %v2055_v34, %v2055_v34 }
 0x171   : > { %v2057_v58 = vpop.eup %2056 }
 0x172   : > { %1564 = vst.msk [vmem:[%s2720_s5 + $0x28] sm:$0xf] %vm1553_vm8, %v1758_v4  ;;  %v1756_v26 = vpack.c.bf16 %v2057_v58, %v2057_v58 }
 0x173   : > { %v2059_v29 = vpop.eup %2058 }
 0x174   : > { %1562 = vst.msk [vmem:[%s2720_s5 + $0x20] sm:$0xf] %vm1553_vm8, %v1756_v26  ;;  %v1759_v8 = vpack.c.bf16 %v2059_v29, %v2059_v29 }
 0x175   : > { %v2061_v46 = vpop.eup %2060 }
 0x176   : > { %1565 = vst.msk [vmem:[%s2720_s5 + $0x2c] sm:$0xf] %vm1553_vm8, %v1759_v8  ;;  %v1757_v49 = vpack.c.bf16 %v2061_v46, %v2061_v46 }
 0x178   : > { %1563 = vst.msk [vmem:[%s2720_s5 + $0x24] sm:$0xf] %vm1553_vm8, %v1757_v49 }
 0x179 PF: > { %s13_s16 = sadd.s32 1, %s2100_s16   ;;  %s2806_s12 = smov %s2092_s14 }
 0x17a   : > { %p10_p7 = scmp.ge.s32.totalorder %s13_s16, 8   ;;  %s2807_s13 = smov %s2096_s15 }
 0x17b   : > { %s2808_s14 = smov %s2811_s17  ;;  %s2809_s15 = smov %s2815_s18 }
 0x17c   :  { %12 = sbr.rel (!%p10_p7) target bundleno = 3 (0x3), region = 71 }

</bundles_post_ra>
